<compile_context>
chip_gen: v7x
topology: tpu7x:2x2x1
jax: 0.10.0
libtpu: 0.0.40
codegen_flags: <defaults>
</compile_context>

<pallas_src>
import math

import jax
import jax.numpy as jnp
from jax.experimental import pallas as pl
from jax.experimental.pallas import tpu as pltpu

# ---- small synthetic config (distilbert-base scaled down) ----
BATCH = 2
SEQ = 8
DIM = 64
N_HEADS = 4
HEAD_DIM = DIM // N_HEADS
FFN_DIM = 128
N_LAYERS = 2
VOCAB = 100
NUM_LABELS = 6
NUM_LABELS_PAD = 128          # lane-dense classifier output
LN_EPS = 1e-12
MASK_BIG = 1e9                # additive mask magnitude (avoids NaN of finfo.min softmax)

ROWS = BATCH * SEQ            # activations are (B*S, D)


def _layer_norm(x, g, b):
    mu = jnp.mean(x, axis=-1, keepdims=True)
    var = jnp.mean((x - mu) ** 2, axis=-1, keepdims=True)
    return (x - mu) * jax.lax.rsqrt(var + LN_EPS) * g + b


def _mm(a, b):
    # MXU matmul with bf16 operands, f32 accumulation.
    return jnp.dot(a.astype(jnp.bfloat16), b.astype(jnp.bfloat16),
                   preferred_element_type=jnp.float32)


def _mm_nt(a, b):
    # a (m,k) x b (n,k) -> (m,n), contracting last dims of both (no materialized transpose).
    return jax.lax.dot_general(a.astype(jnp.bfloat16), b.astype(jnp.bfloat16),
                               dimension_numbers=(((1,), (1,)), ((), ())),
                               preferred_element_type=jnp.float32)


# ----------------------------- fused Pallas kernel -----------------------------

def fused_model_kernel(emb_ref, mask_ref, eg_ref, eb_ref,
                       wq_ref, bq_ref, wk_ref, bk_ref, wv_ref, bv_ref,
                       wo_ref, bo_ref, sg_ref, sb_ref,
                       w1_ref, b1_ref, w2_ref, b2_ref, og_ref, ob_ref,
                       wp_ref, bp_ref, wc_ref, bc_ref, o_ref):
    # emb: (B*S, D) f32, mask: (B, 1, S) additive f32, weights stacked over (layer[, head]).
    scale = 1.0 / math.sqrt(HEAD_DIM)

    # --- embedding LayerNorm ---
    x = _layer_norm(emb_ref[...], eg_ref[...], eb_ref[...])            # (B*S, D)

    # --- transformer blocks (static unroll over the small layer count) ---
    for l in range(N_LAYERS):
        xb = x.astype(jnp.bfloat16)                                    # cast once per layer
        attn = jnp.zeros((ROWS, DIM), jnp.float32)
        for h in range(N_HEADS):
            # per-head projections: slice the weight *refs*, not activation vregs
            qh = jnp.dot(xb, wq_ref[l, h], preferred_element_type=jnp.float32) + bq_ref[l, h]
            kh = jnp.dot(xb, wk_ref[l, h], preferred_element_type=jnp.float32) + bk_ref[l, h]
            vh = jnp.dot(xb, wv_ref[l, h], preferred_element_type=jnp.float32) + bv_ref[l, h]
            ctx_rows = []
            for b in range(BATCH):                                     # per-batch (S,S) attention
                rows = slice(b * SEQ, (b + 1) * SEQ)                   # sublane-aligned row slice
                qb = qh[rows] * scale
                s = _mm_nt(qb, kh[rows])                               # (S, S)
                s = s + mask_ref[b]                                    # additive key mask (1, S)
                p = jax.nn.softmax(s, axis=-1)
                ctx_rows.append(_mm(p, vh[rows]))                      # (S, Hd)
            ctx = jnp.concatenate(ctx_rows, axis=0)                    # (B*S, Hd) sublane concat
            # accumulate output projection per head (no lane-dim concat of heads)
            attn = attn + jnp.dot(ctx.astype(jnp.bfloat16), wo_ref[l, h],
                                  preferred_element_type=jnp.float32)
        attn = attn + bo_ref[l]
        h1 = _layer_norm(x + attn, sg_ref[l], sb_ref[l])               # sa_layer_norm(residual)
        f = jnp.dot(h1.astype(jnp.bfloat16), w1_ref[l], preferred_element_type=jnp.float32) + b1_ref[l]
        # TODO(synk): DistilBERT uses exact (erf) GELU; tanh approximation used for a guaranteed
        # Mosaic lowering.
        f = jax.nn.gelu(f, approximate=True)
        f = jnp.dot(f.astype(jnp.bfloat16), w2_ref[l], preferred_element_type=jnp.float32) + b2_ref[l]
        x = _layer_norm(h1 + f, og_ref[l], ob_ref[l])                  # output_layer_norm(residual)

    # --- classification head on every position (wrapper picks the [CLS] rows) ---
    p = jnp.dot(x.astype(jnp.bfloat16), wp_ref[...], preferred_element_type=jnp.float32) + bp_ref[...]
    p = jnp.maximum(p, 0.0)                                            # ReLU; dropout = identity
    o_ref[...] = jnp.dot(p.astype(jnp.bfloat16), wc_ref[...],
                         preferred_element_type=jnp.float32) + bc_ref[...]


_VMEM = pl.BlockSpec(memory_space=pltpu.MemorySpace.VMEM)
_N_KERNEL_INPUTS = 24


# ----------------------------- parameters & forward -----------------------------

def init_params(key):
    def nrm(k, shape, scale=0.02):
        return scale * jax.random.normal(k, shape, dtype=jnp.float32)

    keys = iter(jax.random.split(key, 64))
    params = {
        "word_emb": nrm(next(keys), (VOCAB, DIM)),
        "pos_emb": nrm(next(keys), (SEQ, DIM)),
        "emb_ln_g": jnp.ones((1, DIM), jnp.float32),
        "emb_ln_b": jnp.zeros((1, DIM), jnp.float32),
        "layers": [],
        "wp": nrm(next(keys), (DIM, DIM)),               # pre_classifier
        "bp": jnp.zeros((1, DIM), jnp.float32),
        "wc": nrm(next(keys), (DIM, NUM_LABELS)),        # classifier
        "bc": jnp.zeros((1, NUM_LABELS), jnp.float32),
    }
    for _ in range(N_LAYERS):
        params["layers"].append({
            "wq": nrm(next(keys), (DIM, DIM)), "bq": jnp.zeros((1, DIM), jnp.float32),
            "wk": nrm(next(keys), (DIM, DIM)), "bk": jnp.zeros((1, DIM), jnp.float32),
            "wv": nrm(next(keys), (DIM, DIM)), "bv": jnp.zeros((1, DIM), jnp.float32),
            "wo": nrm(next(keys), (DIM, DIM)), "bo": jnp.zeros((1, DIM), jnp.float32),
            "sa_g": jnp.ones((1, DIM), jnp.float32), "sa_b": jnp.zeros((1, DIM), jnp.float32),
            "w1": nrm(next(keys), (DIM, FFN_DIM)), "b1": jnp.zeros((1, FFN_DIM), jnp.float32),
            "w2": nrm(next(keys), (FFN_DIM, DIM)), "b2": jnp.zeros((1, DIM), jnp.float32),
            "out_g": jnp.ones((1, DIM), jnp.float32), "out_b": jnp.zeros((1, DIM), jnp.float32),
        })
    return params


def pack_params(params):
    """Stack per-layer weights, pre-split attention weights per head, pad classifier to 128 lanes."""
    layers = params["layers"]
    bf16 = jnp.bfloat16

    def split_in(w):     # (D, D) -> (H, D, Hd): column block of head h
        return w.reshape(DIM, N_HEADS, HEAD_DIM).transpose(1, 0, 2)

    def split_out(w):    # (D, D) -> (H, Hd, D): row block of head h
        return w.reshape(N_HEADS, HEAD_DIM, DIM)

    def split_bias(b):   # (1, D) -> (H, 1, Hd)
        return b.reshape(N_HEADS, 1, HEAD_DIM)

    def stack(fn, name, cast=None):
        a = jnp.stack([fn(lyr[name]) for lyr in layers])
        return a.astype(cast) if cast is not None else a

    ident = lambda a: a
    packed = {
        "emb_g": params["emb_ln_g"], "emb_b": params["emb_ln_b"],
        "wq": stack(split_in, "wq", bf16), "bq": stack(split_bias, "bq"),
        "wk": stack(split_in, "wk", bf16), "bk": stack(split_bias, "bk"),
        "wv": stack(split_in, "wv", bf16), "bv": stack(split_bias, "bv"),
        "wo": stack(split_out, "wo", bf16), "bo": stack(ident, "bo"),
        "sa_g": stack(ident, "sa_g"), "sa_b": stack(ident, "sa_b"),
        "w1": stack(ident, "w1", bf16), "b1": stack(ident, "b1"),
        "w2": stack(ident, "w2", bf16), "b2": stack(ident, "b2"),
        "out_g": stack(ident, "out_g"), "out_b": stack(ident, "out_b"),
        "wp": params["wp"].astype(bf16), "bp": params["bp"],
        "wc": jnp.zeros((DIM, NUM_LABELS_PAD), jnp.float32)
              .at[:, :NUM_LABELS].set(params["wc"]).astype(bf16),
        "bc": jnp.zeros((1, NUM_LABELS_PAD), jnp.float32)
              .at[:, :NUM_LABELS].set(params["bc"]),
    }
    return packed


def intent_classifier_forward(params, packed, input_ids, attention_mask):
    # --- embeddings (gather is plain-JAX glue) ---
    tok = jnp.take(params["word_emb"], input_ids, axis=0)            # (B, S, D)
    pos = params["pos_emb"][None, :, :]                              # (1, S, D)
    emb = (tok + pos).reshape(ROWS, DIM)                             # (B*S, D)

    # additive attention mask: 0 for keep, -1e9 for pad (finite even for all-pad rows)
    mask_add = (attention_mask.astype(jnp.float32) - 1.0).reshape(BATCH, 1, SEQ) * MASK_BIG

    out = pl.pallas_call(
        fused_model_kernel,
        out_shape=jax.ShapeDtypeStruct((ROWS, NUM_LABELS_PAD), jnp.float32),
        in_specs=[_VMEM] * _N_KERNEL_INPUTS,
        out_specs=_VMEM,
    )(emb, mask_add, packed["emb_g"], packed["emb_b"],
      packed["wq"], packed["bq"], packed["wk"], packed["bk"], packed["wv"], packed["bv"],
      packed["wo"], packed["bo"], packed["sa_g"], packed["sa_b"],
      packed["w1"], packed["b1"], packed["w2"], packed["b2"], packed["out_g"], packed["out_b"],
      packed["wp"], packed["bp"], packed["wc"], packed["bc"])

    # pooled = hidden[:, 0] -> logits rows at [CLS] positions, first NUM_LABELS lanes
    logits = out.reshape(BATCH, SEQ, NUM_LABELS_PAD)[:, 0, :NUM_LABELS]
    return logits


if __name__ == "__main__":
    key = jax.random.PRNGKey(0)
    k_param, k_ids = jax.random.split(key)

    params = init_params(k_param)
    packed = pack_params(params)

    input_ids = jax.random.randint(k_ids, (BATCH, SEQ), 0, VOCAB, dtype=jnp.int32)
    attention_mask = jnp.ones((BATCH, SEQ), dtype=jnp.int32)
    attention_mask = attention_mask.at[1, SEQ - 2:].set(0)           # pad last 2 tokens of batch 1

    logits = intent_classifier_forward(params, packed, input_ids, attention_mask)
    logits = jax.block_until_ready(logits)

    assert logits.shape == (BATCH, NUM_LABELS)
    assert bool(jnp.all(jnp.isfinite(logits)))
    print("KERNEL_OK")
</pallas_src>

<mosaic_0001>
module attributes {stable_mosaic.version = 11 : i64} {
  func.func @fused_model_kernel(%arg0: memref<16x64xf32, #tpu.memory_space<vmem>>, %arg1: memref<2x1x8xf32, #tpu.memory_space<vmem>>, %arg2: memref<1x64xf32, #tpu.memory_space<vmem>>, %arg3: memref<1x64xf32, #tpu.memory_space<vmem>>, %arg4: memref<2x4x64x16xbf16, #tpu.memory_space<vmem>>, %arg5: memref<2x4x1x16xf32, #tpu.memory_space<vmem>>, %arg6: memref<2x4x64x16xbf16, #tpu.memory_space<vmem>>, %arg7: memref<2x4x1x16xf32, #tpu.memory_space<vmem>>, %arg8: memref<2x4x64x16xbf16, #tpu.memory_space<vmem>>, %arg9: memref<2x4x1x16xf32, #tpu.memory_space<vmem>>, %arg10: memref<2x4x16x64xbf16, #tpu.memory_space<vmem>>, %arg11: memref<2x1x64xf32, #tpu.memory_space<vmem>>, %arg12: memref<2x1x64xf32, #tpu.memory_space<vmem>>, %arg13: memref<2x1x64xf32, #tpu.memory_space<vmem>>, %arg14: memref<2x64x128xbf16, #tpu.memory_space<vmem>>, %arg15: memref<2x1x128xf32, #tpu.memory_space<vmem>>, %arg16: memref<2x128x64xbf16, #tpu.memory_space<vmem>>, %arg17: memref<2x1x64xf32, #tpu.memory_space<vmem>>, %arg18: memref<2x1x64xf32, #tpu.memory_space<vmem>>, %arg19: memref<2x1x64xf32, #tpu.memory_space<vmem>>, %arg20: memref<64x64xbf16, #tpu.memory_space<vmem>>, %arg21: memref<1x64xf32, #tpu.memory_space<vmem>>, %arg22: memref<64x128xbf16, #tpu.memory_space<vmem>>, %arg23: memref<1x128xf32, #tpu.memory_space<vmem>>, %arg24: memref<16x128xf32, #tpu.memory_space<vmem>>) attributes {dimension_semantics = [], scalar_prefetch = 0 : i64, scratch_operands = 0 : i64, tpu.core_type = #tpu.core_type<tc>} {
    %c0 = arith.constant 0 : index
    %c0_0 = arith.constant 0 : index
    %0 = vector.load %arg0[%c0, %c0_0] : memref<16x64xf32, #tpu.memory_space<vmem>>, vector<16x64xf32>
    %c0_1 = arith.constant 0 : index
    %c0_2 = arith.constant 0 : index
    %1 = vector.load %arg2[%c0_1, %c0_2] : memref<1x64xf32, #tpu.memory_space<vmem>>, vector<1x64xf32>
    %c0_3 = arith.constant 0 : index
    %c0_4 = arith.constant 0 : index
    %2 = vector.load %arg3[%c0_3, %c0_4] : memref<1x64xf32, #tpu.memory_space<vmem>>, vector<1x64xf32>
    %cst = arith.constant dense<0.000000e+00> : vector<16xf32>
    %3 = vector.multi_reduction <add>, %0, %cst [1] : vector<16x64xf32> to vector<16xf32>
    %4 = vector.shape_cast %3 : vector<16xf32> to vector<16x1xf32>
    %cst_5 = arith.constant 6.400000e+01 : f32
    %5 = vector.broadcast %cst_5 : f32 to vector<16x1xf32>
    %6 = arith.divf %4, %5 : vector<16x1xf32>
    %7 = vector.broadcast %6 : vector<16x1xf32> to vector<16x64xf32>
    %8 = arith.subf %0, %7 : vector<16x64xf32>
    %9 = arith.mulf %8, %8 : vector<16x64xf32>
    %cst_6 = arith.constant dense<0.000000e+00> : vector<16xf32>
    %10 = vector.multi_reduction <add>, %9, %cst_6 [1] : vector<16x64xf32> to vector<16xf32>
    %11 = vector.shape_cast %10 : vector<16xf32> to vector<16x1xf32>
    %cst_7 = arith.constant 6.400000e+01 : f32
    %12 = vector.broadcast %cst_7 : f32 to vector<16x1xf32>
    %13 = arith.divf %11, %12 : vector<16x1xf32>
    %14 = vector.broadcast %6 : vector<16x1xf32> to vector<16x64xf32>
    %15 = arith.subf %0, %14 : vector<16x64xf32>
    %cst_8 = arith.constant 9.99999996E-13 : f32
    %16 = vector.broadcast %cst_8 : f32 to vector<16x1xf32>
    %17 = arith.addf %13, %16 : vector<16x1xf32>
    %18 = math.rsqrt %17 : vector<16x1xf32>
    %19 = vector.broadcast %18 : vector<16x1xf32> to vector<16x64xf32>
    %20 = arith.mulf %15, %19 : vector<16x64xf32>
    %21 = vector.broadcast %1 : vector<1x64xf32> to vector<16x64xf32>
    %22 = arith.mulf %20, %21 : vector<16x64xf32>
    %23 = vector.broadcast %2 : vector<1x64xf32> to vector<16x64xf32>
    %24 = arith.addf %22, %23 : vector<16x64xf32>
    %25 = arith.truncf %24 : vector<16x64xf32> to vector<16x64xbf16>
    %cst_9 = arith.constant 0.000000e+00 : f32
    %26 = vector.broadcast %cst_9 : f32 to vector<16x64xf32>
    %c0_10 = arith.constant 0 : index
    %c0_11 = arith.constant 0 : index
    %c0_12 = arith.constant 0 : index
    %c0_13 = arith.constant 0 : index
    %27 = vector.load %arg4[%c0_10, %c0_11, %c0_12, %c0_13] : memref<2x4x64x16xbf16, #tpu.memory_space<vmem>>, vector<1x1x64x16xbf16>
    %28 = vector.shape_cast %27 : vector<1x1x64x16xbf16> to vector<64x16xbf16>
    %cst_14 = arith.constant dense<0.000000e+00> : vector<16x16xf32>
    %29 = tpu.matmul %25, %28, %cst_14 {dimension_numbers = #tpu.dot_dimension_numbers<[1], [0], [0], [1], [0, 0, 1, 1], [], []>} : vector<16x64xbf16>, vector<64x16xbf16>, vector<16x16xf32> -> vector<16x16xf32>
    %c0_15 = arith.constant 0 : index
    %c0_16 = arith.constant 0 : index
    %c0_17 = arith.constant 0 : index
    %c0_18 = arith.constant 0 : index
    %30 = vector.load %arg5[%c0_15, %c0_16, %c0_17, %c0_18] : memref<2x4x1x16xf32, #tpu.memory_space<vmem>>, vector<1x1x1x16xf32>
    %31 = vector.shape_cast %30 : vector<1x1x1x16xf32> to vector<1x16xf32>
    %32 = vector.broadcast %31 : vector<1x16xf32> to vector<16x16xf32>
    %33 = arith.addf %29, %32 : vector<16x16xf32>
    %c0_19 = arith.constant 0 : index
    %c0_20 = arith.constant 0 : index
    %c0_21 = arith.constant 0 : index
    %c0_22 = arith.constant 0 : index
    %34 = vector.load %arg6[%c0_19, %c0_20, %c0_21, %c0_22] : memref<2x4x64x16xbf16, #tpu.memory_space<vmem>>, vector<1x1x64x16xbf16>
    %35 = vector.shape_cast %34 : vector<1x1x64x16xbf16> to vector<64x16xbf16>
    %cst_23 = arith.constant dense<0.000000e+00> : vector<16x16xf32>
    %36 = tpu.matmul %25, %35, %cst_23 {dimension_numbers = #tpu.dot_dimension_numbers<[1], [0], [0], [1], [0, 0, 1, 1], [], []>} : vector<16x64xbf16>, vector<64x16xbf16>, vector<16x16xf32> -> vector<16x16xf32>
    %c0_24 = arith.constant 0 : index
    %c0_25 = arith.constant 0 : index
    %c0_26 = arith.constant 0 : index
    %c0_27 = arith.constant 0 : index
    %37 = vector.load %arg7[%c0_24, %c0_25, %c0_26, %c0_27] : memref<2x4x1x16xf32, #tpu.memory_space<vmem>>, vector<1x1x1x16xf32>
    %38 = vector.shape_cast %37 : vector<1x1x1x16xf32> to vector<1x16xf32>
    %39 = vector.broadcast %38 : vector<1x16xf32> to vector<16x16xf32>
    %40 = arith.addf %36, %39 : vector<16x16xf32>
    %c0_28 = arith.constant 0 : index
    %c0_29 = arith.constant 0 : index
    %c0_30 = arith.constant 0 : index
    %c0_31 = arith.constant 0 : index
    %41 = vector.load %arg8[%c0_28, %c0_29, %c0_30, %c0_31] : memref<2x4x64x16xbf16, #tpu.memory_space<vmem>>, vector<1x1x64x16xbf16>
    %42 = vector.shape_cast %41 : vector<1x1x64x16xbf16> to vector<64x16xbf16>
    %cst_32 = arith.constant dense<0.000000e+00> : vector<16x16xf32>
    %43 = tpu.matmul %25, %42, %cst_32 {dimension_numbers = #tpu.dot_dimension_numbers<[1], [0], [0], [1], [0, 0, 1, 1], [], []>} : vector<16x64xbf16>, vector<64x16xbf16>, vector<16x16xf32> -> vector<16x16xf32>
    %c0_33 = arith.constant 0 : index
    %c0_34 = arith.constant 0 : index
    %c0_35 = arith.constant 0 : index
    %c0_36 = arith.constant 0 : index
    %44 = vector.load %arg9[%c0_33, %c0_34, %c0_35, %c0_36] : memref<2x4x1x16xf32, #tpu.memory_space<vmem>>, vector<1x1x1x16xf32>
    %45 = vector.shape_cast %44 : vector<1x1x1x16xf32> to vector<1x16xf32>
    %46 = vector.broadcast %45 : vector<1x16xf32> to vector<16x16xf32>
    %47 = arith.addf %43, %46 : vector<16x16xf32>
    %48 = vector.extract_strided_slice %33 {offsets = [0, 0], sizes = [8, 16], strides = [1, 1]} : vector<16x16xf32> to vector<8x16xf32>
    %cst_37 = arith.constant 2.500000e-01 : f32
    %49 = vector.broadcast %cst_37 : f32 to vector<8x16xf32>
    %50 = arith.mulf %48, %49 : vector<8x16xf32>
    %51 = vector.extract_strided_slice %40 {offsets = [0, 0], sizes = [8, 16], strides = [1, 1]} : vector<16x16xf32> to vector<8x16xf32>
    %52 = arith.truncf %50 : vector<8x16xf32> to vector<8x16xbf16>
    %53 = arith.truncf %51 : vector<8x16xf32> to vector<8x16xbf16>
    %cst_38 = arith.constant dense<0.000000e+00> : vector<8x8xf32>
    %54 = tpu.matmul %52, %53, %cst_38 {dimension_numbers = #tpu.dot_dimension_numbers<[1], [1], [0], [0], [0, 0, 1, 0], [], []>} : vector<8x16xbf16>, vector<8x16xbf16>, vector<8x8xf32> -> vector<8x8xf32>
    %c0_39 = arith.constant 0 : index
    %c0_40 = arith.constant 0 : index
    %c0_41 = arith.constant 0 : index
    %55 = vector.load %arg1[%c0_39, %c0_40, %c0_41] : memref<2x1x8xf32, #tpu.memory_space<vmem>>, vector<1x1x8xf32>
    %56 = vector.shape_cast %55 : vector<1x1x8xf32> to vector<1x8xf32>
    %57 = vector.broadcast %56 : vector<1x8xf32> to vector<8x8xf32>
    %58 = arith.addf %54, %57 : vector<8x8xf32>
    %cst_42 = arith.constant dense<0xFF800000> : vector<8xf32>
    %59 = vector.multi_reduction <maximumf>, %58, %cst_42 [1] : vector<8x8xf32> to vector<8xf32>
    %cst_43 = arith.constant 0xFF800000 : f32
    %60 = vector.broadcast %cst_43 : f32 to vector<8xf32>
    %61 = arith.maximumf %60, %59 : vector<8xf32>
    %62 = vector.shape_cast %61 : vector<8xf32> to vector<8x1xf32>
    %63 = vector.broadcast %62 : vector<8x1xf32> to vector<8x8xf32>
    %64 = arith.subf %58, %63 : vector<8x8xf32>
    %65 = math.exp %64 : vector<8x8xf32>
    %cst_44 = arith.constant dense<0.000000e+00> : vector<8xf32>
    %66 = vector.multi_reduction <add>, %65, %cst_44 [1] : vector<8x8xf32> to vector<8xf32>
    %67 = vector.shape_cast %66 : vector<8xf32> to vector<8x1xf32>
    %68 = vector.broadcast %67 : vector<8x1xf32> to vector<8x8xf32>
    %69 = arith.divf %65, %68 : vector<8x8xf32>
    %70 = vector.extract_strided_slice %47 {offsets = [0, 0], sizes = [8, 16], strides = [1, 1]} : vector<16x16xf32> to vector<8x16xf32>
    %71 = arith.truncf %69 : vector<8x8xf32> to vector<8x8xbf16>
    %72 = arith.truncf %70 : vector<8x16xf32> to vector<8x16xbf16>
    %cst_45 = arith.constant dense<0.000000e+00> : vector<8x16xf32>
    %73 = tpu.matmul %71, %72, %cst_45 {dimension_numbers = #tpu.dot_dimension_numbers<[1], [0], [0], [1], [0, 0, 1, 1], [], []>} : vector<8x8xbf16>, vector<8x16xbf16>, vector<8x16xf32> -> vector<8x16xf32>
    %74 = vector.extract_strided_slice %33 {offsets = [8, 0], sizes = [8, 16], strides = [1, 1]} : vector<16x16xf32> to vector<8x16xf32>
    %cst_46 = arith.constant 2.500000e-01 : f32
    %75 = vector.broadcast %cst_46 : f32 to vector<8x16xf32>
    %76 = arith.mulf %74, %75 : vector<8x16xf32>
    %77 = vector.extract_strided_slice %40 {offsets = [8, 0], sizes = [8, 16], strides = [1, 1]} : vector<16x16xf32> to vector<8x16xf32>
    %78 = arith.truncf %76 : vector<8x16xf32> to vector<8x16xbf16>
    %79 = arith.truncf %77 : vector<8x16xf32> to vector<8x16xbf16>
    %cst_47 = arith.constant dense<0.000000e+00> : vector<8x8xf32>
    %80 = tpu.matmul %78, %79, %cst_47 {dimension_numbers = #tpu.dot_dimension_numbers<[1], [1], [0], [0], [0, 0, 1, 0], [], []>} : vector<8x16xbf16>, vector<8x16xbf16>, vector<8x8xf32> -> vector<8x8xf32>
    %c1 = arith.constant 1 : index
    %c0_48 = arith.constant 0 : index
    %c0_49 = arith.constant 0 : index
    %81 = vector.load %arg1[%c1, %c0_48, %c0_49] : memref<2x1x8xf32, #tpu.memory_space<vmem>>, vector<1x1x8xf32>
    %82 = vector.shape_cast %81 : vector<1x1x8xf32> to vector<1x8xf32>
    %83 = vector.broadcast %82 : vector<1x8xf32> to vector<8x8xf32>
    %84 = arith.addf %80, %83 : vector<8x8xf32>
    %cst_50 = arith.constant dense<0xFF800000> : vector<8xf32>
    %85 = vector.multi_reduction <maximumf>, %84, %cst_50 [1] : vector<8x8xf32> to vector<8xf32>
    %cst_51 = arith.constant 0xFF800000 : f32
    %86 = vector.broadcast %cst_51 : f32 to vector<8xf32>
    %87 = arith.maximumf %86, %85 : vector<8xf32>
    %88 = vector.shape_cast %87 : vector<8xf32> to vector<8x1xf32>
    %89 = vector.broadcast %88 : vector<8x1xf32> to vector<8x8xf32>
    %90 = arith.subf %84, %89 : vector<8x8xf32>
    %91 = math.exp %90 : vector<8x8xf32>
    %cst_52 = arith.constant dense<0.000000e+00> : vector<8xf32>
    %92 = vector.multi_reduction <add>, %91, %cst_52 [1] : vector<8x8xf32> to vector<8xf32>
    %93 = vector.shape_cast %92 : vector<8xf32> to vector<8x1xf32>
    %94 = vector.broadcast %93 : vector<8x1xf32> to vector<8x8xf32>
    %95 = arith.divf %91, %94 : vector<8x8xf32>
    %96 = vector.extract_strided_slice %47 {offsets = [8, 0], sizes = [8, 16], strides = [1, 1]} : vector<16x16xf32> to vector<8x16xf32>
    %97 = arith.truncf %95 : vector<8x8xf32> to vector<8x8xbf16>
    %98 = arith.truncf %96 : vector<8x16xf32> to vector<8x16xbf16>
    %cst_53 = arith.constant dense<0.000000e+00> : vector<8x16xf32>
    %99 = tpu.matmul %97, %98, %cst_53 {dimension_numbers = #tpu.dot_dimension_numbers<[1], [0], [0], [1], [0, 0, 1, 1], [], []>} : vector<8x8xbf16>, vector<8x16xbf16>, vector<8x16xf32> -> vector<8x16xf32>
    %100 = tpu.concatenate %73, %99 in 0 : vector<8x16xf32>, vector<8x16xf32> -> vector<16x16xf32>
    %101 = arith.truncf %100 : vector<16x16xf32> to vector<16x16xbf16>
    %c0_54 = arith.constant 0 : index
    %c0_55 = arith.constant 0 : index
    %c0_56 = arith.constant 0 : index
    %c0_57 = arith.constant 0 : index
    %102 = vector.load %arg10[%c0_54, %c0_55, %c0_56, %c0_57] : memref<2x4x16x64xbf16, #tpu.memory_space<vmem>>, vector<1x1x16x64xbf16>
    %103 = vector.shape_cast %102 : vector<1x1x16x64xbf16> to vector<16x64xbf16>
    %cst_58 = arith.constant dense<0.000000e+00> : vector<16x64xf32>
    %104 = tpu.matmul %101, %103, %cst_58 {dimension_numbers = #tpu.dot_dimension_numbers<[1], [0], [0], [1], [0, 0, 1, 1], [], []>} : vector<16x16xbf16>, vector<16x64xbf16>, vector<16x64xf32> -> vector<16x64xf32>
    %105 = arith.addf %26, %104 : vector<16x64xf32>
    %c0_59 = arith.constant 0 : index
    %c1_60 = arith.constant 1 : index
    %c0_61 = arith.constant 0 : index
    %c0_62 = arith.constant 0 : index
    %106 = vector.load %arg4[%c0_59, %c1_60, %c0_61, %c0_62] : memref<2x4x64x16xbf16, #tpu.memory_space<vmem>>, vector<1x1x64x16xbf16>
    %107 = vector.shape_cast %106 : vector<1x1x64x16xbf16> to vector<64x16xbf16>
    %cst_63 = arith.constant dense<0.000000e+00> : vector<16x16xf32>
    %108 = tpu.matmul %25, %107, %cst_63 {dimension_numbers = #tpu.dot_dimension_numbers<[1], [0], [0], [1], [0, 0, 1, 1], [], []>} : vector<16x64xbf16>, vector<64x16xbf16>, vector<16x16xf32> -> vector<16x16xf32>
    %c0_64 = arith.constant 0 : index
    %c1_65 = arith.constant 1 : index
    %c0_66 = arith.constant 0 : index
    %c0_67 = arith.constant 0 : index
    %109 = vector.load %arg5[%c0_64, %c1_65, %c0_66, %c0_67] : memref<2x4x1x16xf32, #tpu.memory_space<vmem>>, vector<1x1x1x16xf32>
    %110 = vector.shape_cast %109 : vector<1x1x1x16xf32> to vector<1x16xf32>
    %111 = vector.broadcast %110 : vector<1x16xf32> to vector<16x16xf32>
    %112 = arith.addf %108, %111 : vector<16x16xf32>
    %c0_68 = arith.constant 0 : index
    %c1_69 = arith.constant 1 : index
    %c0_70 = arith.constant 0 : index
    %c0_71 = arith.constant 0 : index
    %113 = vector.load %arg6[%c0_68, %c1_69, %c0_70, %c0_71] : memref<2x4x64x16xbf16, #tpu.memory_space<vmem>>, vector<1x1x64x16xbf16>
    %114 = vector.shape_cast %113 : vector<1x1x64x16xbf16> to vector<64x16xbf16>
    %cst_72 = arith.constant dense<0.000000e+00> : vector<16x16xf32>
    %115 = tpu.matmul %25, %114, %cst_72 {dimension_numbers = #tpu.dot_dimension_numbers<[1], [0], [0], [1], [0, 0, 1, 1], [], []>} : vector<16x64xbf16>, vector<64x16xbf16>, vector<16x16xf32> -> vector<16x16xf32>
    %c0_73 = arith.constant 0 : index
    %c1_74 = arith.constant 1 : index
    %c0_75 = arith.constant 0 : index
    %c0_76 = arith.constant 0 : index
    %116 = vector.load %arg7[%c0_73, %c1_74, %c0_75, %c0_76] : memref<2x4x1x16xf32, #tpu.memory_space<vmem>>, vector<1x1x1x16xf32>
    %117 = vector.shape_cast %116 : vector<1x1x1x16xf32> to vector<1x16xf32>
    %118 = vector.broadcast %117 : vector<1x16xf32> to vector<16x16xf32>
    %119 = arith.addf %115, %118 : vector<16x16xf32>
    %c0_77 = arith.constant 0 : index
    %c1_78 = arith.constant 1 : index
    %c0_79 = arith.constant 0 : index
    %c0_80 = arith.constant 0 : index
    %120 = vector.load %arg8[%c0_77, %c1_78, %c0_79, %c0_80] : memref<2x4x64x16xbf16, #tpu.memory_space<vmem>>, vector<1x1x64x16xbf16>
    %121 = vector.shape_cast %120 : vector<1x1x64x16xbf16> to vector<64x16xbf16>
    %cst_81 = arith.constant dense<0.000000e+00> : vector<16x16xf32>
    %122 = tpu.matmul %25, %121, %cst_81 {dimension_numbers = #tpu.dot_dimension_numbers<[1], [0], [0], [1], [0, 0, 1, 1], [], []>} : vector<16x64xbf16>, vector<64x16xbf16>, vector<16x16xf32> -> vector<16x16xf32>
    %c0_82 = arith.constant 0 : index
    %c1_83 = arith.constant 1 : index
    %c0_84 = arith.constant 0 : index
    %c0_85 = arith.constant 0 : index
    %123 = vector.load %arg9[%c0_82, %c1_83, %c0_84, %c0_85] : memref<2x4x1x16xf32, #tpu.memory_space<vmem>>, vector<1x1x1x16xf32>
    %124 = vector.shape_cast %123 : vector<1x1x1x16xf32> to vector<1x16xf32>
    %125 = vector.broadcast %124 : vector<1x16xf32> to vector<16x16xf32>
    %126 = arith.addf %122, %125 : vector<16x16xf32>
    %127 = vector.extract_strided_slice %112 {offsets = [0, 0], sizes = [8, 16], strides = [1, 1]} : vector<16x16xf32> to vector<8x16xf32>
    %cst_86 = arith.constant 2.500000e-01 : f32
    %128 = vector.broadcast %cst_86 : f32 to vector<8x16xf32>
    %129 = arith.mulf %127, %128 : vector<8x16xf32>
    %130 = vector.extract_strided_slice %119 {offsets = [0, 0], sizes = [8, 16], strides = [1, 1]} : vector<16x16xf32> to vector<8x16xf32>
    %131 = arith.truncf %129 : vector<8x16xf32> to vector<8x16xbf16>
    %132 = arith.truncf %130 : vector<8x16xf32> to vector<8x16xbf16>
    %cst_87 = arith.constant dense<0.000000e+00> : vector<8x8xf32>
    %133 = tpu.matmul %131, %132, %cst_87 {dimension_numbers = #tpu.dot_dimension_numbers<[1], [1], [0], [0], [0, 0, 1, 0], [], []>} : vector<8x16xbf16>, vector<8x16xbf16>, vector<8x8xf32> -> vector<8x8xf32>
    %c0_88 = arith.constant 0 : index
    %c0_89 = arith.constant 0 : index
    %c0_90 = arith.constant 0 : index
    %134 = vector.load %arg1[%c0_88, %c0_89, %c0_90] : memref<2x1x8xf32, #tpu.memory_space<vmem>>, vector<1x1x8xf32>
    %135 = vector.shape_cast %134 : vector<1x1x8xf32> to vector<1x8xf32>
    %136 = vector.broadcast %135 : vector<1x8xf32> to vector<8x8xf32>
    %137 = arith.addf %133, %136 : vector<8x8xf32>
    %cst_91 = arith.constant dense<0xFF800000> : vector<8xf32>
    %138 = vector.multi_reduction <maximumf>, %137, %cst_91 [1] : vector<8x8xf32> to vector<8xf32>
    %cst_92 = arith.constant 0xFF800000 : f32
    %139 = vector.broadcast %cst_92 : f32 to vector<8xf32>
    %140 = arith.maximumf %139, %138 : vector<8xf32>
    %141 = vector.shape_cast %140 : vector<8xf32> to vector<8x1xf32>
    %142 = vector.broadcast %141 : vector<8x1xf32> to vector<8x8xf32>
    %143 = arith.subf %137, %142 : vector<8x8xf32>
    %144 = math.exp %143 : vector<8x8xf32>
    %cst_93 = arith.constant dense<0.000000e+00> : vector<8xf32>
    %145 = vector.multi_reduction <add>, %144, %cst_93 [1] : vector<8x8xf32> to vector<8xf32>
    %146 = vector.shape_cast %145 : vector<8xf32> to vector<8x1xf32>
    %147 = vector.broadcast %146 : vector<8x1xf32> to vector<8x8xf32>
    %148 = arith.divf %144, %147 : vector<8x8xf32>
    %149 = vector.extract_strided_slice %126 {offsets = [0, 0], sizes = [8, 16], strides = [1, 1]} : vector<16x16xf32> to vector<8x16xf32>
    %150 = arith.truncf %148 : vector<8x8xf32> to vector<8x8xbf16>
    %151 = arith.truncf %149 : vector<8x16xf32> to vector<8x16xbf16>
    %cst_94 = arith.constant dense<0.000000e+00> : vector<8x16xf32>
    %152 = tpu.matmul %150, %151, %cst_94 {dimension_numbers = #tpu.dot_dimension_numbers<[1], [0], [0], [1], [0, 0, 1, 1], [], []>} : vector<8x8xbf16>, vector<8x16xbf16>, vector<8x16xf32> -> vector<8x16xf32>
    %153 = vector.extract_strided_slice %112 {offsets = [8, 0], sizes = [8, 16], strides = [1, 1]} : vector<16x16xf32> to vector<8x16xf32>
    %cst_95 = arith.constant 2.500000e-01 : f32
    %154 = vector.broadcast %cst_95 : f32 to vector<8x16xf32>
    %155 = arith.mulf %153, %154 : vector<8x16xf32>
    %156 = vector.extract_strided_slice %119 {offsets = [8, 0], sizes = [8, 16], strides = [1, 1]} : vector<16x16xf32> to vector<8x16xf32>
    %157 = arith.truncf %155 : vector<8x16xf32> to vector<8x16xbf16>
    %158 = arith.truncf %156 : vector<8x16xf32> to vector<8x16xbf16>
    %cst_96 = arith.constant dense<0.000000e+00> : vector<8x8xf32>
    %159 = tpu.matmul %157, %158, %cst_96 {dimension_numbers = #tpu.dot_dimension_numbers<[1], [1], [0], [0], [0, 0, 1, 0], [], []>} : vector<8x16xbf16>, vector<8x16xbf16>, vector<8x8xf32> -> vector<8x8xf32>
    %c1_97 = arith.constant 1 : index
    %c0_98 = arith.constant 0 : index
    %c0_99 = arith.constant 0 : index
    %160 = vector.load %arg1[%c1_97, %c0_98, %c0_99] : memref<2x1x8xf32, #tpu.memory_space<vmem>>, vector<1x1x8xf32>
    %161 = vector.shape_cast %160 : vector<1x1x8xf32> to vector<1x8xf32>
    %162 = vector.broadcast %161 : vector<1x8xf32> to vector<8x8xf32>
    %163 = arith.addf %159, %162 : vector<8x8xf32>
    %cst_100 = arith.constant dense<0xFF800000> : vector<8xf32>
    %164 = vector.multi_reduction <maximumf>, %163, %cst_100 [1] : vector<8x8xf32> to vector<8xf32>
    %cst_101 = arith.constant 0xFF800000 : f32
    %165 = vector.broadcast %cst_101 : f32 to vector<8xf32>
    %166 = arith.maximumf %165, %164 : vector<8xf32>
    %167 = vector.shape_cast %166 : vector<8xf32> to vector<8x1xf32>
    %168 = vector.broadcast %167 : vector<8x1xf32> to vector<8x8xf32>
    %169 = arith.subf %163, %168 : vector<8x8xf32>
    %170 = math.exp %169 : vector<8x8xf32>
    %cst_102 = arith.constant dense<0.000000e+00> : vector<8xf32>
    %171 = vector.multi_reduction <add>, %170, %cst_102 [1] : vector<8x8xf32> to vector<8xf32>
    %172 = vector.shape_cast %171 : vector<8xf32> to vector<8x1xf32>
    %173 = vector.broadcast %172 : vector<8x1xf32> to vector<8x8xf32>
    %174 = arith.divf %170, %173 : vector<8x8xf32>
    %175 = vector.extract_strided_slice %126 {offsets = [8, 0], sizes = [8, 16], strides = [1, 1]} : vector<16x16xf32> to vector<8x16xf32>
    %176 = arith.truncf %174 : vector<8x8xf32> to vector<8x8xbf16>
    %177 = arith.truncf %175 : vector<8x16xf32> to vector<8x16xbf16>
    %cst_103 = arith.constant dense<0.000000e+00> : vector<8x16xf32>
    %178 = tpu.matmul %176, %177, %cst_103 {dimension_numbers = #tpu.dot_dimension_numbers<[1], [0], [0], [1], [0, 0, 1, 1], [], []>} : vector<8x8xbf16>, vector<8x16xbf16>, vector<8x16xf32> -> vector<8x16xf32>
    %179 = tpu.concatenate %152, %178 in 0 : vector<8x16xf32>, vector<8x16xf32> -> vector<16x16xf32>
    %180 = arith.truncf %179 : vector<16x16xf32> to vector<16x16xbf16>
    %c0_104 = arith.constant 0 : index
    %c1_105 = arith.constant 1 : index
    %c0_106 = arith.constant 0 : index
    %c0_107 = arith.constant 0 : index
    %181 = vector.load %arg10[%c0_104, %c1_105, %c0_106, %c0_107] : memref<2x4x16x64xbf16, #tpu.memory_space<vmem>>, vector<1x1x16x64xbf16>
    %182 = vector.shape_cast %181 : vector<1x1x16x64xbf16> to vector<16x64xbf16>
    %cst_108 = arith.constant dense<0.000000e+00> : vector<16x64xf32>
    %183 = tpu.matmul %180, %182, %cst_108 {dimension_numbers = #tpu.dot_dimension_numbers<[1], [0], [0], [1], [0, 0, 1, 1], [], []>} : vector<16x16xbf16>, vector<16x64xbf16>, vector<16x64xf32> -> vector<16x64xf32>
    %184 = arith.addf %105, %183 : vector<16x64xf32>
    %c0_109 = arith.constant 0 : index
    %c2 = arith.constant 2 : index
    %c0_110 = arith.constant 0 : index
    %c0_111 = arith.constant 0 : index
    %185 = vector.load %arg4[%c0_109, %c2, %c0_110, %c0_111] : memref<2x4x64x16xbf16, #tpu.memory_space<vmem>>, vector<1x1x64x16xbf16>
    %186 = vector.shape_cast %185 : vector<1x1x64x16xbf16> to vector<64x16xbf16>
    %cst_112 = arith.constant dense<0.000000e+00> : vector<16x16xf32>
    %187 = tpu.matmul %25, %186, %cst_112 {dimension_numbers = #tpu.dot_dimension_numbers<[1], [0], [0], [1], [0, 0, 1, 1], [], []>} : vector<16x64xbf16>, vector<64x16xbf16>, vector<16x16xf32> -> vector<16x16xf32>
    %c0_113 = arith.constant 0 : index
    %c2_114 = arith.constant 2 : index
    %c0_115 = arith.constant 0 : index
    %c0_116 = arith.constant 0 : index
    %188 = vector.load %arg5[%c0_113, %c2_114, %c0_115, %c0_116] : memref<2x4x1x16xf32, #tpu.memory_space<vmem>>, vector<1x1x1x16xf32>
    %189 = vector.shape_cast %188 : vector<1x1x1x16xf32> to vector<1x16xf32>
    %190 = vector.broadcast %189 : vector<1x16xf32> to vector<16x16xf32>
    %191 = arith.addf %187, %190 : vector<16x16xf32>
    %c0_117 = arith.constant 0 : index
    %c2_118 = arith.constant 2 : index
    %c0_119 = arith.constant 0 : index
    %c0_120 = arith.constant 0 : index
    %192 = vector.load %arg6[%c0_117, %c2_118, %c0_119, %c0_120] : memref<2x4x64x16xbf16, #tpu.memory_space<vmem>>, vector<1x1x64x16xbf16>
    %193 = vector.shape_cast %192 : vector<1x1x64x16xbf16> to vector<64x16xbf16>
    %cst_121 = arith.constant dense<0.000000e+00> : vector<16x16xf32>
    %194 = tpu.matmul %25, %193, %cst_121 {dimension_numbers = #tpu.dot_dimension_numbers<[1], [0], [0], [1], [0, 0, 1, 1], [], []>} : vector<16x64xbf16>, vector<64x16xbf16>, vector<16x16xf32> -> vector<16x16xf32>
    %c0_122 = arith.constant 0 : index
    %c2_123 = arith.constant 2 : index
    %c0_124 = arith.constant 0 : index
    %c0_125 = arith.constant 0 : index
    %195 = vector.load %arg7[%c0_122, %c2_123, %c0_124, %c0_125] : memref<2x4x1x16xf32, #tpu.memory_space<vmem>>, vector<1x1x1x16xf32>
    %196 = vector.shape_cast %195 : vector<1x1x1x16xf32> to vector<1x16xf32>
    %197 = vector.broadcast %196 : vector<1x16xf32> to vector<16x16xf32>
    %198 = arith.addf %194, %197 : vector<16x16xf32>
    %c0_126 = arith.constant 0 : index
    %c2_127 = arith.constant 2 : index
    %c0_128 = arith.constant 0 : index
    %c0_129 = arith.constant 0 : index
    %199 = vector.load %arg8[%c0_126, %c2_127, %c0_128, %c0_129] : memref<2x4x64x16xbf16, #tpu.memory_space<vmem>>, vector<1x1x64x16xbf16>
    %200 = vector.shape_cast %199 : vector<1x1x64x16xbf16> to vector<64x16xbf16>
    %cst_130 = arith.constant dense<0.000000e+00> : vector<16x16xf32>
    %201 = tpu.matmul %25, %200, %cst_130 {dimension_numbers = #tpu.dot_dimension_numbers<[1], [0], [0], [1], [0, 0, 1, 1], [], []>} : vector<16x64xbf16>, vector<64x16xbf16>, vector<16x16xf32> -> vector<16x16xf32>
    %c0_131 = arith.constant 0 : index
    %c2_132 = arith.constant 2 : index
    %c0_133 = arith.constant 0 : index
    %c0_134 = arith.constant 0 : index
    %202 = vector.load %arg9[%c0_131, %c2_132, %c0_133, %c0_134] : memref<2x4x1x16xf32, #tpu.memory_space<vmem>>, vector<1x1x1x16xf32>
    %203 = vector.shape_cast %202 : vector<1x1x1x16xf32> to vector<1x16xf32>
    %204 = vector.broadcast %203 : vector<1x16xf32> to vector<16x16xf32>
    %205 = arith.addf %201, %204 : vector<16x16xf32>
    %206 = vector.extract_strided_slice %191 {offsets = [0, 0], sizes = [8, 16], strides = [1, 1]} : vector<16x16xf32> to vector<8x16xf32>
    %cst_135 = arith.constant 2.500000e-01 : f32
    %207 = vector.broadcast %cst_135 : f32 to vector<8x16xf32>
    %208 = arith.mulf %206, %207 : vector<8x16xf32>
    %209 = vector.extract_strided_slice %198 {offsets = [0, 0], sizes = [8, 16], strides = [1, 1]} : vector<16x16xf32> to vector<8x16xf32>
    %210 = arith.truncf %208 : vector<8x16xf32> to vector<8x16xbf16>
    %211 = arith.truncf %209 : vector<8x16xf32> to vector<8x16xbf16>
    %cst_136 = arith.constant dense<0.000000e+00> : vector<8x8xf32>
    %212 = tpu.matmul %210, %211, %cst_136 {dimension_numbers = #tpu.dot_dimension_numbers<[1], [1], [0], [0], [0, 0, 1, 0], [], []>} : vector<8x16xbf16>, vector<8x16xbf16>, vector<8x8xf32> -> vector<8x8xf32>
    %c0_137 = arith.constant 0 : index
    %c0_138 = arith.constant 0 : index
    %c0_139 = arith.constant 0 : index
    %213 = vector.load %arg1[%c0_137, %c0_138, %c0_139] : memref<2x1x8xf32, #tpu.memory_space<vmem>>, vector<1x1x8xf32>
    %214 = vector.shape_cast %213 : vector<1x1x8xf32> to vector<1x8xf32>
    %215 = vector.broadcast %214 : vector<1x8xf32> to vector<8x8xf32>
    %216 = arith.addf %212, %215 : vector<8x8xf32>
    %cst_140 = arith.constant dense<0xFF800000> : vector<8xf32>
    %217 = vector.multi_reduction <maximumf>, %216, %cst_140 [1] : vector<8x8xf32> to vector<8xf32>
    %cst_141 = arith.constant 0xFF800000 : f32
    %218 = vector.broadcast %cst_141 : f32 to vector<8xf32>
    %219 = arith.maximumf %218, %217 : vector<8xf32>
    %220 = vector.shape_cast %219 : vector<8xf32> to vector<8x1xf32>
    %221 = vector.broadcast %220 : vector<8x1xf32> to vector<8x8xf32>
    %222 = arith.subf %216, %221 : vector<8x8xf32>
    %223 = math.exp %222 : vector<8x8xf32>
    %cst_142 = arith.constant dense<0.000000e+00> : vector<8xf32>
    %224 = vector.multi_reduction <add>, %223, %cst_142 [1] : vector<8x8xf32> to vector<8xf32>
    %225 = vector.shape_cast %224 : vector<8xf32> to vector<8x1xf32>
    %226 = vector.broadcast %225 : vector<8x1xf32> to vector<8x8xf32>
    %227 = arith.divf %223, %226 : vector<8x8xf32>
    %228 = vector.extract_strided_slice %205 {offsets = [0, 0], sizes = [8, 16], strides = [1, 1]} : vector<16x16xf32> to vector<8x16xf32>
    %229 = arith.truncf %227 : vector<8x8xf32> to vector<8x8xbf16>
    %230 = arith.truncf %228 : vector<8x16xf32> to vector<8x16xbf16>
    %cst_143 = arith.constant dense<0.000000e+00> : vector<8x16xf32>
    %231 = tpu.matmul %229, %230, %cst_143 {dimension_numbers = #tpu.dot_dimension_numbers<[1], [0], [0], [1], [0, 0, 1, 1], [], []>} : vector<8x8xbf16>, vector<8x16xbf16>, vector<8x16xf32> -> vector<8x16xf32>
    %232 = vector.extract_strided_slice %191 {offsets = [8, 0], sizes = [8, 16], strides = [1, 1]} : vector<16x16xf32> to vector<8x16xf32>
    %cst_144 = arith.constant 2.500000e-01 : f32
    %233 = vector.broadcast %cst_144 : f32 to vector<8x16xf32>
    %234 = arith.mulf %232, %233 : vector<8x16xf32>
    %235 = vector.extract_strided_slice %198 {offsets = [8, 0], sizes = [8, 16], strides = [1, 1]} : vector<16x16xf32> to vector<8x16xf32>
    %236 = arith.truncf %234 : vector<8x16xf32> to vector<8x16xbf16>
    %237 = arith.truncf %235 : vector<8x16xf32> to vector<8x16xbf16>
    %cst_145 = arith.constant dense<0.000000e+00> : vector<8x8xf32>
    %238 = tpu.matmul %236, %237, %cst_145 {dimension_numbers = #tpu.dot_dimension_numbers<[1], [1], [0], [0], [0, 0, 1, 0], [], []>} : vector<8x16xbf16>, vector<8x16xbf16>, vector<8x8xf32> -> vector<8x8xf32>
    %c1_146 = arith.constant 1 : index
    %c0_147 = arith.constant 0 : index
    %c0_148 = arith.constant 0 : index
    %239 = vector.load %arg1[%c1_146, %c0_147, %c0_148] : memref<2x1x8xf32, #tpu.memory_space<vmem>>, vector<1x1x8xf32>
    %240 = vector.shape_cast %239 : vector<1x1x8xf32> to vector<1x8xf32>
    %241 = vector.broadcast %240 : vector<1x8xf32> to vector<8x8xf32>
    %242 = arith.addf %238, %241 : vector<8x8xf32>
    %cst_149 = arith.constant dense<0xFF800000> : vector<8xf32>
    %243 = vector.multi_reduction <maximumf>, %242, %cst_149 [1] : vector<8x8xf32> to vector<8xf32>
    %cst_150 = arith.constant 0xFF800000 : f32
    %244 = vector.broadcast %cst_150 : f32 to vector<8xf32>
    %245 = arith.maximumf %244, %243 : vector<8xf32>
    %246 = vector.shape_cast %245 : vector<8xf32> to vector<8x1xf32>
    %247 = vector.broadcast %246 : vector<8x1xf32> to vector<8x8xf32>
    %248 = arith.subf %242, %247 : vector<8x8xf32>
    %249 = math.exp %248 : vector<8x8xf32>
    %cst_151 = arith.constant dense<0.000000e+00> : vector<8xf32>
    %250 = vector.multi_reduction <add>, %249, %cst_151 [1] : vector<8x8xf32> to vector<8xf32>
    %251 = vector.shape_cast %250 : vector<8xf32> to vector<8x1xf32>
    %252 = vector.broadcast %251 : vector<8x1xf32> to vector<8x8xf32>
    %253 = arith.divf %249, %252 : vector<8x8xf32>
    %254 = vector.extract_strided_slice %205 {offsets = [8, 0], sizes = [8, 16], strides = [1, 1]} : vector<16x16xf32> to vector<8x16xf32>
    %255 = arith.truncf %253 : vector<8x8xf32> to vector<8x8xbf16>
    %256 = arith.truncf %254 : vector<8x16xf32> to vector<8x16xbf16>
    %cst_152 = arith.constant dense<0.000000e+00> : vector<8x16xf32>
    %257 = tpu.matmul %255, %256, %cst_152 {dimension_numbers = #tpu.dot_dimension_numbers<[1], [0], [0], [1], [0, 0, 1, 1], [], []>} : vector<8x8xbf16>, vector<8x16xbf16>, vector<8x16xf32> -> vector<8x16xf32>
    %258 = tpu.concatenate %231, %257 in 0 : vector<8x16xf32>, vector<8x16xf32> -> vector<16x16xf32>
    %259 = arith.truncf %258 : vector<16x16xf32> to vector<16x16xbf16>
    %c0_153 = arith.constant 0 : index
    %c2_154 = arith.constant 2 : index
    %c0_155 = arith.constant 0 : index
    %c0_156 = arith.constant 0 : index
    %260 = vector.load %arg10[%c0_153, %c2_154, %c0_155, %c0_156] : memref<2x4x16x64xbf16, #tpu.memory_space<vmem>>, vector<1x1x16x64xbf16>
    %261 = vector.shape_cast %260 : vector<1x1x16x64xbf16> to vector<16x64xbf16>
    %cst_157 = arith.constant dense<0.000000e+00> : vector<16x64xf32>
    %262 = tpu.matmul %259, %261, %cst_157 {dimension_numbers = #tpu.dot_dimension_numbers<[1], [0], [0], [1], [0, 0, 1, 1], [], []>} : vector<16x16xbf16>, vector<16x64xbf16>, vector<16x64xf32> -> vector<16x64xf32>
    %263 = arith.addf %184, %262 : vector<16x64xf32>
    %c0_158 = arith.constant 0 : index
    %c3 = arith.constant 3 : index
    %c0_159 = arith.constant 0 : index
    %c0_160 = arith.constant 0 : index
    %264 = vector.load %arg4[%c0_158, %c3, %c0_159, %c0_160] : memref<2x4x64x16xbf16, #tpu.memory_space<vmem>>, vector<1x1x64x16xbf16>
    %265 = vector.shape_cast %264 : vector<1x1x64x16xbf16> to vector<64x16xbf16>
    %cst_161 = arith.constant dense<0.000000e+00> : vector<16x16xf32>
    %266 = tpu.matmul %25, %265, %cst_161 {dimension_numbers = #tpu.dot_dimension_numbers<[1], [0], [0], [1], [0, 0, 1, 1], [], []>} : vector<16x64xbf16>, vector<64x16xbf16>, vector<16x16xf32> -> vector<16x16xf32>
    %c0_162 = arith.constant 0 : index
    %c3_163 = arith.constant 3 : index
    %c0_164 = arith.constant 0 : index
    %c0_165 = arith.constant 0 : index
    %267 = vector.load %arg5[%c0_162, %c3_163, %c0_164, %c0_165] : memref<2x4x1x16xf32, #tpu.memory_space<vmem>>, vector<1x1x1x16xf32>
    %268 = vector.shape_cast %267 : vector<1x1x1x16xf32> to vector<1x16xf32>
    %269 = vector.broadcast %268 : vector<1x16xf32> to vector<16x16xf32>
    %270 = arith.addf %266, %269 : vector<16x16xf32>
    %c0_166 = arith.constant 0 : index
    %c3_167 = arith.constant 3 : index
    %c0_168 = arith.constant 0 : index
    %c0_169 = arith.constant 0 : index
    %271 = vector.load %arg6[%c0_166, %c3_167, %c0_168, %c0_169] : memref<2x4x64x16xbf16, #tpu.memory_space<vmem>>, vector<1x1x64x16xbf16>
    %272 = vector.shape_cast %271 : vector<1x1x64x16xbf16> to vector<64x16xbf16>
    %cst_170 = arith.constant dense<0.000000e+00> : vector<16x16xf32>
    %273 = tpu.matmul %25, %272, %cst_170 {dimension_numbers = #tpu.dot_dimension_numbers<[1], [0], [0], [1], [0, 0, 1, 1], [], []>} : vector<16x64xbf16>, vector<64x16xbf16>, vector<16x16xf32> -> vector<16x16xf32>
    %c0_171 = arith.constant 0 : index
    %c3_172 = arith.constant 3 : index
    %c0_173 = arith.constant 0 : index
    %c0_174 = arith.constant 0 : index
    %274 = vector.load %arg7[%c0_171, %c3_172, %c0_173, %c0_174] : memref<2x4x1x16xf32, #tpu.memory_space<vmem>>, vector<1x1x1x16xf32>
    %275 = vector.shape_cast %274 : vector<1x1x1x16xf32> to vector<1x16xf32>
    %276 = vector.broadcast %275 : vector<1x16xf32> to vector<16x16xf32>
    %277 = arith.addf %273, %276 : vector<16x16xf32>
    %c0_175 = arith.constant 0 : index
    %c3_176 = arith.constant 3 : index
    %c0_177 = arith.constant 0 : index
    %c0_178 = arith.constant 0 : index
    %278 = vector.load %arg8[%c0_175, %c3_176, %c0_177, %c0_178] : memref<2x4x64x16xbf16, #tpu.memory_space<vmem>>, vector<1x1x64x16xbf16>
    %279 = vector.shape_cast %278 : vector<1x1x64x16xbf16> to vector<64x16xbf16>
    %cst_179 = arith.constant dense<0.000000e+00> : vector<16x16xf32>
    %280 = tpu.matmul %25, %279, %cst_179 {dimension_numbers = #tpu.dot_dimension_numbers<[1], [0], [0], [1], [0, 0, 1, 1], [], []>} : vector<16x64xbf16>, vector<64x16xbf16>, vector<16x16xf32> -> vector<16x16xf32>
    %c0_180 = arith.constant 0 : index
    %c3_181 = arith.constant 3 : index
    %c0_182 = arith.constant 0 : index
    %c0_183 = arith.constant 0 : index
    %281 = vector.load %arg9[%c0_180, %c3_181, %c0_182, %c0_183] : memref<2x4x1x16xf32, #tpu.memory_space<vmem>>, vector<1x1x1x16xf32>
    %282 = vector.shape_cast %281 : vector<1x1x1x16xf32> to vector<1x16xf32>
    %283 = vector.broadcast %282 : vector<1x16xf32> to vector<16x16xf32>
    %284 = arith.addf %280, %283 : vector<16x16xf32>
    %285 = vector.extract_strided_slice %270 {offsets = [0, 0], sizes = [8, 16], strides = [1, 1]} : vector<16x16xf32> to vector<8x16xf32>
    %cst_184 = arith.constant 2.500000e-01 : f32
    %286 = vector.broadcast %cst_184 : f32 to vector<8x16xf32>
    %287 = arith.mulf %285, %286 : vector<8x16xf32>
    %288 = vector.extract_strided_slice %277 {offsets = [0, 0], sizes = [8, 16], strides = [1, 1]} : vector<16x16xf32> to vector<8x16xf32>
    %289 = arith.truncf %287 : vector<8x16xf32> to vector<8x16xbf16>
    %290 = arith.truncf %288 : vector<8x16xf32> to vector<8x16xbf16>
    %cst_185 = arith.constant dense<0.000000e+00> : vector<8x8xf32>
    %291 = tpu.matmul %289, %290, %cst_185 {dimension_numbers = #tpu.dot_dimension_numbers<[1], [1], [0], [0], [0, 0, 1, 0], [], []>} : vector<8x16xbf16>, vector<8x16xbf16>, vector<8x8xf32> -> vector<8x8xf32>
    %c0_186 = arith.constant 0 : index
    %c0_187 = arith.constant 0 : index
    %c0_188 = arith.constant 0 : index
    %292 = vector.load %arg1[%c0_186, %c0_187, %c0_188] : memref<2x1x8xf32, #tpu.memory_space<vmem>>, vector<1x1x8xf32>
    %293 = vector.shape_cast %292 : vector<1x1x8xf32> to vector<1x8xf32>
    %294 = vector.broadcast %293 : vector<1x8xf32> to vector<8x8xf32>
    %295 = arith.addf %291, %294 : vector<8x8xf32>
    %cst_189 = arith.constant dense<0xFF800000> : vector<8xf32>
    %296 = vector.multi_reduction <maximumf>, %295, %cst_189 [1] : vector<8x8xf32> to vector<8xf32>
    %cst_190 = arith.constant 0xFF800000 : f32
    %297 = vector.broadcast %cst_190 : f32 to vector<8xf32>
    %298 = arith.maximumf %297, %296 : vector<8xf32>
    %299 = vector.shape_cast %298 : vector<8xf32> to vector<8x1xf32>
    %300 = vector.broadcast %299 : vector<8x1xf32> to vector<8x8xf32>
    %301 = arith.subf %295, %300 : vector<8x8xf32>
    %302 = math.exp %301 : vector<8x8xf32>
    %cst_191 = arith.constant dense<0.000000e+00> : vector<8xf32>
    %303 = vector.multi_reduction <add>, %302, %cst_191 [1] : vector<8x8xf32> to vector<8xf32>
    %304 = vector.shape_cast %303 : vector<8xf32> to vector<8x1xf32>
    %305 = vector.broadcast %304 : vector<8x1xf32> to vector<8x8xf32>
    %306 = arith.divf %302, %305 : vector<8x8xf32>
    %307 = vector.extract_strided_slice %284 {offsets = [0, 0], sizes = [8, 16], strides = [1, 1]} : vector<16x16xf32> to vector<8x16xf32>
    %308 = arith.truncf %306 : vector<8x8xf32> to vector<8x8xbf16>
    %309 = arith.truncf %307 : vector<8x16xf32> to vector<8x16xbf16>
    %cst_192 = arith.constant dense<0.000000e+00> : vector<8x16xf32>
    %310 = tpu.matmul %308, %309, %cst_192 {dimension_numbers = #tpu.dot_dimension_numbers<[1], [0], [0], [1], [0, 0, 1, 1], [], []>} : vector<8x8xbf16>, vector<8x16xbf16>, vector<8x16xf32> -> vector<8x16xf32>
    %311 = vector.extract_strided_slice %270 {offsets = [8, 0], sizes = [8, 16], strides = [1, 1]} : vector<16x16xf32> to vector<8x16xf32>
    %cst_193 = arith.constant 2.500000e-01 : f32
    %312 = vector.broadcast %cst_193 : f32 to vector<8x16xf32>
    %313 = arith.mulf %311, %312 : vector<8x16xf32>
    %314 = vector.extract_strided_slice %277 {offsets = [8, 0], sizes = [8, 16], strides = [1, 1]} : vector<16x16xf32> to vector<8x16xf32>
    %315 = arith.truncf %313 : vector<8x16xf32> to vector<8x16xbf16>
    %316 = arith.truncf %314 : vector<8x16xf32> to vector<8x16xbf16>
    %cst_194 = arith.constant dense<0.000000e+00> : vector<8x8xf32>
    %317 = tpu.matmul %315, %316, %cst_194 {dimension_numbers = #tpu.dot_dimension_numbers<[1], [1], [0], [0], [0, 0, 1, 0], [], []>} : vector<8x16xbf16>, vector<8x16xbf16>, vector<8x8xf32> -> vector<8x8xf32>
    %c1_195 = arith.constant 1 : index
    %c0_196 = arith.constant 0 : index
    %c0_197 = arith.constant 0 : index
    %318 = vector.load %arg1[%c1_195, %c0_196, %c0_197] : memref<2x1x8xf32, #tpu.memory_space<vmem>>, vector<1x1x8xf32>
    %319 = vector.shape_cast %318 : vector<1x1x8xf32> to vector<1x8xf32>
    %320 = vector.broadcast %319 : vector<1x8xf32> to vector<8x8xf32>
    %321 = arith.addf %317, %320 : vector<8x8xf32>
    %cst_198 = arith.constant dense<0xFF800000> : vector<8xf32>
    %322 = vector.multi_reduction <maximumf>, %321, %cst_198 [1] : vector<8x8xf32> to vector<8xf32>
    %cst_199 = arith.constant 0xFF800000 : f32
    %323 = vector.broadcast %cst_199 : f32 to vector<8xf32>
    %324 = arith.maximumf %323, %322 : vector<8xf32>
    %325 = vector.shape_cast %324 : vector<8xf32> to vector<8x1xf32>
    %326 = vector.broadcast %325 : vector<8x1xf32> to vector<8x8xf32>
    %327 = arith.subf %321, %326 : vector<8x8xf32>
    %328 = math.exp %327 : vector<8x8xf32>
    %cst_200 = arith.constant dense<0.000000e+00> : vector<8xf32>
    %329 = vector.multi_reduction <add>, %328, %cst_200 [1] : vector<8x8xf32> to vector<8xf32>
    %330 = vector.shape_cast %329 : vector<8xf32> to vector<8x1xf32>
    %331 = vector.broadcast %330 : vector<8x1xf32> to vector<8x8xf32>
    %332 = arith.divf %328, %331 : vector<8x8xf32>
    %333 = vector.extract_strided_slice %284 {offsets = [8, 0], sizes = [8, 16], strides = [1, 1]} : vector<16x16xf32> to vector<8x16xf32>
    %334 = arith.truncf %332 : vector<8x8xf32> to vector<8x8xbf16>
    %335 = arith.truncf %333 : vector<8x16xf32> to vector<8x16xbf16>
    %cst_201 = arith.constant dense<0.000000e+00> : vector<8x16xf32>
    %336 = tpu.matmul %334, %335, %cst_201 {dimension_numbers = #tpu.dot_dimension_numbers<[1], [0], [0], [1], [0, 0, 1, 1], [], []>} : vector<8x8xbf16>, vector<8x16xbf16>, vector<8x16xf32> -> vector<8x16xf32>
    %337 = tpu.concatenate %310, %336 in 0 : vector<8x16xf32>, vector<8x16xf32> -> vector<16x16xf32>
    %338 = arith.truncf %337 : vector<16x16xf32> to vector<16x16xbf16>
    %c0_202 = arith.constant 0 : index
    %c3_203 = arith.constant 3 : index
    %c0_204 = arith.constant 0 : index
    %c0_205 = arith.constant 0 : index
    %339 = vector.load %arg10[%c0_202, %c3_203, %c0_204, %c0_205] : memref<2x4x16x64xbf16, #tpu.memory_space<vmem>>, vector<1x1x16x64xbf16>
    %340 = vector.shape_cast %339 : vector<1x1x16x64xbf16> to vector<16x64xbf16>
    %cst_206 = arith.constant dense<0.000000e+00> : vector<16x64xf32>
    %341 = tpu.matmul %338, %340, %cst_206 {dimension_numbers = #tpu.dot_dimension_numbers<[1], [0], [0], [1], [0, 0, 1, 1], [], []>} : vector<16x16xbf16>, vector<16x64xbf16>, vector<16x64xf32> -> vector<16x64xf32>
    %342 = arith.addf %263, %341 : vector<16x64xf32>
    %c0_207 = arith.constant 0 : index
    %c0_208 = arith.constant 0 : index
    %c0_209 = arith.constant 0 : index
    %343 = vector.load %arg11[%c0_207, %c0_208, %c0_209] : memref<2x1x64xf32, #tpu.memory_space<vmem>>, vector<1x1x64xf32>
    %344 = vector.shape_cast %343 : vector<1x1x64xf32> to vector<1x64xf32>
    %345 = vector.broadcast %344 : vector<1x64xf32> to vector<16x64xf32>
    %346 = arith.addf %342, %345 : vector<16x64xf32>
    %347 = arith.addf %24, %346 : vector<16x64xf32>
    %c0_210 = arith.constant 0 : index
    %c0_211 = arith.constant 0 : index
    %c0_212 = arith.constant 0 : index
    %348 = vector.load %arg12[%c0_210, %c0_211, %c0_212] : memref<2x1x64xf32, #tpu.memory_space<vmem>>, vector<1x1x64xf32>
    %349 = vector.shape_cast %348 : vector<1x1x64xf32> to vector<1x64xf32>
    %c0_213 = arith.constant 0 : index
    %c0_214 = arith.constant 0 : index
    %c0_215 = arith.constant 0 : index
    %350 = vector.load %arg13[%c0_213, %c0_214, %c0_215] : memref<2x1x64xf32, #tpu.memory_space<vmem>>, vector<1x1x64xf32>
    %351 = vector.shape_cast %350 : vector<1x1x64xf32> to vector<1x64xf32>
    %cst_216 = arith.constant dense<0.000000e+00> : vector<16xf32>
    %352 = vector.multi_reduction <add>, %347, %cst_216 [1] : vector<16x64xf32> to vector<16xf32>
    %353 = vector.shape_cast %352 : vector<16xf32> to vector<16x1xf32>
    %cst_217 = arith.constant 6.400000e+01 : f32
    %354 = vector.broadcast %cst_217 : f32 to vector<16x1xf32>
    %355 = arith.divf %353, %354 : vector<16x1xf32>
    %356 = vector.broadcast %355 : vector<16x1xf32> to vector<16x64xf32>
    %357 = arith.subf %347, %356 : vector<16x64xf32>
    %358 = arith.mulf %357, %357 : vector<16x64xf32>
    %cst_218 = arith.constant dense<0.000000e+00> : vector<16xf32>
    %359 = vector.multi_reduction <add>, %358, %cst_218 [1] : vector<16x64xf32> to vector<16xf32>
    %360 = vector.shape_cast %359 : vector<16xf32> to vector<16x1xf32>
    %cst_219 = arith.constant 6.400000e+01 : f32
    %361 = vector.broadcast %cst_219 : f32 to vector<16x1xf32>
    %362 = arith.divf %360, %361 : vector<16x1xf32>
    %363 = vector.broadcast %355 : vector<16x1xf32> to vector<16x64xf32>
    %364 = arith.subf %347, %363 : vector<16x64xf32>
    %cst_220 = arith.constant 9.99999996E-13 : f32
    %365 = vector.broadcast %cst_220 : f32 to vector<16x1xf32>
    %366 = arith.addf %362, %365 : vector<16x1xf32>
    %367 = math.rsqrt %366 : vector<16x1xf32>
    %368 = vector.broadcast %367 : vector<16x1xf32> to vector<16x64xf32>
    %369 = arith.mulf %364, %368 : vector<16x64xf32>
    %370 = vector.broadcast %349 : vector<1x64xf32> to vector<16x64xf32>
    %371 = arith.mulf %369, %370 : vector<16x64xf32>
    %372 = vector.broadcast %351 : vector<1x64xf32> to vector<16x64xf32>
    %373 = arith.addf %371, %372 : vector<16x64xf32>
    %374 = arith.truncf %373 : vector<16x64xf32> to vector<16x64xbf16>
    %c0_221 = arith.constant 0 : index
    %c0_222 = arith.constant 0 : index
    %c0_223 = arith.constant 0 : index
    %375 = vector.load %arg14[%c0_221, %c0_222, %c0_223] : memref<2x64x128xbf16, #tpu.memory_space<vmem>>, vector<1x64x128xbf16>
    %376 = vector.shape_cast %375 : vector<1x64x128xbf16> to vector<64x128xbf16>
    %cst_224 = arith.constant dense<0.000000e+00> : vector<16x128xf32>
    %377 = tpu.matmul %374, %376, %cst_224 {dimension_numbers = #tpu.dot_dimension_numbers<[1], [0], [0], [1], [0, 0, 1, 1], [], []>} : vector<16x64xbf16>, vector<64x128xbf16>, vector<16x128xf32> -> vector<16x128xf32>
    %c0_225 = arith.constant 0 : index
    %c0_226 = arith.constant 0 : index
    %c0_227 = arith.constant 0 : index
    %378 = vector.load %arg15[%c0_225, %c0_226, %c0_227] : memref<2x1x128xf32, #tpu.memory_space<vmem>>, vector<1x1x128xf32>
    %379 = vector.shape_cast %378 : vector<1x1x128xf32> to vector<1x128xf32>
    %380 = vector.broadcast %379 : vector<1x128xf32> to vector<16x128xf32>
    %381 = arith.addf %377, %380 : vector<16x128xf32>
    %382 = arith.mulf %381, %381 : vector<16x128xf32>
    %383 = arith.mulf %381, %382 : vector<16x128xf32>
    %cst_228 = arith.constant 4.471500e-02 : f32
    %384 = vector.broadcast %cst_228 : f32 to vector<16x128xf32>
    %385 = arith.mulf %384, %383 : vector<16x128xf32>
    %386 = arith.addf %381, %385 : vector<16x128xf32>
    %cst_229 = arith.constant 0.797884583 : f32
    %387 = vector.broadcast %cst_229 : f32 to vector<16x128xf32>
    %388 = arith.mulf %387, %386 : vector<16x128xf32>
    %389 = math.tanh %388 : vector<16x128xf32>
    %cst_230 = arith.constant 1.000000e+00 : f32
    %390 = vector.broadcast %cst_230 : f32 to vector<16x128xf32>
    %391 = arith.addf %390, %389 : vector<16x128xf32>
    %cst_231 = arith.constant 5.000000e-01 : f32
    %392 = vector.broadcast %cst_231 : f32 to vector<16x128xf32>
    %393 = arith.mulf %392, %391 : vector<16x128xf32>
    %394 = arith.mulf %381, %393 : vector<16x128xf32>
    %395 = arith.truncf %394 : vector<16x128xf32> to vector<16x128xbf16>
    %c0_232 = arith.constant 0 : index
    %c0_233 = arith.constant 0 : index
    %c0_234 = arith.constant 0 : index
    %396 = vector.load %arg16[%c0_232, %c0_233, %c0_234] : memref<2x128x64xbf16, #tpu.memory_space<vmem>>, vector<1x128x64xbf16>
    %397 = vector.shape_cast %396 : vector<1x128x64xbf16> to vector<128x64xbf16>
    %cst_235 = arith.constant dense<0.000000e+00> : vector<16x64xf32>
    %398 = tpu.matmul %395, %397, %cst_235 {dimension_numbers = #tpu.dot_dimension_numbers<[1], [0], [0], [1], [0, 0, 1, 1], [], []>} : vector<16x128xbf16>, vector<128x64xbf16>, vector<16x64xf32> -> vector<16x64xf32>
    %c0_236 = arith.constant 0 : index
    %c0_237 = arith.constant 0 : index
    %c0_238 = arith.constant 0 : index
    %399 = vector.load %arg17[%c0_236, %c0_237, %c0_238] : memref<2x1x64xf32, #tpu.memory_space<vmem>>, vector<1x1x64xf32>
    %400 = vector.shape_cast %399 : vector<1x1x64xf32> to vector<1x64xf32>
    %401 = vector.broadcast %400 : vector<1x64xf32> to vector<16x64xf32>
    %402 = arith.addf %398, %401 : vector<16x64xf32>
    %403 = arith.addf %373, %402 : vector<16x64xf32>
    %c0_239 = arith.constant 0 : index
    %c0_240 = arith.constant 0 : index
    %c0_241 = arith.constant 0 : index
    %404 = vector.load %arg18[%c0_239, %c0_240, %c0_241] : memref<2x1x64xf32, #tpu.memory_space<vmem>>, vector<1x1x64xf32>
    %405 = vector.shape_cast %404 : vector<1x1x64xf32> to vector<1x64xf32>
    %c0_242 = arith.constant 0 : index
    %c0_243 = arith.constant 0 : index
    %c0_244 = arith.constant 0 : index
    %406 = vector.load %arg19[%c0_242, %c0_243, %c0_244] : memref<2x1x64xf32, #tpu.memory_space<vmem>>, vector<1x1x64xf32>
    %407 = vector.shape_cast %406 : vector<1x1x64xf32> to vector<1x64xf32>
    %cst_245 = arith.constant dense<0.000000e+00> : vector<16xf32>
    %408 = vector.multi_reduction <add>, %403, %cst_245 [1] : vector<16x64xf32> to vector<16xf32>
    %409 = vector.shape_cast %408 : vector<16xf32> to vector<16x1xf32>
    %cst_246 = arith.constant 6.400000e+01 : f32
    %410 = vector.broadcast %cst_246 : f32 to vector<16x1xf32>
    %411 = arith.divf %409, %410 : vector<16x1xf32>
    %412 = vector.broadcast %411 : vector<16x1xf32> to vector<16x64xf32>
    %413 = arith.subf %403, %412 : vector<16x64xf32>
    %414 = arith.mulf %413, %413 : vector<16x64xf32>
    %cst_247 = arith.constant dense<0.000000e+00> : vector<16xf32>
    %415 = vector.multi_reduction <add>, %414, %cst_247 [1] : vector<16x64xf32> to vector<16xf32>
    %416 = vector.shape_cast %415 : vector<16xf32> to vector<16x1xf32>
    %cst_248 = arith.constant 6.400000e+01 : f32
    %417 = vector.broadcast %cst_248 : f32 to vector<16x1xf32>
    %418 = arith.divf %416, %417 : vector<16x1xf32>
    %419 = vector.broadcast %411 : vector<16x1xf32> to vector<16x64xf32>
    %420 = arith.subf %403, %419 : vector<16x64xf32>
    %cst_249 = arith.constant 9.99999996E-13 : f32
    %421 = vector.broadcast %cst_249 : f32 to vector<16x1xf32>
    %422 = arith.addf %418, %421 : vector<16x1xf32>
    %423 = math.rsqrt %422 : vector<16x1xf32>
    %424 = vector.broadcast %423 : vector<16x1xf32> to vector<16x64xf32>
    %425 = arith.mulf %420, %424 : vector<16x64xf32>
    %426 = vector.broadcast %405 : vector<1x64xf32> to vector<16x64xf32>
    %427 = arith.mulf %425, %426 : vector<16x64xf32>
    %428 = vector.broadcast %407 : vector<1x64xf32> to vector<16x64xf32>
    %429 = arith.addf %427, %428 : vector<16x64xf32>
    %430 = arith.truncf %429 : vector<16x64xf32> to vector<16x64xbf16>
    %cst_250 = arith.constant 0.000000e+00 : f32
    %431 = vector.broadcast %cst_250 : f32 to vector<16x64xf32>
    %c1_251 = arith.constant 1 : index
    %c0_252 = arith.constant 0 : index
    %c0_253 = arith.constant 0 : index
    %c0_254 = arith.constant 0 : index
    %432 = vector.load %arg4[%c1_251, %c0_252, %c0_253, %c0_254] : memref<2x4x64x16xbf16, #tpu.memory_space<vmem>>, vector<1x1x64x16xbf16>
    %433 = vector.shape_cast %432 : vector<1x1x64x16xbf16> to vector<64x16xbf16>
    %cst_255 = arith.constant dense<0.000000e+00> : vector<16x16xf32>
    %434 = tpu.matmul %430, %433, %cst_255 {dimension_numbers = #tpu.dot_dimension_numbers<[1], [0], [0], [1], [0, 0, 1, 1], [], []>} : vector<16x64xbf16>, vector<64x16xbf16>, vector<16x16xf32> -> vector<16x16xf32>
    %c1_256 = arith.constant 1 : index
    %c0_257 = arith.constant 0 : index
    %c0_258 = arith.constant 0 : index
    %c0_259 = arith.constant 0 : index
    %435 = vector.load %arg5[%c1_256, %c0_257, %c0_258, %c0_259] : memref<2x4x1x16xf32, #tpu.memory_space<vmem>>, vector<1x1x1x16xf32>
    %436 = vector.shape_cast %435 : vector<1x1x1x16xf32> to vector<1x16xf32>
    %437 = vector.broadcast %436 : vector<1x16xf32> to vector<16x16xf32>
    %438 = arith.addf %434, %437 : vector<16x16xf32>
    %c1_260 = arith.constant 1 : index
    %c0_261 = arith.constant 0 : index
    %c0_262 = arith.constant 0 : index
    %c0_263 = arith.constant 0 : index
    %439 = vector.load %arg6[%c1_260, %c0_261, %c0_262, %c0_263] : memref<2x4x64x16xbf16, #tpu.memory_space<vmem>>, vector<1x1x64x16xbf16>
    %440 = vector.shape_cast %439 : vector<1x1x64x16xbf16> to vector<64x16xbf16>
    %cst_264 = arith.constant dense<0.000000e+00> : vector<16x16xf32>
    %441 = tpu.matmul %430, %440, %cst_264 {dimension_numbers = #tpu.dot_dimension_numbers<[1], [0], [0], [1], [0, 0, 1, 1], [], []>} : vector<16x64xbf16>, vector<64x16xbf16>, vector<16x16xf32> -> vector<16x16xf32>
    %c1_265 = arith.constant 1 : index
    %c0_266 = arith.constant 0 : index
    %c0_267 = arith.constant 0 : index
    %c0_268 = arith.constant 0 : index
    %442 = vector.load %arg7[%c1_265, %c0_266, %c0_267, %c0_268] : memref<2x4x1x16xf32, #tpu.memory_space<vmem>>, vector<1x1x1x16xf32>
    %443 = vector.shape_cast %442 : vector<1x1x1x16xf32> to vector<1x16xf32>
    %444 = vector.broadcast %443 : vector<1x16xf32> to vector<16x16xf32>
    %445 = arith.addf %441, %444 : vector<16x16xf32>
    %c1_269 = arith.constant 1 : index
    %c0_270 = arith.constant 0 : index
    %c0_271 = arith.constant 0 : index
    %c0_272 = arith.constant 0 : index
    %446 = vector.load %arg8[%c1_269, %c0_270, %c0_271, %c0_272] : memref<2x4x64x16xbf16, #tpu.memory_space<vmem>>, vector<1x1x64x16xbf16>
    %447 = vector.shape_cast %446 : vector<1x1x64x16xbf16> to vector<64x16xbf16>
    %cst_273 = arith.constant dense<0.000000e+00> : vector<16x16xf32>
    %448 = tpu.matmul %430, %447, %cst_273 {dimension_numbers = #tpu.dot_dimension_numbers<[1], [0], [0], [1], [0, 0, 1, 1], [], []>} : vector<16x64xbf16>, vector<64x16xbf16>, vector<16x16xf32> -> vector<16x16xf32>
    %c1_274 = arith.constant 1 : index
    %c0_275 = arith.constant 0 : index
    %c0_276 = arith.constant 0 : index
    %c0_277 = arith.constant 0 : index
    %449 = vector.load %arg9[%c1_274, %c0_275, %c0_276, %c0_277] : memref<2x4x1x16xf32, #tpu.memory_space<vmem>>, vector<1x1x1x16xf32>
    %450 = vector.shape_cast %449 : vector<1x1x1x16xf32> to vector<1x16xf32>
    %451 = vector.broadcast %450 : vector<1x16xf32> to vector<16x16xf32>
    %452 = arith.addf %448, %451 : vector<16x16xf32>
    %453 = vector.extract_strided_slice %438 {offsets = [0, 0], sizes = [8, 16], strides = [1, 1]} : vector<16x16xf32> to vector<8x16xf32>
    %cst_278 = arith.constant 2.500000e-01 : f32
    %454 = vector.broadcast %cst_278 : f32 to vector<8x16xf32>
    %455 = arith.mulf %453, %454 : vector<8x16xf32>
    %456 = vector.extract_strided_slice %445 {offsets = [0, 0], sizes = [8, 16], strides = [1, 1]} : vector<16x16xf32> to vector<8x16xf32>
    %457 = arith.truncf %455 : vector<8x16xf32> to vector<8x16xbf16>
    %458 = arith.truncf %456 : vector<8x16xf32> to vector<8x16xbf16>
    %cst_279 = arith.constant dense<0.000000e+00> : vector<8x8xf32>
    %459 = tpu.matmul %457, %458, %cst_279 {dimension_numbers = #tpu.dot_dimension_numbers<[1], [1], [0], [0], [0, 0, 1, 0], [], []>} : vector<8x16xbf16>, vector<8x16xbf16>, vector<8x8xf32> -> vector<8x8xf32>
    %c0_280 = arith.constant 0 : index
    %c0_281 = arith.constant 0 : index
    %c0_282 = arith.constant 0 : index
    %460 = vector.load %arg1[%c0_280, %c0_281, %c0_282] : memref<2x1x8xf32, #tpu.memory_space<vmem>>, vector<1x1x8xf32>
    %461 = vector.shape_cast %460 : vector<1x1x8xf32> to vector<1x8xf32>
    %462 = vector.broadcast %461 : vector<1x8xf32> to vector<8x8xf32>
    %463 = arith.addf %459, %462 : vector<8x8xf32>
    %cst_283 = arith.constant dense<0xFF800000> : vector<8xf32>
    %464 = vector.multi_reduction <maximumf>, %463, %cst_283 [1] : vector<8x8xf32> to vector<8xf32>
    %cst_284 = arith.constant 0xFF800000 : f32
    %465 = vector.broadcast %cst_284 : f32 to vector<8xf32>
    %466 = arith.maximumf %465, %464 : vector<8xf32>
    %467 = vector.shape_cast %466 : vector<8xf32> to vector<8x1xf32>
    %468 = vector.broadcast %467 : vector<8x1xf32> to vector<8x8xf32>
    %469 = arith.subf %463, %468 : vector<8x8xf32>
    %470 = math.exp %469 : vector<8x8xf32>
    %cst_285 = arith.constant dense<0.000000e+00> : vector<8xf32>
    %471 = vector.multi_reduction <add>, %470, %cst_285 [1] : vector<8x8xf32> to vector<8xf32>
    %472 = vector.shape_cast %471 : vector<8xf32> to vector<8x1xf32>
    %473 = vector.broadcast %472 : vector<8x1xf32> to vector<8x8xf32>
    %474 = arith.divf %470, %473 : vector<8x8xf32>
    %475 = vector.extract_strided_slice %452 {offsets = [0, 0], sizes = [8, 16], strides = [1, 1]} : vector<16x16xf32> to vector<8x16xf32>
    %476 = arith.truncf %474 : vector<8x8xf32> to vector<8x8xbf16>
    %477 = arith.truncf %475 : vector<8x16xf32> to vector<8x16xbf16>
    %cst_286 = arith.constant dense<0.000000e+00> : vector<8x16xf32>
    %478 = tpu.matmul %476, %477, %cst_286 {dimension_numbers = #tpu.dot_dimension_numbers<[1], [0], [0], [1], [0, 0, 1, 1], [], []>} : vector<8x8xbf16>, vector<8x16xbf16>, vector<8x16xf32> -> vector<8x16xf32>
    %479 = vector.extract_strided_slice %438 {offsets = [8, 0], sizes = [8, 16], strides = [1, 1]} : vector<16x16xf32> to vector<8x16xf32>
    %cst_287 = arith.constant 2.500000e-01 : f32
    %480 = vector.broadcast %cst_287 : f32 to vector<8x16xf32>
    %481 = arith.mulf %479, %480 : vector<8x16xf32>
    %482 = vector.extract_strided_slice %445 {offsets = [8, 0], sizes = [8, 16], strides = [1, 1]} : vector<16x16xf32> to vector<8x16xf32>
    %483 = arith.truncf %481 : vector<8x16xf32> to vector<8x16xbf16>
    %484 = arith.truncf %482 : vector<8x16xf32> to vector<8x16xbf16>
    %cst_288 = arith.constant dense<0.000000e+00> : vector<8x8xf32>
    %485 = tpu.matmul %483, %484, %cst_288 {dimension_numbers = #tpu.dot_dimension_numbers<[1], [1], [0], [0], [0, 0, 1, 0], [], []>} : vector<8x16xbf16>, vector<8x16xbf16>, vector<8x8xf32> -> vector<8x8xf32>
    %c1_289 = arith.constant 1 : index
    %c0_290 = arith.constant 0 : index
    %c0_291 = arith.constant 0 : index
    %486 = vector.load %arg1[%c1_289, %c0_290, %c0_291] : memref<2x1x8xf32, #tpu.memory_space<vmem>>, vector<1x1x8xf32>
    %487 = vector.shape_cast %486 : vector<1x1x8xf32> to vector<1x8xf32>
    %488 = vector.broadcast %487 : vector<1x8xf32> to vector<8x8xf32>
    %489 = arith.addf %485, %488 : vector<8x8xf32>
    %cst_292 = arith.constant dense<0xFF800000> : vector<8xf32>
    %490 = vector.multi_reduction <maximumf>, %489, %cst_292 [1] : vector<8x8xf32> to vector<8xf32>
    %cst_293 = arith.constant 0xFF800000 : f32
    %491 = vector.broadcast %cst_293 : f32 to vector<8xf32>
    %492 = arith.maximumf %491, %490 : vector<8xf32>
    %493 = vector.shape_cast %492 : vector<8xf32> to vector<8x1xf32>
    %494 = vector.broadcast %493 : vector<8x1xf32> to vector<8x8xf32>
    %495 = arith.subf %489, %494 : vector<8x8xf32>
    %496 = math.exp %495 : vector<8x8xf32>
    %cst_294 = arith.constant dense<0.000000e+00> : vector<8xf32>
    %497 = vector.multi_reduction <add>, %496, %cst_294 [1] : vector<8x8xf32> to vector<8xf32>
    %498 = vector.shape_cast %497 : vector<8xf32> to vector<8x1xf32>
    %499 = vector.broadcast %498 : vector<8x1xf32> to vector<8x8xf32>
    %500 = arith.divf %496, %499 : vector<8x8xf32>
    %501 = vector.extract_strided_slice %452 {offsets = [8, 0], sizes = [8, 16], strides = [1, 1]} : vector<16x16xf32> to vector<8x16xf32>
    %502 = arith.truncf %500 : vector<8x8xf32> to vector<8x8xbf16>
    %503 = arith.truncf %501 : vector<8x16xf32> to vector<8x16xbf16>
    %cst_295 = arith.constant dense<0.000000e+00> : vector<8x16xf32>
    %504 = tpu.matmul %502, %503, %cst_295 {dimension_numbers = #tpu.dot_dimension_numbers<[1], [0], [0], [1], [0, 0, 1, 1], [], []>} : vector<8x8xbf16>, vector<8x16xbf16>, vector<8x16xf32> -> vector<8x16xf32>
    %505 = tpu.concatenate %478, %504 in 0 : vector<8x16xf32>, vector<8x16xf32> -> vector<16x16xf32>
    %506 = arith.truncf %505 : vector<16x16xf32> to vector<16x16xbf16>
    %c1_296 = arith.constant 1 : index
    %c0_297 = arith.constant 0 : index
    %c0_298 = arith.constant 0 : index
    %c0_299 = arith.constant 0 : index
    %507 = vector.load %arg10[%c1_296, %c0_297, %c0_298, %c0_299] : memref<2x4x16x64xbf16, #tpu.memory_space<vmem>>, vector<1x1x16x64xbf16>
    %508 = vector.shape_cast %507 : vector<1x1x16x64xbf16> to vector<16x64xbf16>
    %cst_300 = arith.constant dense<0.000000e+00> : vector<16x64xf32>
    %509 = tpu.matmul %506, %508, %cst_300 {dimension_numbers = #tpu.dot_dimension_numbers<[1], [0], [0], [1], [0, 0, 1, 1], [], []>} : vector<16x16xbf16>, vector<16x64xbf16>, vector<16x64xf32> -> vector<16x64xf32>
    %510 = arith.addf %431, %509 : vector<16x64xf32>
    %c1_301 = arith.constant 1 : index
    %c1_302 = arith.constant 1 : index
    %c0_303 = arith.constant 0 : index
    %c0_304 = arith.constant 0 : index
    %511 = vector.load %arg4[%c1_301, %c1_302, %c0_303, %c0_304] : memref<2x4x64x16xbf16, #tpu.memory_space<vmem>>, vector<1x1x64x16xbf16>
    %512 = vector.shape_cast %511 : vector<1x1x64x16xbf16> to vector<64x16xbf16>
    %cst_305 = arith.constant dense<0.000000e+00> : vector<16x16xf32>
    %513 = tpu.matmul %430, %512, %cst_305 {dimension_numbers = #tpu.dot_dimension_numbers<[1], [0], [0], [1], [0, 0, 1, 1], [], []>} : vector<16x64xbf16>, vector<64x16xbf16>, vector<16x16xf32> -> vector<16x16xf32>
    %c1_306 = arith.constant 1 : index
    %c1_307 = arith.constant 1 : index
    %c0_308 = arith.constant 0 : index
    %c0_309 = arith.constant 0 : index
    %514 = vector.load %arg5[%c1_306, %c1_307, %c0_308, %c0_309] : memref<2x4x1x16xf32, #tpu.memory_space<vmem>>, vector<1x1x1x16xf32>
    %515 = vector.shape_cast %514 : vector<1x1x1x16xf32> to vector<1x16xf32>
    %516 = vector.broadcast %515 : vector<1x16xf32> to vector<16x16xf32>
    %517 = arith.addf %513, %516 : vector<16x16xf32>
    %c1_310 = arith.constant 1 : index
    %c1_311 = arith.constant 1 : index
    %c0_312 = arith.constant 0 : index
    %c0_313 = arith.constant 0 : index
    %518 = vector.load %arg6[%c1_310, %c1_311, %c0_312, %c0_313] : memref<2x4x64x16xbf16, #tpu.memory_space<vmem>>, vector<1x1x64x16xbf16>
    %519 = vector.shape_cast %518 : vector<1x1x64x16xbf16> to vector<64x16xbf16>
    %cst_314 = arith.constant dense<0.000000e+00> : vector<16x16xf32>
    %520 = tpu.matmul %430, %519, %cst_314 {dimension_numbers = #tpu.dot_dimension_numbers<[1], [0], [0], [1], [0, 0, 1, 1], [], []>} : vector<16x64xbf16>, vector<64x16xbf16>, vector<16x16xf32> -> vector<16x16xf32>
    %c1_315 = arith.constant 1 : index
    %c1_316 = arith.constant 1 : index
    %c0_317 = arith.constant 0 : index
    %c0_318 = arith.constant 0 : index
    %521 = vector.load %arg7[%c1_315, %c1_316, %c0_317, %c0_318] : memref<2x4x1x16xf32, #tpu.memory_space<vmem>>, vector<1x1x1x16xf32>
    %522 = vector.shape_cast %521 : vector<1x1x1x16xf32> to vector<1x16xf32>
    %523 = vector.broadcast %522 : vector<1x16xf32> to vector<16x16xf32>
    %524 = arith.addf %520, %523 : vector<16x16xf32>
    %c1_319 = arith.constant 1 : index
    %c1_320 = arith.constant 1 : index
    %c0_321 = arith.constant 0 : index
    %c0_322 = arith.constant 0 : index
    %525 = vector.load %arg8[%c1_319, %c1_320, %c0_321, %c0_322] : memref<2x4x64x16xbf16, #tpu.memory_space<vmem>>, vector<1x1x64x16xbf16>
    %526 = vector.shape_cast %525 : vector<1x1x64x16xbf16> to vector<64x16xbf16>
    %cst_323 = arith.constant dense<0.000000e+00> : vector<16x16xf32>
    %527 = tpu.matmul %430, %526, %cst_323 {dimension_numbers = #tpu.dot_dimension_numbers<[1], [0], [0], [1], [0, 0, 1, 1], [], []>} : vector<16x64xbf16>, vector<64x16xbf16>, vector<16x16xf32> -> vector<16x16xf32>
    %c1_324 = arith.constant 1 : index
    %c1_325 = arith.constant 1 : index
    %c0_326 = arith.constant 0 : index
    %c0_327 = arith.constant 0 : index
    %528 = vector.load %arg9[%c1_324, %c1_325, %c0_326, %c0_327] : memref<2x4x1x16xf32, #tpu.memory_space<vmem>>, vector<1x1x1x16xf32>
    %529 = vector.shape_cast %528 : vector<1x1x1x16xf32> to vector<1x16xf32>
    %530 = vector.broadcast %529 : vector<1x16xf32> to vector<16x16xf32>
    %531 = arith.addf %527, %530 : vector<16x16xf32>
    %532 = vector.extract_strided_slice %517 {offsets = [0, 0], sizes = [8, 16], strides = [1, 1]} : vector<16x16xf32> to vector<8x16xf32>
    %cst_328 = arith.constant 2.500000e-01 : f32
    %533 = vector.broadcast %cst_328 : f32 to vector<8x16xf32>
    %534 = arith.mulf %532, %533 : vector<8x16xf32>
    %535 = vector.extract_strided_slice %524 {offsets = [0, 0], sizes = [8, 16], strides = [1, 1]} : vector<16x16xf32> to vector<8x16xf32>
    %536 = arith.truncf %534 : vector<8x16xf32> to vector<8x16xbf16>
    %537 = arith.truncf %535 : vector<8x16xf32> to vector<8x16xbf16>
    %cst_329 = arith.constant dense<0.000000e+00> : vector<8x8xf32>
    %538 = tpu.matmul %536, %537, %cst_329 {dimension_numbers = #tpu.dot_dimension_numbers<[1], [1], [0], [0], [0, 0, 1, 0], [], []>} : vector<8x16xbf16>, vector<8x16xbf16>, vector<8x8xf32> -> vector<8x8xf32>
    %c0_330 = arith.constant 0 : index
    %c0_331 = arith.constant 0 : index
    %c0_332 = arith.constant 0 : index
    %539 = vector.load %arg1[%c0_330, %c0_331, %c0_332] : memref<2x1x8xf32, #tpu.memory_space<vmem>>, vector<1x1x8xf32>
    %540 = vector.shape_cast %539 : vector<1x1x8xf32> to vector<1x8xf32>
    %541 = vector.broadcast %540 : vector<1x8xf32> to vector<8x8xf32>
    %542 = arith.addf %538, %541 : vector<8x8xf32>
    %cst_333 = arith.constant dense<0xFF800000> : vector<8xf32>
    %543 = vector.multi_reduction <maximumf>, %542, %cst_333 [1] : vector<8x8xf32> to vector<8xf32>
    %cst_334 = arith.constant 0xFF800000 : f32
    %544 = vector.broadcast %cst_334 : f32 to vector<8xf32>
    %545 = arith.maximumf %544, %543 : vector<8xf32>
    %546 = vector.shape_cast %545 : vector<8xf32> to vector<8x1xf32>
    %547 = vector.broadcast %546 : vector<8x1xf32> to vector<8x8xf32>
    %548 = arith.subf %542, %547 : vector<8x8xf32>
    %549 = math.exp %548 : vector<8x8xf32>
    %cst_335 = arith.constant dense<0.000000e+00> : vector<8xf32>
    %550 = vector.multi_reduction <add>, %549, %cst_335 [1] : vector<8x8xf32> to vector<8xf32>
    %551 = vector.shape_cast %550 : vector<8xf32> to vector<8x1xf32>
    %552 = vector.broadcast %551 : vector<8x1xf32> to vector<8x8xf32>
    %553 = arith.divf %549, %552 : vector<8x8xf32>
    %554 = vector.extract_strided_slice %531 {offsets = [0, 0], sizes = [8, 16], strides = [1, 1]} : vector<16x16xf32> to vector<8x16xf32>
    %555 = arith.truncf %553 : vector<8x8xf32> to vector<8x8xbf16>
    %556 = arith.truncf %554 : vector<8x16xf32> to vector<8x16xbf16>
    %cst_336 = arith.constant dense<0.000000e+00> : vector<8x16xf32>
    %557 = tpu.matmul %555, %556, %cst_336 {dimension_numbers = #tpu.dot_dimension_numbers<[1], [0], [0], [1], [0, 0, 1, 1], [], []>} : vector<8x8xbf16>, vector<8x16xbf16>, vector<8x16xf32> -> vector<8x16xf32>
    %558 = vector.extract_strided_slice %517 {offsets = [8, 0], sizes = [8, 16], strides = [1, 1]} : vector<16x16xf32> to vector<8x16xf32>
    %cst_337 = arith.constant 2.500000e-01 : f32
    %559 = vector.broadcast %cst_337 : f32 to vector<8x16xf32>
    %560 = arith.mulf %558, %559 : vector<8x16xf32>
    %561 = vector.extract_strided_slice %524 {offsets = [8, 0], sizes = [8, 16], strides = [1, 1]} : vector<16x16xf32> to vector<8x16xf32>
    %562 = arith.truncf %560 : vector<8x16xf32> to vector<8x16xbf16>
    %563 = arith.truncf %561 : vector<8x16xf32> to vector<8x16xbf16>
    %cst_338 = arith.constant dense<0.000000e+00> : vector<8x8xf32>
    %564 = tpu.matmul %562, %563, %cst_338 {dimension_numbers = #tpu.dot_dimension_numbers<[1], [1], [0], [0], [0, 0, 1, 0], [], []>} : vector<8x16xbf16>, vector<8x16xbf16>, vector<8x8xf32> -> vector<8x8xf32>
    %c1_339 = arith.constant 1 : index
    %c0_340 = arith.constant 0 : index
    %c0_341 = arith.constant 0 : index
    %565 = vector.load %arg1[%c1_339, %c0_340, %c0_341] : memref<2x1x8xf32, #tpu.memory_space<vmem>>, vector<1x1x8xf32>
    %566 = vector.shape_cast %565 : vector<1x1x8xf32> to vector<1x8xf32>
    %567 = vector.broadcast %566 : vector<1x8xf32> to vector<8x8xf32>
    %568 = arith.addf %564, %567 : vector<8x8xf32>
    %cst_342 = arith.constant dense<0xFF800000> : vector<8xf32>
    %569 = vector.multi_reduction <maximumf>, %568, %cst_342 [1] : vector<8x8xf32> to vector<8xf32>
    %cst_343 = arith.constant 0xFF800000 : f32
    %570 = vector.broadcast %cst_343 : f32 to vector<8xf32>
    %571 = arith.maximumf %570, %569 : vector<8xf32>
    %572 = vector.shape_cast %571 : vector<8xf32> to vector<8x1xf32>
    %573 = vector.broadcast %572 : vector<8x1xf32> to vector<8x8xf32>
    %574 = arith.subf %568, %573 : vector<8x8xf32>
    %575 = math.exp %574 : vector<8x8xf32>
    %cst_344 = arith.constant dense<0.000000e+00> : vector<8xf32>
    %576 = vector.multi_reduction <add>, %575, %cst_344 [1] : vector<8x8xf32> to vector<8xf32>
    %577 = vector.shape_cast %576 : vector<8xf32> to vector<8x1xf32>
    %578 = vector.broadcast %577 : vector<8x1xf32> to vector<8x8xf32>
    %579 = arith.divf %575, %578 : vector<8x8xf32>
    %580 = vector.extract_strided_slice %531 {offsets = [8, 0], sizes = [8, 16], strides = [1, 1]} : vector<16x16xf32> to vector<8x16xf32>
    %581 = arith.truncf %579 : vector<8x8xf32> to vector<8x8xbf16>
    %582 = arith.truncf %580 : vector<8x16xf32> to vector<8x16xbf16>
    %cst_345 = arith.constant dense<0.000000e+00> : vector<8x16xf32>
    %583 = tpu.matmul %581, %582, %cst_345 {dimension_numbers = #tpu.dot_dimension_numbers<[1], [0], [0], [1], [0, 0, 1, 1], [], []>} : vector<8x8xbf16>, vector<8x16xbf16>, vector<8x16xf32> -> vector<8x16xf32>
    %584 = tpu.concatenate %557, %583 in 0 : vector<8x16xf32>, vector<8x16xf32> -> vector<16x16xf32>
    %585 = arith.truncf %584 : vector<16x16xf32> to vector<16x16xbf16>
    %c1_346 = arith.constant 1 : index
    %c1_347 = arith.constant 1 : index
    %c0_348 = arith.constant 0 : index
    %c0_349 = arith.constant 0 : index
    %586 = vector.load %arg10[%c1_346, %c1_347, %c0_348, %c0_349] : memref<2x4x16x64xbf16, #tpu.memory_space<vmem>>, vector<1x1x16x64xbf16>
    %587 = vector.shape_cast %586 : vector<1x1x16x64xbf16> to vector<16x64xbf16>
    %cst_350 = arith.constant dense<0.000000e+00> : vector<16x64xf32>
    %588 = tpu.matmul %585, %587, %cst_350 {dimension_numbers = #tpu.dot_dimension_numbers<[1], [0], [0], [1], [0, 0, 1, 1], [], []>} : vector<16x16xbf16>, vector<16x64xbf16>, vector<16x64xf32> -> vector<16x64xf32>
    %589 = arith.addf %510, %588 : vector<16x64xf32>
    %c1_351 = arith.constant 1 : index
    %c2_352 = arith.constant 2 : index
    %c0_353 = arith.constant 0 : index
    %c0_354 = arith.constant 0 : index
    %590 = vector.load %arg4[%c1_351, %c2_352, %c0_353, %c0_354] : memref<2x4x64x16xbf16, #tpu.memory_space<vmem>>, vector<1x1x64x16xbf16>
    %591 = vector.shape_cast %590 : vector<1x1x64x16xbf16> to vector<64x16xbf16>
    %cst_355 = arith.constant dense<0.000000e+00> : vector<16x16xf32>
    %592 = tpu.matmul %430, %591, %cst_355 {dimension_numbers = #tpu.dot_dimension_numbers<[1], [0], [0], [1], [0, 0, 1, 1], [], []>} : vector<16x64xbf16>, vector<64x16xbf16>, vector<16x16xf32> -> vector<16x16xf32>
    %c1_356 = arith.constant 1 : index
    %c2_357 = arith.constant 2 : index
    %c0_358 = arith.constant 0 : index
    %c0_359 = arith.constant 0 : index
    %593 = vector.load %arg5[%c1_356, %c2_357, %c0_358, %c0_359] : memref<2x4x1x16xf32, #tpu.memory_space<vmem>>, vector<1x1x1x16xf32>
    %594 = vector.shape_cast %593 : vector<1x1x1x16xf32> to vector<1x16xf32>
    %595 = vector.broadcast %594 : vector<1x16xf32> to vector<16x16xf32>
    %596 = arith.addf %592, %595 : vector<16x16xf32>
    %c1_360 = arith.constant 1 : index
    %c2_361 = arith.constant 2 : index
    %c0_362 = arith.constant 0 : index
    %c0_363 = arith.constant 0 : index
    %597 = vector.load %arg6[%c1_360, %c2_361, %c0_362, %c0_363] : memref<2x4x64x16xbf16, #tpu.memory_space<vmem>>, vector<1x1x64x16xbf16>
    %598 = vector.shape_cast %597 : vector<1x1x64x16xbf16> to vector<64x16xbf16>
    %cst_364 = arith.constant dense<0.000000e+00> : vector<16x16xf32>
    %599 = tpu.matmul %430, %598, %cst_364 {dimension_numbers = #tpu.dot_dimension_numbers<[1], [0], [0], [1], [0, 0, 1, 1], [], []>} : vector<16x64xbf16>, vector<64x16xbf16>, vector<16x16xf32> -> vector<16x16xf32>
    %c1_365 = arith.constant 1 : index
    %c2_366 = arith.constant 2 : index
    %c0_367 = arith.constant 0 : index
    %c0_368 = arith.constant 0 : index
    %600 = vector.load %arg7[%c1_365, %c2_366, %c0_367, %c0_368] : memref<2x4x1x16xf32, #tpu.memory_space<vmem>>, vector<1x1x1x16xf32>
    %601 = vector.shape_cast %600 : vector<1x1x1x16xf32> to vector<1x16xf32>
    %602 = vector.broadcast %601 : vector<1x16xf32> to vector<16x16xf32>
    %603 = arith.addf %599, %602 : vector<16x16xf32>
    %c1_369 = arith.constant 1 : index
    %c2_370 = arith.constant 2 : index
    %c0_371 = arith.constant 0 : index
    %c0_372 = arith.constant 0 : index
    %604 = vector.load %arg8[%c1_369, %c2_370, %c0_371, %c0_372] : memref<2x4x64x16xbf16, #tpu.memory_space<vmem>>, vector<1x1x64x16xbf16>
    %605 = vector.shape_cast %604 : vector<1x1x64x16xbf16> to vector<64x16xbf16>
    %cst_373 = arith.constant dense<0.000000e+00> : vector<16x16xf32>
    %606 = tpu.matmul %430, %605, %cst_373 {dimension_numbers = #tpu.dot_dimension_numbers<[1], [0], [0], [1], [0, 0, 1, 1], [], []>} : vector<16x64xbf16>, vector<64x16xbf16>, vector<16x16xf32> -> vector<16x16xf32>
    %c1_374 = arith.constant 1 : index
    %c2_375 = arith.constant 2 : index
    %c0_376 = arith.constant 0 : index
    %c0_377 = arith.constant 0 : index
    %607 = vector.load %arg9[%c1_374, %c2_375, %c0_376, %c0_377] : memref<2x4x1x16xf32, #tpu.memory_space<vmem>>, vector<1x1x1x16xf32>
    %608 = vector.shape_cast %607 : vector<1x1x1x16xf32> to vector<1x16xf32>
    %609 = vector.broadcast %608 : vector<1x16xf32> to vector<16x16xf32>
    %610 = arith.addf %606, %609 : vector<16x16xf32>
    %611 = vector.extract_strided_slice %596 {offsets = [0, 0], sizes = [8, 16], strides = [1, 1]} : vector<16x16xf32> to vector<8x16xf32>
    %cst_378 = arith.constant 2.500000e-01 : f32
    %612 = vector.broadcast %cst_378 : f32 to vector<8x16xf32>
    %613 = arith.mulf %611, %612 : vector<8x16xf32>
    %614 = vector.extract_strided_slice %603 {offsets = [0, 0], sizes = [8, 16], strides = [1, 1]} : vector<16x16xf32> to vector<8x16xf32>
    %615 = arith.truncf %613 : vector<8x16xf32> to vector<8x16xbf16>
    %616 = arith.truncf %614 : vector<8x16xf32> to vector<8x16xbf16>
    %cst_379 = arith.constant dense<0.000000e+00> : vector<8x8xf32>
    %617 = tpu.matmul %615, %616, %cst_379 {dimension_numbers = #tpu.dot_dimension_numbers<[1], [1], [0], [0], [0, 0, 1, 0], [], []>} : vector<8x16xbf16>, vector<8x16xbf16>, vector<8x8xf32> -> vector<8x8xf32>
    %c0_380 = arith.constant 0 : index
    %c0_381 = arith.constant 0 : index
    %c0_382 = arith.constant 0 : index
    %618 = vector.load %arg1[%c0_380, %c0_381, %c0_382] : memref<2x1x8xf32, #tpu.memory_space<vmem>>, vector<1x1x8xf32>
    %619 = vector.shape_cast %618 : vector<1x1x8xf32> to vector<1x8xf32>
    %620 = vector.broadcast %619 : vector<1x8xf32> to vector<8x8xf32>
    %621 = arith.addf %617, %620 : vector<8x8xf32>
    %cst_383 = arith.constant dense<0xFF800000> : vector<8xf32>
    %622 = vector.multi_reduction <maximumf>, %621, %cst_383 [1] : vector<8x8xf32> to vector<8xf32>
    %cst_384 = arith.constant 0xFF800000 : f32
    %623 = vector.broadcast %cst_384 : f32 to vector<8xf32>
    %624 = arith.maximumf %623, %622 : vector<8xf32>
    %625 = vector.shape_cast %624 : vector<8xf32> to vector<8x1xf32>
    %626 = vector.broadcast %625 : vector<8x1xf32> to vector<8x8xf32>
    %627 = arith.subf %621, %626 : vector<8x8xf32>
    %628 = math.exp %627 : vector<8x8xf32>
    %cst_385 = arith.constant dense<0.000000e+00> : vector<8xf32>
    %629 = vector.multi_reduction <add>, %628, %cst_385 [1] : vector<8x8xf32> to vector<8xf32>
    %630 = vector.shape_cast %629 : vector<8xf32> to vector<8x1xf32>
    %631 = vector.broadcast %630 : vector<8x1xf32> to vector<8x8xf32>
    %632 = arith.divf %628, %631 : vector<8x8xf32>
    %633 = vector.extract_strided_slice %610 {offsets = [0, 0], sizes = [8, 16], strides = [1, 1]} : vector<16x16xf32> to vector<8x16xf32>
    %634 = arith.truncf %632 : vector<8x8xf32> to vector<8x8xbf16>
    %635 = arith.truncf %633 : vector<8x16xf32> to vector<8x16xbf16>
    %cst_386 = arith.constant dense<0.000000e+00> : vector<8x16xf32>
    %636 = tpu.matmul %634, %635, %cst_386 {dimension_numbers = #tpu.dot_dimension_numbers<[1], [0], [0], [1], [0, 0, 1, 1], [], []>} : vector<8x8xbf16>, vector<8x16xbf16>, vector<8x16xf32> -> vector<8x16xf32>
    %637 = vector.extract_strided_slice %596 {offsets = [8, 0], sizes = [8, 16], strides = [1, 1]} : vector<16x16xf32> to vector<8x16xf32>
    %cst_387 = arith.constant 2.500000e-01 : f32
    %638 = vector.broadcast %cst_387 : f32 to vector<8x16xf32>
    %639 = arith.mulf %637, %638 : vector<8x16xf32>
    %640 = vector.extract_strided_slice %603 {offsets = [8, 0], sizes = [8, 16], strides = [1, 1]} : vector<16x16xf32> to vector<8x16xf32>
    %641 = arith.truncf %639 : vector<8x16xf32> to vector<8x16xbf16>
    %642 = arith.truncf %640 : vector<8x16xf32> to vector<8x16xbf16>
    %cst_388 = arith.constant dense<0.000000e+00> : vector<8x8xf32>
    %643 = tpu.matmul %641, %642, %cst_388 {dimension_numbers = #tpu.dot_dimension_numbers<[1], [1], [0], [0], [0, 0, 1, 0], [], []>} : vector<8x16xbf16>, vector<8x16xbf16>, vector<8x8xf32> -> vector<8x8xf32>
    %c1_389 = arith.constant 1 : index
    %c0_390 = arith.constant 0 : index
    %c0_391 = arith.constant 0 : index
    %644 = vector.load %arg1[%c1_389, %c0_390, %c0_391] : memref<2x1x8xf32, #tpu.memory_space<vmem>>, vector<1x1x8xf32>
    %645 = vector.shape_cast %644 : vector<1x1x8xf32> to vector<1x8xf32>
    %646 = vector.broadcast %645 : vector<1x8xf32> to vector<8x8xf32>
    %647 = arith.addf %643, %646 : vector<8x8xf32>
    %cst_392 = arith.constant dense<0xFF800000> : vector<8xf32>
    %648 = vector.multi_reduction <maximumf>, %647, %cst_392 [1] : vector<8x8xf32> to vector<8xf32>
    %cst_393 = arith.constant 0xFF800000 : f32
    %649 = vector.broadcast %cst_393 : f32 to vector<8xf32>
    %650 = arith.maximumf %649, %648 : vector<8xf32>
    %651 = vector.shape_cast %650 : vector<8xf32> to vector<8x1xf32>
    %652 = vector.broadcast %651 : vector<8x1xf32> to vector<8x8xf32>
    %653 = arith.subf %647, %652 : vector<8x8xf32>
    %654 = math.exp %653 : vector<8x8xf32>
    %cst_394 = arith.constant dense<0.000000e+00> : vector<8xf32>
    %655 = vector.multi_reduction <add>, %654, %cst_394 [1] : vector<8x8xf32> to vector<8xf32>
    %656 = vector.shape_cast %655 : vector<8xf32> to vector<8x1xf32>
    %657 = vector.broadcast %656 : vector<8x1xf32> to vector<8x8xf32>
    %658 = arith.divf %654, %657 : vector<8x8xf32>
    %659 = vector.extract_strided_slice %610 {offsets = [8, 0], sizes = [8, 16], strides = [1, 1]} : vector<16x16xf32> to vector<8x16xf32>
    %660 = arith.truncf %658 : vector<8x8xf32> to vector<8x8xbf16>
    %661 = arith.truncf %659 : vector<8x16xf32> to vector<8x16xbf16>
    %cst_395 = arith.constant dense<0.000000e+00> : vector<8x16xf32>
    %662 = tpu.matmul %660, %661, %cst_395 {dimension_numbers = #tpu.dot_dimension_numbers<[1], [0], [0], [1], [0, 0, 1, 1], [], []>} : vector<8x8xbf16>, vector<8x16xbf16>, vector<8x16xf32> -> vector<8x16xf32>
    %663 = tpu.concatenate %636, %662 in 0 : vector<8x16xf32>, vector<8x16xf32> -> vector<16x16xf32>
    %664 = arith.truncf %663 : vector<16x16xf32> to vector<16x16xbf16>
    %c1_396 = arith.constant 1 : index
    %c2_397 = arith.constant 2 : index
    %c0_398 = arith.constant 0 : index
    %c0_399 = arith.constant 0 : index
    %665 = vector.load %arg10[%c1_396, %c2_397, %c0_398, %c0_399] : memref<2x4x16x64xbf16, #tpu.memory_space<vmem>>, vector<1x1x16x64xbf16>
    %666 = vector.shape_cast %665 : vector<1x1x16x64xbf16> to vector<16x64xbf16>
    %cst_400 = arith.constant dense<0.000000e+00> : vector<16x64xf32>
    %667 = tpu.matmul %664, %666, %cst_400 {dimension_numbers = #tpu.dot_dimension_numbers<[1], [0], [0], [1], [0, 0, 1, 1], [], []>} : vector<16x16xbf16>, vector<16x64xbf16>, vector<16x64xf32> -> vector<16x64xf32>
    %668 = arith.addf %589, %667 : vector<16x64xf32>
    %c1_401 = arith.constant 1 : index
    %c3_402 = arith.constant 3 : index
    %c0_403 = arith.constant 0 : index
    %c0_404 = arith.constant 0 : index
    %669 = vector.load %arg4[%c1_401, %c3_402, %c0_403, %c0_404] : memref<2x4x64x16xbf16, #tpu.memory_space<vmem>>, vector<1x1x64x16xbf16>
    %670 = vector.shape_cast %669 : vector<1x1x64x16xbf16> to vector<64x16xbf16>
    %cst_405 = arith.constant dense<0.000000e+00> : vector<16x16xf32>
    %671 = tpu.matmul %430, %670, %cst_405 {dimension_numbers = #tpu.dot_dimension_numbers<[1], [0], [0], [1], [0, 0, 1, 1], [], []>} : vector<16x64xbf16>, vector<64x16xbf16>, vector<16x16xf32> -> vector<16x16xf32>
    %c1_406 = arith.constant 1 : index
    %c3_407 = arith.constant 3 : index
    %c0_408 = arith.constant 0 : index
    %c0_409 = arith.constant 0 : index
    %672 = vector.load %arg5[%c1_406, %c3_407, %c0_408, %c0_409] : memref<2x4x1x16xf32, #tpu.memory_space<vmem>>, vector<1x1x1x16xf32>
    %673 = vector.shape_cast %672 : vector<1x1x1x16xf32> to vector<1x16xf32>
    %674 = vector.broadcast %673 : vector<1x16xf32> to vector<16x16xf32>
    %675 = arith.addf %671, %674 : vector<16x16xf32>
    %c1_410 = arith.constant 1 : index
    %c3_411 = arith.constant 3 : index
    %c0_412 = arith.constant 0 : index
    %c0_413 = arith.constant 0 : index
    %676 = vector.load %arg6[%c1_410, %c3_411, %c0_412, %c0_413] : memref<2x4x64x16xbf16, #tpu.memory_space<vmem>>, vector<1x1x64x16xbf16>
    %677 = vector.shape_cast %676 : vector<1x1x64x16xbf16> to vector<64x16xbf16>
    %cst_414 = arith.constant dense<0.000000e+00> : vector<16x16xf32>
    %678 = tpu.matmul %430, %677, %cst_414 {dimension_numbers = #tpu.dot_dimension_numbers<[1], [0], [0], [1], [0, 0, 1, 1], [], []>} : vector<16x64xbf16>, vector<64x16xbf16>, vector<16x16xf32> -> vector<16x16xf32>
    %c1_415 = arith.constant 1 : index
    %c3_416 = arith.constant 3 : index
    %c0_417 = arith.constant 0 : index
    %c0_418 = arith.constant 0 : index
    %679 = vector.load %arg7[%c1_415, %c3_416, %c0_417, %c0_418] : memref<2x4x1x16xf32, #tpu.memory_space<vmem>>, vector<1x1x1x16xf32>
    %680 = vector.shape_cast %679 : vector<1x1x1x16xf32> to vector<1x16xf32>
    %681 = vector.broadcast %680 : vector<1x16xf32> to vector<16x16xf32>
    %682 = arith.addf %678, %681 : vector<16x16xf32>
    %c1_419 = arith.constant 1 : index
    %c3_420 = arith.constant 3 : index
    %c0_421 = arith.constant 0 : index
    %c0_422 = arith.constant 0 : index
    %683 = vector.load %arg8[%c1_419, %c3_420, %c0_421, %c0_422] : memref<2x4x64x16xbf16, #tpu.memory_space<vmem>>, vector<1x1x64x16xbf16>
    %684 = vector.shape_cast %683 : vector<1x1x64x16xbf16> to vector<64x16xbf16>
    %cst_423 = arith.constant dense<0.000000e+00> : vector<16x16xf32>
    %685 = tpu.matmul %430, %684, %cst_423 {dimension_numbers = #tpu.dot_dimension_numbers<[1], [0], [0], [1], [0, 0, 1, 1], [], []>} : vector<16x64xbf16>, vector<64x16xbf16>, vector<16x16xf32> -> vector<16x16xf32>
    %c1_424 = arith.constant 1 : index
    %c3_425 = arith.constant 3 : index
    %c0_426 = arith.constant 0 : index
    %c0_427 = arith.constant 0 : index
    %686 = vector.load %arg9[%c1_424, %c3_425, %c0_426, %c0_427] : memref<2x4x1x16xf32, #tpu.memory_space<vmem>>, vector<1x1x1x16xf32>
    %687 = vector.shape_cast %686 : vector<1x1x1x16xf32> to vector<1x16xf32>
    %688 = vector.broadcast %687 : vector<1x16xf32> to vector<16x16xf32>
    %689 = arith.addf %685, %688 : vector<16x16xf32>
    %690 = vector.extract_strided_slice %675 {offsets = [0, 0], sizes = [8, 16], strides = [1, 1]} : vector<16x16xf32> to vector<8x16xf32>
    %cst_428 = arith.constant 2.500000e-01 : f32
    %691 = vector.broadcast %cst_428 : f32 to vector<8x16xf32>
    %692 = arith.mulf %690, %691 : vector<8x16xf32>
    %693 = vector.extract_strided_slice %682 {offsets = [0, 0], sizes = [8, 16], strides = [1, 1]} : vector<16x16xf32> to vector<8x16xf32>
    %694 = arith.truncf %692 : vector<8x16xf32> to vector<8x16xbf16>
    %695 = arith.truncf %693 : vector<8x16xf32> to vector<8x16xbf16>
    %cst_429 = arith.constant dense<0.000000e+00> : vector<8x8xf32>
    %696 = tpu.matmul %694, %695, %cst_429 {dimension_numbers = #tpu.dot_dimension_numbers<[1], [1], [0], [0], [0, 0, 1, 0], [], []>} : vector<8x16xbf16>, vector<8x16xbf16>, vector<8x8xf32> -> vector<8x8xf32>
    %c0_430 = arith.constant 0 : index
    %c0_431 = arith.constant 0 : index
    %c0_432 = arith.constant 0 : index
    %697 = vector.load %arg1[%c0_430, %c0_431, %c0_432] : memref<2x1x8xf32, #tpu.memory_space<vmem>>, vector<1x1x8xf32>
    %698 = vector.shape_cast %697 : vector<1x1x8xf32> to vector<1x8xf32>
    %699 = vector.broadcast %698 : vector<1x8xf32> to vector<8x8xf32>
    %700 = arith.addf %696, %699 : vector<8x8xf32>
    %cst_433 = arith.constant dense<0xFF800000> : vector<8xf32>
    %701 = vector.multi_reduction <maximumf>, %700, %cst_433 [1] : vector<8x8xf32> to vector<8xf32>
    %cst_434 = arith.constant 0xFF800000 : f32
    %702 = vector.broadcast %cst_434 : f32 to vector<8xf32>
    %703 = arith.maximumf %702, %701 : vector<8xf32>
    %704 = vector.shape_cast %703 : vector<8xf32> to vector<8x1xf32>
    %705 = vector.broadcast %704 : vector<8x1xf32> to vector<8x8xf32>
    %706 = arith.subf %700, %705 : vector<8x8xf32>
    %707 = math.exp %706 : vector<8x8xf32>
    %cst_435 = arith.constant dense<0.000000e+00> : vector<8xf32>
    %708 = vector.multi_reduction <add>, %707, %cst_435 [1] : vector<8x8xf32> to vector<8xf32>
    %709 = vector.shape_cast %708 : vector<8xf32> to vector<8x1xf32>
    %710 = vector.broadcast %709 : vector<8x1xf32> to vector<8x8xf32>
    %711 = arith.divf %707, %710 : vector<8x8xf32>
    %712 = vector.extract_strided_slice %689 {offsets = [0, 0], sizes = [8, 16], strides = [1, 1]} : vector<16x16xf32> to vector<8x16xf32>
    %713 = arith.truncf %711 : vector<8x8xf32> to vector<8x8xbf16>
    %714 = arith.truncf %712 : vector<8x16xf32> to vector<8x16xbf16>
    %cst_436 = arith.constant dense<0.000000e+00> : vector<8x16xf32>
    %715 = tpu.matmul %713, %714, %cst_436 {dimension_numbers = #tpu.dot_dimension_numbers<[1], [0], [0], [1], [0, 0, 1, 1], [], []>} : vector<8x8xbf16>, vector<8x16xbf16>, vector<8x16xf32> -> vector<8x16xf32>
    %716 = vector.extract_strided_slice %675 {offsets = [8, 0], sizes = [8, 16], strides = [1, 1]} : vector<16x16xf32> to vector<8x16xf32>
    %cst_437 = arith.constant 2.500000e-01 : f32
    %717 = vector.broadcast %cst_437 : f32 to vector<8x16xf32>
    %718 = arith.mulf %716, %717 : vector<8x16xf32>
    %719 = vector.extract_strided_slice %682 {offsets = [8, 0], sizes = [8, 16], strides = [1, 1]} : vector<16x16xf32> to vector<8x16xf32>
    %720 = arith.truncf %718 : vector<8x16xf32> to vector<8x16xbf16>
    %721 = arith.truncf %719 : vector<8x16xf32> to vector<8x16xbf16>
    %cst_438 = arith.constant dense<0.000000e+00> : vector<8x8xf32>
    %722 = tpu.matmul %720, %721, %cst_438 {dimension_numbers = #tpu.dot_dimension_numbers<[1], [1], [0], [0], [0, 0, 1, 0], [], []>} : vector<8x16xbf16>, vector<8x16xbf16>, vector<8x8xf32> -> vector<8x8xf32>
    %c1_439 = arith.constant 1 : index
    %c0_440 = arith.constant 0 : index
    %c0_441 = arith.constant 0 : index
    %723 = vector.load %arg1[%c1_439, %c0_440, %c0_441] : memref<2x1x8xf32, #tpu.memory_space<vmem>>, vector<1x1x8xf32>
    %724 = vector.shape_cast %723 : vector<1x1x8xf32> to vector<1x8xf32>
    %725 = vector.broadcast %724 : vector<1x8xf32> to vector<8x8xf32>
    %726 = arith.addf %722, %725 : vector<8x8xf32>
    %cst_442 = arith.constant dense<0xFF800000> : vector<8xf32>
    %727 = vector.multi_reduction <maximumf>, %726, %cst_442 [1] : vector<8x8xf32> to vector<8xf32>
    %cst_443 = arith.constant 0xFF800000 : f32
    %728 = vector.broadcast %cst_443 : f32 to vector<8xf32>
    %729 = arith.maximumf %728, %727 : vector<8xf32>
    %730 = vector.shape_cast %729 : vector<8xf32> to vector<8x1xf32>
    %731 = vector.broadcast %730 : vector<8x1xf32> to vector<8x8xf32>
    %732 = arith.subf %726, %731 : vector<8x8xf32>
    %733 = math.exp %732 : vector<8x8xf32>
    %cst_444 = arith.constant dense<0.000000e+00> : vector<8xf32>
    %734 = vector.multi_reduction <add>, %733, %cst_444 [1] : vector<8x8xf32> to vector<8xf32>
    %735 = vector.shape_cast %734 : vector<8xf32> to vector<8x1xf32>
    %736 = vector.broadcast %735 : vector<8x1xf32> to vector<8x8xf32>
    %737 = arith.divf %733, %736 : vector<8x8xf32>
    %738 = vector.extract_strided_slice %689 {offsets = [8, 0], sizes = [8, 16], strides = [1, 1]} : vector<16x16xf32> to vector<8x16xf32>
    %739 = arith.truncf %737 : vector<8x8xf32> to vector<8x8xbf16>
    %740 = arith.truncf %738 : vector<8x16xf32> to vector<8x16xbf16>
    %cst_445 = arith.constant dense<0.000000e+00> : vector<8x16xf32>
    %741 = tpu.matmul %739, %740, %cst_445 {dimension_numbers = #tpu.dot_dimension_numbers<[1], [0], [0], [1], [0, 0, 1, 1], [], []>} : vector<8x8xbf16>, vector<8x16xbf16>, vector<8x16xf32> -> vector<8x16xf32>
    %742 = tpu.concatenate %715, %741 in 0 : vector<8x16xf32>, vector<8x16xf32> -> vector<16x16xf32>
    %743 = arith.truncf %742 : vector<16x16xf32> to vector<16x16xbf16>
    %c1_446 = arith.constant 1 : index
    %c3_447 = arith.constant 3 : index
    %c0_448 = arith.constant 0 : index
    %c0_449 = arith.constant 0 : index
    %744 = vector.load %arg10[%c1_446, %c3_447, %c0_448, %c0_449] : memref<2x4x16x64xbf16, #tpu.memory_space<vmem>>, vector<1x1x16x64xbf16>
    %745 = vector.shape_cast %744 : vector<1x1x16x64xbf16> to vector<16x64xbf16>
    %cst_450 = arith.constant dense<0.000000e+00> : vector<16x64xf32>
    %746 = tpu.matmul %743, %745, %cst_450 {dimension_numbers = #tpu.dot_dimension_numbers<[1], [0], [0], [1], [0, 0, 1, 1], [], []>} : vector<16x16xbf16>, vector<16x64xbf16>, vector<16x64xf32> -> vector<16x64xf32>
    %747 = arith.addf %668, %746 : vector<16x64xf32>
    %c1_451 = arith.constant 1 : index
    %c0_452 = arith.constant 0 : index
    %c0_453 = arith.constant 0 : index
    %748 = vector.load %arg11[%c1_451, %c0_452, %c0_453] : memref<2x1x64xf32, #tpu.memory_space<vmem>>, vector<1x1x64xf32>
    %749 = vector.shape_cast %748 : vector<1x1x64xf32> to vector<1x64xf32>
    %750 = vector.broadcast %749 : vector<1x64xf32> to vector<16x64xf32>
    %751 = arith.addf %747, %750 : vector<16x64xf32>
    %752 = arith.addf %429, %751 : vector<16x64xf32>
    %c1_454 = arith.constant 1 : index
    %c0_455 = arith.constant 0 : index
    %c0_456 = arith.constant 0 : index
    %753 = vector.load %arg12[%c1_454, %c0_455, %c0_456] : memref<2x1x64xf32, #tpu.memory_space<vmem>>, vector<1x1x64xf32>
    %754 = vector.shape_cast %753 : vector<1x1x64xf32> to vector<1x64xf32>
    %c1_457 = arith.constant 1 : index
    %c0_458 = arith.constant 0 : index
    %c0_459 = arith.constant 0 : index
    %755 = vector.load %arg13[%c1_457, %c0_458, %c0_459] : memref<2x1x64xf32, #tpu.memory_space<vmem>>, vector<1x1x64xf32>
    %756 = vector.shape_cast %755 : vector<1x1x64xf32> to vector<1x64xf32>
    %cst_460 = arith.constant dense<0.000000e+00> : vector<16xf32>
    %757 = vector.multi_reduction <add>, %752, %cst_460 [1] : vector<16x64xf32> to vector<16xf32>
    %758 = vector.shape_cast %757 : vector<16xf32> to vector<16x1xf32>
    %cst_461 = arith.constant 6.400000e+01 : f32
    %759 = vector.broadcast %cst_461 : f32 to vector<16x1xf32>
    %760 = arith.divf %758, %759 : vector<16x1xf32>
    %761 = vector.broadcast %760 : vector<16x1xf32> to vector<16x64xf32>
    %762 = arith.subf %752, %761 : vector<16x64xf32>
    %763 = arith.mulf %762, %762 : vector<16x64xf32>
    %cst_462 = arith.constant dense<0.000000e+00> : vector<16xf32>
    %764 = vector.multi_reduction <add>, %763, %cst_462 [1] : vector<16x64xf32> to vector<16xf32>
    %765 = vector.shape_cast %764 : vector<16xf32> to vector<16x1xf32>
    %cst_463 = arith.constant 6.400000e+01 : f32
    %766 = vector.broadcast %cst_463 : f32 to vector<16x1xf32>
    %767 = arith.divf %765, %766 : vector<16x1xf32>
    %768 = vector.broadcast %760 : vector<16x1xf32> to vector<16x64xf32>
    %769 = arith.subf %752, %768 : vector<16x64xf32>
    %cst_464 = arith.constant 9.99999996E-13 : f32
    %770 = vector.broadcast %cst_464 : f32 to vector<16x1xf32>
    %771 = arith.addf %767, %770 : vector<16x1xf32>
    %772 = math.rsqrt %771 : vector<16x1xf32>
    %773 = vector.broadcast %772 : vector<16x1xf32> to vector<16x64xf32>
    %774 = arith.mulf %769, %773 : vector<16x64xf32>
    %775 = vector.broadcast %754 : vector<1x64xf32> to vector<16x64xf32>
    %776 = arith.mulf %774, %775 : vector<16x64xf32>
    %777 = vector.broadcast %756 : vector<1x64xf32> to vector<16x64xf32>
    %778 = arith.addf %776, %777 : vector<16x64xf32>
    %779 = arith.truncf %778 : vector<16x64xf32> to vector<16x64xbf16>
    %c1_465 = arith.constant 1 : index
    %c0_466 = arith.constant 0 : index
    %c0_467 = arith.constant 0 : index
    %780 = vector.load %arg14[%c1_465, %c0_466, %c0_467] : memref<2x64x128xbf16, #tpu.memory_space<vmem>>, vector<1x64x128xbf16>
    %781 = vector.shape_cast %780 : vector<1x64x128xbf16> to vector<64x128xbf16>
    %cst_468 = arith.constant dense<0.000000e+00> : vector<16x128xf32>
    %782 = tpu.matmul %779, %781, %cst_468 {dimension_numbers = #tpu.dot_dimension_numbers<[1], [0], [0], [1], [0, 0, 1, 1], [], []>} : vector<16x64xbf16>, vector<64x128xbf16>, vector<16x128xf32> -> vector<16x128xf32>
    %c1_469 = arith.constant 1 : index
    %c0_470 = arith.constant 0 : index
    %c0_471 = arith.constant 0 : index
    %783 = vector.load %arg15[%c1_469, %c0_470, %c0_471] : memref<2x1x128xf32, #tpu.memory_space<vmem>>, vector<1x1x128xf32>
    %784 = vector.shape_cast %783 : vector<1x1x128xf32> to vector<1x128xf32>
    %785 = vector.broadcast %784 : vector<1x128xf32> to vector<16x128xf32>
    %786 = arith.addf %782, %785 : vector<16x128xf32>
    %787 = arith.mulf %786, %786 : vector<16x128xf32>
    %788 = arith.mulf %786, %787 : vector<16x128xf32>
    %cst_472 = arith.constant 4.471500e-02 : f32
    %789 = vector.broadcast %cst_472 : f32 to vector<16x128xf32>
    %790 = arith.mulf %789, %788 : vector<16x128xf32>
    %791 = arith.addf %786, %790 : vector<16x128xf32>
    %cst_473 = arith.constant 0.797884583 : f32
    %792 = vector.broadcast %cst_473 : f32 to vector<16x128xf32>
    %793 = arith.mulf %792, %791 : vector<16x128xf32>
    %794 = math.tanh %793 : vector<16x128xf32>
    %cst_474 = arith.constant 1.000000e+00 : f32
    %795 = vector.broadcast %cst_474 : f32 to vector<16x128xf32>
    %796 = arith.addf %795, %794 : vector<16x128xf32>
    %cst_475 = arith.constant 5.000000e-01 : f32
    %797 = vector.broadcast %cst_475 : f32 to vector<16x128xf32>
    %798 = arith.mulf %797, %796 : vector<16x128xf32>
    %799 = arith.mulf %786, %798 : vector<16x128xf32>
    %800 = arith.truncf %799 : vector<16x128xf32> to vector<16x128xbf16>
    %c1_476 = arith.constant 1 : index
    %c0_477 = arith.constant 0 : index
    %c0_478 = arith.constant 0 : index
    %801 = vector.load %arg16[%c1_476, %c0_477, %c0_478] : memref<2x128x64xbf16, #tpu.memory_space<vmem>>, vector<1x128x64xbf16>
    %802 = vector.shape_cast %801 : vector<1x128x64xbf16> to vector<128x64xbf16>
    %cst_479 = arith.constant dense<0.000000e+00> : vector<16x64xf32>
    %803 = tpu.matmul %800, %802, %cst_479 {dimension_numbers = #tpu.dot_dimension_numbers<[1], [0], [0], [1], [0, 0, 1, 1], [], []>} : vector<16x128xbf16>, vector<128x64xbf16>, vector<16x64xf32> -> vector<16x64xf32>
    %c1_480 = arith.constant 1 : index
    %c0_481 = arith.constant 0 : index
    %c0_482 = arith.constant 0 : index
    %804 = vector.load %arg17[%c1_480, %c0_481, %c0_482] : memref<2x1x64xf32, #tpu.memory_space<vmem>>, vector<1x1x64xf32>
    %805 = vector.shape_cast %804 : vector<1x1x64xf32> to vector<1x64xf32>
    %806 = vector.broadcast %805 : vector<1x64xf32> to vector<16x64xf32>
    %807 = arith.addf %803, %806 : vector<16x64xf32>
    %808 = arith.addf %778, %807 : vector<16x64xf32>
    %c1_483 = arith.constant 1 : index
    %c0_484 = arith.constant 0 : index
    %c0_485 = arith.constant 0 : index
    %809 = vector.load %arg18[%c1_483, %c0_484, %c0_485] : memref<2x1x64xf32, #tpu.memory_space<vmem>>, vector<1x1x64xf32>
    %810 = vector.shape_cast %809 : vector<1x1x64xf32> to vector<1x64xf32>
    %c1_486 = arith.constant 1 : index
    %c0_487 = arith.constant 0 : index
    %c0_488 = arith.constant 0 : index
    %811 = vector.load %arg19[%c1_486, %c0_487, %c0_488] : memref<2x1x64xf32, #tpu.memory_space<vmem>>, vector<1x1x64xf32>
    %812 = vector.shape_cast %811 : vector<1x1x64xf32> to vector<1x64xf32>
    %cst_489 = arith.constant dense<0.000000e+00> : vector<16xf32>
    %813 = vector.multi_reduction <add>, %808, %cst_489 [1] : vector<16x64xf32> to vector<16xf32>
    %814 = vector.shape_cast %813 : vector<16xf32> to vector<16x1xf32>
    %cst_490 = arith.constant 6.400000e+01 : f32
    %815 = vector.broadcast %cst_490 : f32 to vector<16x1xf32>
    %816 = arith.divf %814, %815 : vector<16x1xf32>
    %817 = vector.broadcast %816 : vector<16x1xf32> to vector<16x64xf32>
    %818 = arith.subf %808, %817 : vector<16x64xf32>
    %819 = arith.mulf %818, %818 : vector<16x64xf32>
    %cst_491 = arith.constant dense<0.000000e+00> : vector<16xf32>
    %820 = vector.multi_reduction <add>, %819, %cst_491 [1] : vector<16x64xf32> to vector<16xf32>
    %821 = vector.shape_cast %820 : vector<16xf32> to vector<16x1xf32>
    %cst_492 = arith.constant 6.400000e+01 : f32
    %822 = vector.broadcast %cst_492 : f32 to vector<16x1xf32>
    %823 = arith.divf %821, %822 : vector<16x1xf32>
    %824 = vector.broadcast %816 : vector<16x1xf32> to vector<16x64xf32>
    %825 = arith.subf %808, %824 : vector<16x64xf32>
    %cst_493 = arith.constant 9.99999996E-13 : f32
    %826 = vector.broadcast %cst_493 : f32 to vector<16x1xf32>
    %827 = arith.addf %823, %826 : vector<16x1xf32>
    %828 = math.rsqrt %827 : vector<16x1xf32>
    %829 = vector.broadcast %828 : vector<16x1xf32> to vector<16x64xf32>
    %830 = arith.mulf %825, %829 : vector<16x64xf32>
    %831 = vector.broadcast %810 : vector<1x64xf32> to vector<16x64xf32>
    %832 = arith.mulf %830, %831 : vector<16x64xf32>
    %833 = vector.broadcast %812 : vector<1x64xf32> to vector<16x64xf32>
    %834 = arith.addf %832, %833 : vector<16x64xf32>
    %835 = arith.truncf %834 : vector<16x64xf32> to vector<16x64xbf16>
    %c0_494 = arith.constant 0 : index
    %c0_495 = arith.constant 0 : index
    %836 = vector.load %arg20[%c0_494, %c0_495] : memref<64x64xbf16, #tpu.memory_space<vmem>>, vector<64x64xbf16>
    %cst_496 = arith.constant dense<0.000000e+00> : vector<16x64xf32>
    %837 = tpu.matmul %835, %836, %cst_496 {dimension_numbers = #tpu.dot_dimension_numbers<[1], [0], [0], [1], [0, 0, 1, 1], [], []>} : vector<16x64xbf16>, vector<64x64xbf16>, vector<16x64xf32> -> vector<16x64xf32>
    %c0_497 = arith.constant 0 : index
    %c0_498 = arith.constant 0 : index
    %838 = vector.load %arg21[%c0_497, %c0_498] : memref<1x64xf32, #tpu.memory_space<vmem>>, vector<1x64xf32>
    %839 = vector.broadcast %838 : vector<1x64xf32> to vector<16x64xf32>
    %840 = arith.addf %837, %839 : vector<16x64xf32>
    %cst_499 = arith.constant 0.000000e+00 : f32
    %841 = vector.broadcast %cst_499 : f32 to vector<16x64xf32>
    %842 = arith.maximumf %840, %841 : vector<16x64xf32>
    %843 = arith.truncf %842 : vector<16x64xf32> to vector<16x64xbf16>
    %c0_500 = arith.constant 0 : index
    %c0_501 = arith.constant 0 : index
    %844 = vector.load %arg22[%c0_500, %c0_501] : memref<64x128xbf16, #tpu.memory_space<vmem>>, vector<64x128xbf16>
    %cst_502 = arith.constant dense<0.000000e+00> : vector<16x128xf32>
    %845 = tpu.matmul %843, %844, %cst_502 {dimension_numbers = #tpu.dot_dimension_numbers<[1], [0], [0], [1], [0, 0, 1, 1], [], []>} : vector<16x64xbf16>, vector<64x128xbf16>, vector<16x128xf32> -> vector<16x128xf32>
    %c0_503 = arith.constant 0 : index
    %c0_504 = arith.constant 0 : index
    %846 = vector.load %arg23[%c0_503, %c0_504] : memref<1x128xf32, #tpu.memory_space<vmem>>, vector<1x128xf32>
    %847 = vector.broadcast %846 : vector<1x128xf32> to vector<16x128xf32>
    %848 = arith.addf %845, %847 : vector<16x128xf32>
    %c0_505 = arith.constant 0 : index
    %c0_506 = arith.constant 0 : index
    %849 = vector.load %arg24[%c0_505, %c0_506] : memref<16x128xf32, #tpu.memory_space<vmem>>, vector<16x128xf32>
    tpu.vector_store %arg24[%c0_505, %c0_506], %848 {strides = array<i32>} : memref<16x128xf32, #tpu.memory_space<vmem>>, vector<16x128xf32>,
    return
  }
}

</mosaic_0001>

<bundles_post_ra>
// kernel: tpu_custom_call.1
= control target key start
LH: loop header
LB: loop body
LE: loop exit
PB: predicated region body
PF: predicated region fallthrough
CT: control target
= control target key end

     0   :  { %s8033_s0 = inlined_call_operand.vmem [shape: f32[16,64], index: 0, kind: input, shape index: {}]   ;;  %s8034_s1 = inlined_call_operand.vmem [shape: f32[2,1,8], index: 1, kind: input, shape index: {}]   ;;  %s8035_s2 = inlined_call_operand.vmem [shape: f32[1,64], index: 2, kind: input, shape index: {}]   ;;  %s8036_s3 = inlined_call_operand.vmem [shape: f32[1,64], index: 3, kind: input, shape index: {}]   ;;  %s8037_s4 = inlined_call_operand.vmem [shape: bf16[2,4,64,16], index: 4, kind: input, shape index: {}]   ;;  %s8038_s5 = inlined_call_operand.vmem [shape: f32[2,4,1,16], index: 5, kind: input, shape index: {}]   ;;  %s8039_s6 = inlined_call_operand.vmem [shape: bf16[2,4,64,16], index: 6, kind: input, shape index: {}]   ;;  %s8040_s7 = inlined_call_operand.vmem [shape: f32[2,4,1,16], index: 7, kind: input, shape index: {}]   ;;  %s8041_s8 = inlined_call_operand.vmem [shape: bf16[2,4,64,16], index: 8, kind: input, shape index: {}]   ;;  %s8042_s9 = inlined_call_operand.vmem [shape: f32[2,4,1,16], index: 9, kind: input, shape index: {}]   ;;  %s8043_s10 = inlined_call_operand.vmem [shape: bf16[2,4,16,64], index: 10, kind: input, shape index: {}]   ;;  %s8044_s11 = inlined_call_operand.vmem [shape: f32[2,1,64], index: 11, kind: input, shape index: {}]   ;;  %s8045_s12 = inlined_call_operand.vmem [shape: f32[2,1,64], index: 12, kind: input, shape index: {}]   ;;  %s8046_s13 = inlined_call_operand.vmem [shape: f32[2,1,64], index: 13, kind: input, shape index: {}]   ;;  %s8047_s14 = inlined_call_operand.vmem [shape: bf16[2,64,128], index: 14, kind: input, shape index: {}]   ;;  %s8048_s15 = inlined_call_operand.vmem [shape: f32[2,1,128], index: 15, kind: input, shape index: {}]   ;;  %s8049_s16 = inlined_call_operand.vmem [shape: bf16[2,128,64], index: 16, kind: input, shape index: {}]   ;;  %s8050_s17 = inlined_call_operand.vmem [shape: f32[2,1,64], index: 17, kind: input, shape index: {}]   ;;  %s8051_s18 = inlined_call_operand.vmem [shape: f32[2,1,64], index: 18, kind: input, shape index: {}]   ;;  %s8052_s19 = inlined_call_operand.vmem [shape: f32[2,1,64], index: 19, kind: input, shape index: {}]   ;;  %s8053_s20 = inlined_call_operand.vmem [shape: bf16[64,64], index: 20, kind: input, shape index: {}]   ;;  %s8054_s21 = inlined_call_operand.vmem [shape: f32[1,64], index: 21, kind: input, shape index: {}]   ;;  %s8055_s22 = inlined_call_operand.vmem [shape: bf16[64,128], index: 22, kind: input, shape index: {}]   ;;  %s8056_s23 = inlined_call_operand.vmem [shape: f32[1,128], index: 23, kind: input, shape index: {}]   ;;  %s8057_s24 = inlined_call_operand.hbm [shape: f32[16,128], index: 24, kind: output, shape index: {}]  }
   0x1   :  { %8065 = sst [smem:[#allocation5_spill]] %s8033_s0 }
   0x2   :  { %8066 = sst [smem:[#allocation6_spill]] %s8034_s1 }
   0x3   :  { %8067 = sst [smem:[#allocation7_spill]] %s8035_s2 }
   0x4   :  { %8068 = sst [smem:[#allocation8_spill]] %s8036_s3 }
   0x5   :  { %8069 = sst [smem:[#allocation9_spill]] %s8037_s4 }
   0x6   :  { %8070 = sst [smem:[#allocation10_spill]] %s8038_s5 }
   0x7   :  { %8071 = sst [smem:[#allocation11_spill]] %s8039_s6 }
   0x8   :  { %8072 = sst [smem:[#allocation12_spill]] %s8040_s7 }
   0x9   :  { %8073 = sst [smem:[#allocation13_spill]] %s8041_s8 }
   0xa   :  { %s8074_s27 = sld [smem:[#allocation5_spill]]  ;;  %vm83_vm0 = vcmask 523264  }
  0x10   :  { %v79_v0 = vld [vmem:[%s8074_s27] sm:$0xff]  ;;  %v80_v1 = vld [vmem:[%s8074_s27 + $0x8] sm:$0xff] }
  0x11   :  { %v84_v2 = vsel %vm83_vm0, %v79_v0, 0.0  ;;  %v87_v3 = vsel %vm83_vm0, %v80_v1, 0.0 }
  0x12   :  { %85 = vadd.xlane.f32.xlu0 %v84_v2 }
  0x16   :  { %88 = vadd.xlane.f32.xlu0 %v87_v3 }
  0x17   :  { %29 = vsyncpa [#allocation3], 0  ;;  %s8075_s0 = sld [smem:[#allocation9_spill]]  ;;  %v6707_v15 = vmov 0.0   ;;  %s8076_s3 = sld [smem:[#allocation11_spill]]  ;;  %vm6708_vm1 = vmmov 0  }
  0x18   :  { %5832 = vmatprep.subr.bf16.mxu0 %v6707_v15  ;;  %5844 = vmatprep.subr.bf16.mxu1 %v6707_v15  ;;  %s8077_s8 = sld [smem:[#allocation7_spill]]  ;;  %s8078_s5 = sld [smem:[#allocation8_spill]]  ;;  %vm381_vm2 = vcmask 130048   ;;  %vm445_vm3 = vcmask 1043456   ;;  %vm428_vm4 = vcmask 64512  }
  0x19   :  { %5840 = vmatprep.mubr.msk.bf16.mxu0 %vm6708_vm1, %v6707_v15  ;;  %5852 = vmatprep.mubr.msk.bf16.mxu1 %vm6708_vm1, %v6707_v15  ;;  %s8079_s28 = sld [smem:[#allocation13_spill]]  ;;  %s8080_s6 = sld [smem:[#allocation12_spill]] }
  0x1a   :  { %s8081_s7 = sld [smem:[#allocation10_spill]]  ;;  %s8082_s26 = sld [smem:[#allocation6_spill]] }
  0x1d   :  { %v6453_v14 = vld [vmem:[%s8075_s0] sm:$0xff]   ;;  %v6455_v17 = vld [vmem:[%s8075_s0 + $0x8] sm:$0xff]   ;;  %v6457_v19 = vld [vmem:[%s8075_s0 + $0x10] sm:$0xff]  }
  0x1e   :  { %v6454_v16 = vld [vmem:[%s8076_s3] sm:$0xff]   ;;  %5833 = vmatpush3.bf16.msra.mxu0 %v6453_v14  ;;  %v6456_v18 = vld [vmem:[%s8076_s3 + $0x8] sm:$0xff]   ;;  %v6458_v20 = vld [vmem:[%s8076_s3 + $0x10] sm:$0xff]  }
  0x1f   :  { %5845 = vmatpush3.bf16.msra.mxu1 %v6454_v16  ;;  %5834 = vmatprep.subr.bf16.mxu0 %v6707_v15  ;;  %v6459_v21 = vld [vmem:[%s8075_s0 + $0x18] sm:$0xff]   ;;  %v5111_v31 = vld [vmem:[%s8077_s8] ss:$0 sm:$0xff]  ;;  %v6462_v41 = vld [vmem:[%s8079_s28 + $0x8] sm:$0xff]  }
  0x20   :  { %5846 = vmatprep.subr.bf16.mxu1 %v6707_v15  ;;  %v6460_v22 = vld [vmem:[%s8076_s3 + $0x18] sm:$0xff]   ;;  %v5112_v35 = vld [vmem:[%s8078_s5] ss:$0 sm:$0xff]  ;;  %v6463_v42 = vld [vmem:[%s8079_s28 + $0x10] sm:$0xff]  }
  0x21   :  { %v6461_v39 = vld [vmem:[%s8079_s28] sm:$0xff]   ;;  %v6464_v43 = vld [vmem:[%s8079_s28 + $0x18] sm:$0xff]   ;;  %v6466_v45 = vld [vmem:[%s8075_s0 + $0x28] sm:$0xff]  }
  0x22   :  { %5835 = vmatpush3.bf16.msra.mxu0 %v6455_v17  ;;  %v6465_v44 = vld [vmem:[%s8075_s0 + $0x20] sm:$0xff]   ;;  %v6467_v46 = vld [vmem:[%s8075_s0 + $0x30] sm:$0xff]   ;;  %v6468_v47 = vld [vmem:[%s8075_s0 + $0x38] sm:$0xff]  }
  0x23   :  { %5847 = vmatpush3.bf16.msra.mxu1 %v6456_v18  ;;  %5836 = vmatprep.subr.bf16.mxu0 %v6707_v15  ;;  %v6469_v48 = vld [vmem:[%s8079_s28 + $0x20] sm:$0xff]   ;;  %v6470_v49 = vld [vmem:[%s8079_s28 + $0x28] sm:$0xff]   ;;  %v6471_v50 = vld [vmem:[%s8079_s28 + $0x30] sm:$0xff]  }
  0x24   :  { %5848 = vmatprep.subr.bf16.mxu1 %v6707_v15  ;;  %v6472_v51 = vld [vmem:[%s8079_s28 + $0x38] sm:$0xff]   ;;  %v5119_v52 = vld [vmem:[%s8080_s6] ss:$0 sm:$0xff] }
  0x25   :  { %v5113_v53 = vld [vmem:[%s8081_s7] ss:$0 sm:$0xff] }
  0x26   :  { %5837 = vmatpush3.bf16.msra.mxu0 %v6457_v19 }
  0x27   :  { %5849 = vmatpush3.bf16.msra.mxu1 %v6458_v20  ;;  %5838 = vmatprep.subr.bf16.mxu0 %v6707_v15 }
  0x28   :  { %5850 = vmatprep.subr.bf16.mxu1 %v6707_v15 }
  0x2a   :  { %5839 = vmatpush3.bf16.msra.mxu0 %v6459_v21 }
  0x2b   :  { %5851 = vmatpush3.bf16.msra.mxu1 %v6460_v22  ;;  %5856 = vmatprep.subr.bf16.mxu0 %v6707_v15  ;;  %v6992_v22 = vld [vmem:[%s8042_s9 + $0x1] ss:$0 sm:$0xff] }
  0x2c   :  { %5868 = vmatprep.subr.bf16.mxu1 %v6707_v15 }
  0x9f   :  { %v86_v4 = vpop.xlane.xlu0 %85 }
  0xa0   :  { %v91_v5 = vmul.f32 0.015625, %v86_v4 }
  0xa2   :  { %v93_v6 = vsub.f32 %v79_v0, %v91_v5 }
  0xa3   :  { %v89_v7 = vpop.xlane.xlu0 %88 }
  0xa4   :  { %v92_v8 = vmul.f32 0.015625, %v89_v7  ;;  %v95_v9 = vmul.f32 %v93_v6, %v93_v6 }
  0xa6   :  { %v94_v10 = vsub.f32 %v80_v1, %v92_v8  ;;  %v97_v11 = vsel %vm83_vm0, %v95_v9, 0.0 }
  0xa7   :  { %98 = vadd.xlane.f32.xlu1 %v97_v11 }
  0xa8   :  { %v96_v12 = vmul.f32 %v94_v10, %v94_v10 }
  0xaa   :  { %v100_v13 = vsel %vm83_vm0, %v96_v12, 0.0 }
  0xab   :  { %101 = vadd.xlane.f32.xlu1 %v100_v13 }
 0x134   :  { %v99_v23 = vpop.xlane.xlu1 %98 }
 0x135   :  { %v103_v24 = vmul.f32 0.015625, %v99_v23 }
 0x137   :  { %v105_v25 = vadd.f32 1e-12, %v103_v24 }
 0x138   :  { %v102_v26 = vpop.xlane.xlu1 %101 }
 0x139   :  { %6589 = vrsqrt.f32 %v105_v25  ;;  %v104_v27 = vmul.f32 0.015625, %v102_v26  ;;  %v7000_v26 = vld [vmem:[%s8082_s26] ss:$0 sm:$0xff] }
 0x13b   :  { %v106_v28 = vadd.f32 1e-12, %v104_v27 }
 0x13d   :  { %6591 = vrsqrt.f32 %v106_v28 }
 0x143   :  { %v6590_v29 = vpop.eup %6589 }
 0x144   :  { %v109_v30 = vmul.f32 %v6590_v29, %v93_v6  ;;  %v5125_v6 = vld [vmem:[%s8042_s9] ss:$0 sm:$0xff] }
 0x146   :  { %v117_v33 = vmul.f32 %v5111_v31, %v109_v30 }
 0x147   :  { %v6592_v32 = vpop.eup %6591 }
 0x148   :  { %v110_v34 = vmul.f32 %v6592_v32, %v94_v10  ;;  %v6891_v37 = vadd.f32 %v5112_v35, %v117_v33 }
 0x14a   :  { %v118_v36 = vmul.f32 %v5111_v31, %v110_v34 }
 0x14c   :  { %v6893_v38 = vadd.f32 %v5112_v35, %v118_v36 }
 0x14e   :  { %v6900_v40 = vpack.c.bf16 %v6893_v38, %v6891_v37 }
 0x150   :  { %5841 = vmatmul.mubr.msk.bf16.vlgmr.msra.gmra.mrb[0].mxu0 %vm83_vm0, %v6900_v40  ;;  %5853 = vmatmul.mubr.msk.bf16.vlgmr.msra.gmra.mrb[0].mxu1 %vm83_vm0, %v6900_v40 }
 0x151   :  { %5857 = vmatpush3.bf16.msra.mxu0 %v6461_v39  ;;  %5864 = vmatprep.mubr.msk.bf16.mxu0 %vm6708_vm1, %v6707_v15 }
 0x152   :  { %5858 = vmatprep.subr.bf16.mxu0 %v6707_v15  ;;  %5870 = vmatprep.mubr.msk.bf16.mxu1 %vm6708_vm1, %v6707_v15 }
 0x155   :  { %5859 = vmatpush3.bf16.msra.mxu0 %v6462_v41 }
 0x156   :  { %5860 = vmatprep.subr.bf16.mxu0 %v6707_v15 }
 0x159   :  { %5861 = vmatpush3.bf16.msra.mxu0 %v6463_v42 }
 0x15a   :  { %5862 = vmatprep.subr.bf16.mxu0 %v6707_v15 }
 0x15d   :  { %5863 = vmatpush3.bf16.msra.mxu0 %v6464_v43 }
 0x15e   :  { %5892 = vmatprep.subr.bf16.mxu0 %v6707_v15 }
 0x160   :  { %5865 = vmatmul.mubr.msk.bf16.vlgmr.msra.gmra.mrb[4].mxu0 %vm83_vm0, %v6900_v40 }
 0x161   :  { %5893 = vmatpush3.bf16.msra.mxu0 %v6465_v44  ;;  %5900 = vmatprep.mubr.msk.bf16.mxu0 %vm6708_vm1, %v6707_v15 }
 0x162   :  { %5894 = vmatprep.subr.bf16.mxu0 %v6707_v15 }
 0x165   :  { %5895 = vmatpush3.bf16.msra.mxu0 %v6466_v45 }
 0x166   :  { %5896 = vmatprep.subr.bf16.mxu0 %v6707_v15 }
 0x169   :  { %5897 = vmatpush3.bf16.msra.mxu0 %v6467_v46 }
 0x16a   :  { %5898 = vmatprep.subr.bf16.mxu0 %v6707_v15 }
 0x16d   :  { %5899 = vmatpush3.bf16.msra.mxu0 %v6468_v47 }
 0x16e   :  { %5916 = vmatprep.subr.bf16.mxu0 %v6707_v15 }
 0x170   :  { %5901 = vmatmul.mubr.msk.bf16.vlgmr.msra.gmra.mrb[8].mxu0 %vm83_vm0, %v6900_v40 }
 0x171   :  { %5917 = vmatpush3.bf16.msra.mxu0 %v6469_v48  ;;  %5924 = vmatprep.mubr.msk.bf16.mxu0 %vm6708_vm1, %v6707_v15 }
 0x172   :  { %5918 = vmatprep.subr.bf16.mxu0 %v6707_v15 }
 0x175   :  { %5919 = vmatpush3.bf16.msra.mxu0 %v6470_v49 }
 0x176   :  { %5920 = vmatprep.subr.bf16.mxu0 %v6707_v15 }
 0x179   :  { %5921 = vmatpush3.bf16.msra.mxu0 %v6471_v50 }
 0x17a   :  { %5922 = vmatprep.subr.bf16.mxu0 %v6707_v15 }
 0x17d   :  { %5923 = vmatpush3.bf16.msra.mxu0 %v6472_v51 }
 0x17e   :  { %5940 = vmatprep.subr.bf16.mxu0 %v6707_v15 }
 0x180   :  { %5925 = vmatmul.mubr.msk.bf16.vlgmr.msra.gmra.mrb[12].mxu0 %vm83_vm0, %v6900_v40 }
 0x181   :  { %5942 = vmatprep.mubr.msk.bf16.mxu0 %vm6708_vm1, %v6707_v15 }
 0x223   :  { %v204_v54 = vpop.f32.mrb[0].mxu0  ;;  %v284_v55 = vpop.f32.mrb[0].mxu1 }
 0x224   :  { %v285_v56 = vadd.f32 %v5119_v52, %v284_v55  ;;  %v5842_v57 = vpop.f32.mrb[1].mxu0  ;;  %v5854_v58 = vpop.f32.mrb[1].mxu1  ;;  %v205_v61 = vadd.f32 %v5113_v53, %v204_v54  ;;  %v7020_v55 = vld [vmem:[%s8082_s26 + $0x1] ss:$0 sm:$0xff] }
 0x225   :  { %v207_v59 = vpop.f32.mrb[2].mxu0  ;;  %v287_v60 = vpop.f32.mrb[2].mxu1 }
 0x226   :  { %v373_v62 = vpack.c.bf16 %v285_v56, %v285_v56  ;;  %v208_v63 = vadd.f32 %v5113_v53, %v207_v59  ;;  %v288_v0 = vadd.f32 %v5119_v52, %v287_v60  ;;  %v5843_v1 = vpop.f32.mrb[3].mxu0  ;;  %v5855_v2 = vpop.f32.mrb[3].mxu1  ;;  %v371_v4 = vmul.f32 0.25, %v205_v61 }
 0x228   :  { %v386_v3 = vsel %vm381_vm2, %v373_v62, 0  ;;  %v372_v5 = vpack.c.bf16 %v371_v4, %v371_v4  ;;  %v491_v43 = vpack.c.bf16 %v288_v0, %v288_v0  ;;  %v489_v47 = vmul.f32 0.25, %v208_v63 }
 0x229   :  { %5869 = vmatpush3.bf16.xpose.msra.mxu1 %v386_v3 }
 0x22a   :  { %5874 = vmatprep.subr.bf16.mxu1 %v6707_v15  ;;  %v504_v46 = vsel %vm381_vm2, %v491_v43, 0  ;;  %v490_v49 = vpack.c.bf16 %v489_v47, %v489_v47 }
 0x230   :  { %5871 = vmatmul.mubr.msk.bf16.vlgmr.msra.gmra.mrb[4].mxu1 %vm381_vm2, %v372_v5 }
 0x231   :  { %5876 = vmatprep.mubr.msk.bf16.mxu1 %vm6708_vm1, %v6707_v15 }
 0x233   :  { %v364_v7 = vpop.f32.mrb[4].mxu0 }
 0x234   :  { %v365_v8 = vadd.f32 %v5125_v6, %v364_v7  ;;  %v5866_v9 = vpop.f32.mrb[5].mxu0 }
 0x235   :  { %v367_v10 = vpop.f32.mrb[6].mxu0  ;;  %v6475_v9 = vld [vmem:[%s8076_s3 + $0x30] sm:$0xff]  }
 0x236   :  { %v441_v11 = vpack.c.bf16 %v365_v8, %v365_v8  ;;  %v368_v12 = vadd.f32 %v5125_v6, %v367_v10  ;;  %v5867_v13 = vpop.f32.mrb[7].mxu0  ;;  %v6473_v6 = vld [vmem:[%s8076_s3 + $0x20] sm:$0xff]   ;;  %v6474_v8 = vld [vmem:[%s8076_s3 + $0x28] sm:$0xff]   ;;  %v6476_v10 = vld [vmem:[%s8076_s3 + $0x38] sm:$0xff]  }
 0x238   :  { %v447_v14 = vsel %vm445_vm3, %v441_v11, 0  ;;  %v558_v48 = vpack.c.bf16 %v368_v12, %v368_v12 }
 0x239   :  { %5875 = vmatpush3.bf16.msra.mxu1 %v447_v14 }
 0x23a   :  { %5880 = vmatprep.subr.bf16.mxu1 %v6707_v15  ;;  %v563_v50 = vsel %vm445_vm3, %v558_v48, 0 }
 0x243   :  { %v6983_v16 = vpop.f32.mrb[8].mxu0 }
 0x244   :  { %v5902_v17 = vpop.f32.mrb[9].mxu0 }
 0x245   :  { %v6985_v18 = vpop.f32.mrb[10].mxu0 }
 0x246   :  { %v5903_v19 = vpop.f32.mrb[11].mxu0 }
 0x247   :  { %v5162_v19 = vld [vmem:[%s8080_s6 + $0x1] ss:$0 sm:$0xff] }
 0x253   :  { %v6987_v20 = vpop.f32.mrb[12].mxu0 }
 0x254   :  { %v5926_v21 = vpop.f32.mrb[13].mxu0 }
 0x255   :  { %v850_v23 = vpop.f32.mrb[14].mxu0  ;;  %v5147_v21 = vld [vmem:[%s8081_s7 + $0x1] ss:$0 sm:$0xff] }
 0x256   :  { %v6995_v24 = vadd.f32 %v6992_v22, %v850_v23  ;;  %v5927_v25 = vpop.f32.mrb[15].mxu0 }
 0x303   :  { %v422_v27 = vpop.f32.mrb[4].mxu1 }
 0x304   :  { %v423_v28 = vadd.f32 %v7000_v26, %v422_v27  ;;  %v5872_v29 = vpop.f32.mrb[5].mxu1 }
 0x305   :  { %v425_v30 = vpop.f32.mrb[6].mxu1  ;;  %v684_v29 = vadd.f32 %v5147_v21, %v6983_v16 }
 0x306   :  { %v5873_v31 = vpop.f32.mrb[7].mxu1  ;;  %v429_v32 = vsel %vm428_vm4, %v423_v28, -inf }
 0x307   :  { %430 = vmax.xlane.f32.xlu0 %v429_v32 }
 0x394   :  { %v431_v33 = vpop.xlane.xlu0 %430 }
 0x395   :  { %v432_v34 = vsub.f32 %v423_v28, %v431_v33  ;;  %v687_v33 = vadd.f32 %v5147_v21, %v6985_v18  ;;  %v6480_v21 = vld [vmem:[%s8076_s3 + $0x50] sm:$0xff]  }
 0x397   :  { %v433_v35 = vmul.f32 1.442695, %v432_v34  ;;  %v848_v34 = vadd.f32 %v6992_v22, %v6987_v20 }
 0x399   :  { %6593 = vpow2.f32 %v433_v35  ;;  %v915_v16 = vpack.c.bf16 %v848_v34, %v848_v34  ;;  %v6484_v34 = vld [vmem:[%s8075_s0 + $0x48] sm:$0xff]  }
 0x39b   :  { %v920_v18 = vsel %vm445_vm3, %v915_v16, 0  ;;  %v6486_v16 = vld [vmem:[%s8075_s0 + $0x58] sm:$0xff]  }
 0x3a3   :  { %v6594_v36 = vpop.eup %6593 }
 0x3a4   :  { %v435_v39 = vsel %vm428_vm4, %v6594_v36, 0.0 }
 0x3a5   :  { %436 = vadd.xlane.f32.xlu1 %v435_v39  ;;  %v854_v39 = vmul.f32 0.25, %v684_v29  ;;  %v6483_v29 = vld [vmem:[%s8075_s0 + $0x40] sm:$0xff]  }
 0x3a7   :  { %v855_v43 = vpack.c.bf16 %v854_v39, %v854_v39 }
 0x432   :  { %v437_v41 = vpop.xlane.xlu1 %436 }
 0x433   :  { %6595 = vrcp.f32 %v437_v41 }
 0x43d   :  { %v6596_v42 = vpop.eup %6595 }
 0x43e   :  { %v439_v44 = vmul.f32 %v6596_v42, %v6594_v36  ;;  %v962_v42 = vmul.f32 0.25, %v687_v33 }
 0x440   :  { %v440_v45 = vpack.c.bf16 %v439_v44, %v439_v44  ;;  %v963_v44 = vpack.c.bf16 %v962_v42, %v962_v42 }
 0x442   :  { %5877 = vmatmul.mubr.msk.bf16.vlgmr.msra.gmra.mrb[8].mxu1 %vm428_vm4, %v440_v45 }
 0x443   :  { %5881 = vmatpush3.bf16.xpose.msra.mxu1 %v504_v46  ;;  %5882 = vmatprep.mubr.msk.bf16.mxu1 %vm6708_vm1, %v6707_v15 }
 0x444   :  { %5886 = vmatprep.subr.bf16.mxu1 %v6707_v15 }
 0x44a   :  { %5883 = vmatmul.mubr.msk.bf16.vlgmr.msra.gmra.mrb[12].mxu1 %vm381_vm2, %v490_v49 }
 0x44b   :  { %5887 = vmatpush3.bf16.msra.mxu1 %v563_v50  ;;  %5888 = vmatprep.mubr.msk.bf16.mxu1 %vm6708_vm1, %v6707_v15 }
 0x44c   :  { %5904 = vmatprep.subr.bf16.mxu1 %v6707_v15 }
 0x515   :  { %v7015_v51 = vpop.f32.mrb[8].mxu1 }
 0x516   :  { %v5878_v52 = vpop.f32.mrb[9].mxu1 }
 0x517   :  { %v486_v53 = vpop.f32.mrb[10].mxu1 }
 0x518   :  { %v5879_v54 = vpop.f32.mrb[11].mxu1 }
 0x51d   :  { %v540_v56 = vpop.f32.mrb[12].mxu1 }
 0x51e   :  { %v541_v57 = vadd.f32 %v7020_v55, %v540_v56  ;;  %v5884_v58 = vpop.f32.mrb[13].mxu1 }
 0x51f   :  { %v543_v59 = vpop.f32.mrb[14].mxu1 }
 0x520   :  { %v5885_v60 = vpop.f32.mrb[15].mxu1  ;;  %v546_v61 = vsel %vm428_vm4, %v541_v57, -inf }
 0x521   :  { %547 = vmax.xlane.f32.xlu0 %v546_v61 }
 0x5ae   :  { %v548_v62 = vpop.xlane.xlu0 %547 }
 0x5af   :  { %v549_v63 = vsub.f32 %v541_v57, %v548_v62 }
 0x5b1   :  { %v550_v0 = vmul.f32 1.442695, %v549_v63 }
 0x5b3   :  { %6597 = vpow2.f32 %v550_v0 }
 0x5bd   :  { %v6598_v1 = vpop.eup %6597 }
 0x5be   :  { %v552_v2 = vsel %vm428_vm4, %v6598_v1, 0.0 }
 0x5bf   :  { %553 = vadd.xlane.f32.xlu1 %v552_v2 }
 0x64c   :  { %v554_v3 = vpop.xlane.xlu1 %553 }
 0x64d   :  { %6599 = vrcp.f32 %v554_v3 }
 0x657   :  { %v6600_v4 = vpop.eup %6599 }
 0x658   :  { %v556_v5 = vmul.f32 %v6600_v4, %v6598_v1 }
 0x65a   :  { %v557_v7 = vpack.c.bf16 %v556_v5, %v556_v5 }
 0x65c   :  { %5889 = vmatmul.mubr.msk.bf16.vlgmr.msra.gmra.mrb[16].mxu1 %vm428_vm4, %v557_v7 }
 0x65d   :  { %5905 = vmatpush3.bf16.msra.mxu1 %v6473_v6  ;;  %5912 = vmatprep.mubr.msk.bf16.mxu1 %vm6708_vm1, %v6707_v15  ;;  %v1023_v6 = vpack.c.bf16 %v6995_v24, %v6995_v24  ;;  %v6478_v24 = vld [vmem:[%s8076_s3 + $0x40] sm:$0xff]  }
 0x65e   :  { %5906 = vmatprep.subr.bf16.mxu1 %v6707_v15 }
 0x661   :  { %5907 = vmatpush3.bf16.msra.mxu1 %v6474_v8 }
 0x662   :  { %5908 = vmatprep.subr.bf16.mxu1 %v6707_v15 }
 0x665   :  { %5909 = vmatpush3.bf16.msra.mxu1 %v6475_v9 }
 0x666   :  { %5910 = vmatprep.subr.bf16.mxu1 %v6707_v15 }
 0x669   :  { %5911 = vmatpush3.bf16.msra.mxu1 %v6476_v10  ;;  %v1028_v10 = vsel %vm445_vm3, %v1023_v6, 0 }
 0x66a   :  { %5928 = vmatprep.subr.bf16.mxu1 %v6707_v15 }
 0x66c   :  { %5913 = vmatmul.mubr.msk.bf16.vlgmr.msra.gmra.mrb[20].mxu1 %vm83_vm0, %v6900_v40 }
 0x66d   :  { %5930 = vmatprep.mubr.msk.bf16.mxu1 %vm6708_vm1, %v6707_v15 }
 0x72f   :  { %v7048_v11 = vpop.f32.mrb[16].mxu1 }
 0x730   :  { %v605_v12 = vpack.c.bf16 %v7048_v11, %v7015_v51  ;;  %v5890_v13 = vpop.f32.mrb[17].mxu1  ;;  %v6481_v51 = vld [vmem:[%s8076_s3 + $0x58] sm:$0xff]   ;;  %v6482_v11 = vld [vmem:[%s8043_s10 + $0x8] sm:$0xff]  }
 0x731   :  { %v602_v14 = vpop.f32.mrb[18].mxu1 }
 0x732   :  { %v5891_v17 = vpop.f32.mrb[19].mxu1  ;;  %v6477_v14 = vld [vmem:[%s8043_s10] sm:$0xff]  }
 0x73f   :  { %v765_v23 = vpop.f32.mrb[20].mxu1 }
 0x740   :  { %v766_v25 = vadd.f32 %v5162_v19, %v765_v23  ;;  %v5914_v27 = vpop.f32.mrb[21].mxu1 }
 0x741   :  { %v768_v28 = vpop.f32.mrb[22].mxu1 }
 0x742   :  { %v856_v30 = vpack.c.bf16 %v766_v25, %v766_v25  ;;  %v769_v31 = vadd.f32 %v5162_v19, %v768_v28  ;;  %v5915_v32 = vpop.f32.mrb[23].mxu1  ;;  %v6479_v19 = vld [vmem:[%s8076_s3 + $0x48] sm:$0xff]  }
 0x744   :  { %v861_v35 = vsel %vm381_vm2, %v856_v30, 0  ;;  %v964_v36 = vpack.c.bf16 %v769_v31, %v769_v31 }
 0x745   :  { %5929 = vmatpush3.bf16.xpose.msra.mxu1 %v861_v35 }
 0x746   :  { %v969_v41 = vsel %vm381_vm2, %v964_v36, 0  ;;  %5934 = vmatprep.subr.bf16.mxu1 %v6707_v15  ;;  %v6485_v36 = vld [vmem:[%s8075_s0 + $0x50] sm:$0xff]  }
 0x747   :  { %5941 = vmatpush3.bf16.xpose.msra.mxu0 %v969_v41 }
 0x748   :  { %5952 = vmatprep.subr.bf16.mxu0 %v6707_v15 }
 0x74c   :  { %5931 = vmatmul.mubr.msk.bf16.vlgmr.msra.gmra.mrb[24].mxu1 %vm381_vm2, %v855_v43  ;;  %v6487_v43 = vld [vmem:[%s8079_s28 + $0x40] sm:$0xff]  }
 0x74d   :  { %5935 = vmatpush3.bf16.msra.mxu1 %v920_v18  ;;  %5936 = vmatprep.mubr.msk.bf16.mxu1 %vm6708_vm1, %v6707_v15  ;;  %v5217_v18 = vld [vmem:[%s8080_s6 + $0x2] ss:$0 sm:$0xff] }
 0x74e   :  { %5943 = vmatmul.mubr.msk.bf16.vlgmr.msra.gmra.mrb[16].mxu0 %vm381_vm2, %v963_v44  ;;  %5946 = vmatprep.subr.bf16.mxu1 %v6707_v15  ;;  %v6488_v44 = vld [vmem:[%s8079_s28 + $0x48] sm:$0xff]  }
 0x74f   :  { %5954 = vmatprep.mubr.msk.bf16.mxu0 %vm6708_vm1, %v6707_v15  ;;  %5953 = vmatpush3.bf16.msra.mxu0 %v6482_v11 }
 0x750   :  { %5964 = vmatprep.subr.bf16.mxu0 %v6707_v15 }
 0x81f   :  { %v897_v20 = vpop.f32.mrb[24].mxu1 }
 0x820   :  { %v898_v22 = vadd.f32 %v7000_v26, %v897_v20  ;;  %v5932_v45 = vpop.f32.mrb[25].mxu1 }
 0x821   :  { %v900_v46 = vpop.f32.mrb[26].mxu1  ;;  %v1005_v47 = vpop.f32.mrb[16].mxu0 }
 0x822   :  { %v1006_v48 = vadd.f32 %v7020_v55, %v1005_v47  ;;  %v5933_v49 = vpop.f32.mrb[27].mxu1  ;;  %v5944_v50 = vpop.f32.mrb[17].mxu0  ;;  %v903_v52 = vsel %vm428_vm4, %v898_v22, -inf }
 0x823   :  { %904 = vmax.xlane.f32.xlu0 %v903_v52  ;;  %v1008_v53 = vpop.f32.mrb[18].mxu0  ;;  %v6490_v50 = vld [vmem:[%s8079_s28 + $0x58] sm:$0xff]  }
 0x824   :  { %v5945_v54 = vpop.f32.mrb[19].mxu0  ;;  %v1011_v56 = vsel %vm428_vm4, %v1006_v48, -inf }
 0x825   :  { %1012 = vmax.xlane.f32.xlu1 %v1011_v56 }
 0x8b0   :  { %v905_v57 = vpop.xlane.xlu0 %904 }
 0x8b1   :  { %v906_v58 = vsub.f32 %v898_v22, %v905_v57  ;;  %v6489_v22 = vld [vmem:[%s8079_s28 + $0x50] sm:$0xff]  }
 0x8b2   :  { %v1013_v59 = vpop.xlane.xlu1 %1012 }
 0x8b3   :  { %v907_v60 = vmul.f32 1.442695, %v906_v58  ;;  %v1014_v61 = vsub.f32 %v1006_v48, %v1013_v59 }
 0x8b5   :  { %6601 = vpow2.f32 %v907_v60  ;;  %v1015_v62 = vmul.f32 1.442695, %v1014_v61 }
 0x8b7   :  { %6603 = vpow2.f32 %v1015_v62 }
 0x8bf   :  { %v6602_v63 = vpop.eup %6601 }
 0x8c0   :  { %v909_v0 = vsel %vm428_vm4, %v6602_v63, 0.0 }
 0x8c1   :  { %v6604_v1 = vpop.eup %6603  ;;  %910 = vadd.xlane.f32.xlu0 %v909_v0 }
 0x8c2   :  { %v1017_v2 = vsel %vm428_vm4, %v6604_v1, 0.0 }
 0x8c3   :  { %1018 = vadd.xlane.f32.xlu1 %v1017_v2 }
 0x94e   :  { %v911_v3 = vpop.xlane.xlu0 %910 }
 0x94f   :  { %6605 = vrcp.f32 %v911_v3 }
 0x950   :  { %v1019_v4 = vpop.xlane.xlu1 %1018 }
 0x951   :  { %6607 = vrcp.f32 %v1019_v4 }
 0x959   :  { %v6606_v5 = vpop.eup %6605 }
 0x95a   :  { %v913_v7 = vmul.f32 %v6606_v5, %v6602_v63  ;;  %v5202_v63 = vld [vmem:[%s8081_s7 + $0x2] ss:$0 sm:$0xff] }
 0x95b   :  { %v6608_v9 = vpop.eup %6607 }
 0x95c   :  { %v914_v8 = vpack.c.bf16 %v913_v7, %v913_v7  ;;  %v1021_v13 = vmul.f32 %v6608_v9, %v6604_v1 }
 0x95e   :  { %5937 = vmatmul.mubr.msk.bf16.vlgmr.msra.gmra.mrb[28].mxu1 %vm428_vm4, %v914_v8  ;;  %v1022_v17 = vpack.c.bf16 %v1021_v13, %v1021_v13 }
 0x95f   :  { %5947 = vmatpush3.bf16.msra.mxu1 %v1028_v10  ;;  %5948 = vmatprep.mubr.msk.bf16.mxu1 %vm6708_vm1, %v6707_v15  ;;  %v5232_v10 = vld [vmem:[%s8042_s9 + $0x2] ss:$0 sm:$0xff] }
 0x960   :  { %5958 = vmatprep.subr.bf16.mxu1 %v6707_v15 }
 0x966   :  { %5949 = vmatmul.mubr.msk.bf16.vlgmr.msra.gmra.mrb[32].mxu1 %vm428_vm4, %v1022_v17 }
 0x967   :  { %5959 = vmatpush3.bf16.msra.mxu1 %v6477_v14  ;;  %5960 = vmatprep.mubr.msk.bf16.mxu1 %vm6708_vm1, %v6707_v15 }
 0x968   :  { %5976 = vmatprep.subr.bf16.mxu1 %v6707_v15 }
 0x96e   :  { %5961 = vmatmul.mubr.msk.bf16.vlgmr.msra.gmra.mrb[36].mxu1 %vm381_vm2, %v605_v12 }
 0x96f   :  { %5977 = vmatpush3.bf16.msra.mxu1 %v6478_v24  ;;  %5984 = vmatprep.mubr.msk.bf16.mxu1 %vm6708_vm1, %v6707_v15 }
 0x970   :  { %5978 = vmatprep.subr.bf16.mxu1 %v6707_v15 }
 0x973   :  { %5979 = vmatpush3.bf16.msra.mxu1 %v6479_v19 }
 0x974   :  { %5980 = vmatprep.subr.bf16.mxu1 %v6707_v15 }
 0x977   :  { %5981 = vmatpush3.bf16.msra.mxu1 %v6480_v21 }
 0x978   :  { %5982 = vmatprep.subr.bf16.mxu1 %v6707_v15 }
 0x97b   :  { %5983 = vmatpush3.bf16.msra.mxu1 %v6481_v51 }
 0x97c   :  { %6000 = vmatprep.subr.bf16.mxu1 %v6707_v15 }
 0x97e   :  { %5985 = vmatmul.mubr.msk.bf16.vlgmr.msra.gmra.mrb[40].mxu1 %vm83_vm0, %v6900_v40 }
 0x97f   :  { %6002 = vmatprep.mubr.msk.bf16.mxu1 %vm6708_vm1, %v6707_v15 }
 0xa31   :  { %v956_v12 = vpop.f32.mrb[28].mxu1 }
 0xa32   :  { %v5938_v23 = vpop.f32.mrb[29].mxu1 }
 0xa33   :  { %v959_v25 = vpop.f32.mrb[30].mxu1 }
 0xa34   :  { %v5939_v27 = vpop.f32.mrb[31].mxu1 }
 0xa39   :  { %v1064_v28 = vpop.f32.mrb[32].mxu1 }
 0xa3a   :  { %v1070_v30 = vpack.c.bf16 %v1064_v28, %v956_v12  ;;  %v5950_v31 = vpop.f32.mrb[33].mxu1 }
 0xa3b   :  { %v1067_v32 = vpop.f32.mrb[34].mxu1 }
 0xa3c   :  { %v5951_v33 = vpop.f32.mrb[35].mxu1  ;;  %5955 = vmatmul.mubr.msk.bf16.vlgmr.msra.gmra.mrb[20].mxu0 %vm381_vm2, %v1070_v30 }
 0xa3d   :  { %5965 = vmatpush3.bf16.msra.mxu0 %v6483_v29  ;;  %5972 = vmatprep.mubr.msk.bf16.mxu0 %vm6708_vm1, %v6707_v15 }
 0xa3e   :  { %5966 = vmatprep.subr.bf16.mxu0 %v6707_v15 }
 0xa41   :  { %5967 = vmatpush3.bf16.msra.mxu0 %v6484_v34  ;;  %v1167_v35 = vpop.f32.mrb[36].mxu1 }
 0xa42   :  { %v5962_v39 = vpop.f32.mrb[37].mxu1  ;;  %5968 = vmatprep.subr.bf16.mxu0 %v6707_v15 }
 0xa43   :  { %v1170_v41 = vpop.f32.mrb[38].mxu1 }
 0xa44   :  { %v5963_v42 = vpop.f32.mrb[39].mxu1 }
 0xa45   :  { %5969 = vmatpush3.bf16.msra.mxu0 %v6485_v36 }
 0xa46   :  { %5970 = vmatprep.subr.bf16.mxu0 %v6707_v15 }
 0xa49   :  { %5971 = vmatpush3.bf16.msra.mxu0 %v6486_v16 }
 0xa4a   :  { %5988 = vmatprep.subr.bf16.mxu0 %v6707_v15 }
 0xa4c   :  { %5973 = vmatmul.mubr.msk.bf16.vlgmr.msra.gmra.mrb[24].mxu0 %vm83_vm0, %v6900_v40 }
 0xa4d   :  { %5989 = vmatpush3.bf16.msra.mxu0 %v6487_v43  ;;  %5996 = vmatprep.mubr.msk.bf16.mxu0 %vm6708_vm1, %v6707_v15 }
 0xa4e   :  { %5990 = vmatprep.subr.bf16.mxu0 %v6707_v15 }
 0xa51   :  { %v1331_v20 = vpop.f32.mrb[40].mxu1  ;;  %5991 = vmatpush3.bf16.msra.mxu0 %v6488_v44 }
 0xa52   :  { %v1332_v45 = vadd.f32 %v5217_v18, %v1331_v20  ;;  %v5986_v46 = vpop.f32.mrb[41].mxu1  ;;  %5992 = vmatprep.subr.bf16.mxu0 %v6707_v15 }
 0xa53   :  { %v1334_v47 = vpop.f32.mrb[42].mxu1 }
 0xa54   :  { %v1422_v48 = vpack.c.bf16 %v1332_v45, %v1332_v45  ;;  %v5987_v49 = vpop.f32.mrb[43].mxu1  ;;  %v1335_v53 = vadd.f32 %v5217_v18, %v1334_v47 }
 0xa55   :  { %5993 = vmatpush3.bf16.msra.mxu0 %v6489_v22 }
 0xa56   :  { %v1427_v52 = vsel %vm381_vm2, %v1422_v48, 0  ;;  %5994 = vmatprep.subr.bf16.mxu0 %v6707_v15  ;;  %v1530_v54 = vpack.c.bf16 %v1335_v53, %v1335_v53 }
 0xa57   :  { %6001 = vmatpush3.bf16.xpose.msra.mxu1 %v1427_v52 }
 0xa58   :  { %6006 = vmatprep.subr.bf16.mxu1 %v6707_v15  ;;  %v1535_v56 = vsel %vm381_vm2, %v1530_v54, 0 }
 0xa59   :  { %5995 = vmatpush3.bf16.msra.mxu0 %v6490_v50 }
 0xa5a   :  { %6012 = vmatprep.subr.bf16.mxu0 %v6707_v15 }
 0xa5c   :  { %5997 = vmatmul.mubr.msk.bf16.vlgmr.msra.gmra.mrb[28].mxu0 %vm83_vm0, %v6900_v40 }
 0xa5d   :  { %6014 = vmatprep.mubr.msk.bf16.mxu0 %vm6708_vm1, %v6707_v15 }
 0xa62   :  { %6013 = vmatpush3.bf16.xpose.msra.mxu0 %v1535_v56  ;;  %v6491_v56 = vld [vmem:[%s8075_s0 + $0x60] sm:$0xff]  }
 0xa63   :  { %6024 = vmatprep.subr.bf16.mxu0 %v6707_v15 }
 0xb0f   :  { %v1117_v57 = vpop.f32.mrb[20].mxu0 }
 0xb10   :  { %v7174_v58 = vadd.f32 %v1167_v35, %v1117_v57  ;;  %v5956_v59 = vpop.f32.mrb[21].mxu0 }
 0xb11   :  { %v1120_v60 = vpop.f32.mrb[22].mxu0  ;;  %v6492_v59 = vld [vmem:[%s8075_s0 + $0x68] sm:$0xff]  }
 0xb12   :  { %v7176_v61 = vadd.f32 %v1170_v41, %v1120_v60  ;;  %v5957_v62 = vpop.f32.mrb[23].mxu0  ;;  %v6493_v60 = vld [vmem:[%s8075_s0 + $0x70] sm:$0xff]  }
 0xb13   :  { %v6494_v62 = vld [vmem:[%s8075_s0 + $0x78] sm:$0xff]  }
 0xb1f   :  { %v1249_v0 = vpop.f32.mrb[24].mxu0 }
 0xb20   :  { %v1250_v1 = vadd.f32 %v5202_v63, %v1249_v0  ;;  %v5974_v2 = vpop.f32.mrb[25].mxu0  ;;  %v6496_v0 = vld [vmem:[%s8079_s28 + $0x68] sm:$0xff]  }
 0xb21   :  { %v1252_v3 = vpop.f32.mrb[26].mxu0  ;;  %v6498_v2 = vld [vmem:[%s8079_s28 + $0x78] sm:$0xff]  }
 0xb22   :  { %v1420_v4 = vmul.f32 0.25, %v1250_v1  ;;  %v1253_v5 = vadd.f32 %v5202_v63, %v1252_v3  ;;  %v5975_v6 = vpop.f32.mrb[27].mxu0  ;;  %v6495_v63 = vld [vmem:[%s8079_s28 + $0x60] sm:$0xff]   ;;  %v6497_v1 = vld [vmem:[%s8079_s28 + $0x70] sm:$0xff]  }
 0xb23   :  { %v6499_v3 = vld [vmem:[%s8043_s10 + $0x10] sm:$0xff]  }
 0xb24   :  { %v1421_v7 = vpack.c.bf16 %v1420_v4, %v1420_v4  ;;  %v1528_v8 = vmul.f32 0.25, %v1253_v5 }
 0xb26   :  { %v1529_v9 = vpack.c.bf16 %v1528_v8, %v1528_v8  ;;  %6003 = vmatmul.mubr.msk.bf16.vlgmr.msra.gmra.mrb[44].mxu1 %vm381_vm2, %v1421_v7 }
 0xb27   :  { %6008 = vmatprep.mubr.msk.bf16.mxu1 %vm6708_vm1, %v6707_v15 }
 0xb28   :  { %6015 = vmatmul.mubr.msk.bf16.vlgmr.msra.gmra.mrb[32].mxu0 %vm381_vm2, %v1529_v9  ;;  %v6500_v9 = vld [vmem:[%s8076_s3 + $0x60] sm:$0xff]  }
 0xb29   :  { %6026 = vmatprep.mubr.msk.bf16.mxu0 %vm6708_vm1, %v6707_v15  ;;  %6025 = vmatpush3.bf16.msra.mxu0 %v6499_v3 }
 0xb2a   :  { %6042 = vmatprep.subr.bf16.mxu0 %v6707_v15 }
 0xb2f   :  { %v1413_v13 = vpop.f32.mrb[28].mxu0 }
 0xb30   :  { %v1414_v14 = vadd.f32 %v5232_v10, %v1413_v13  ;;  %v5998_v17 = vpop.f32.mrb[29].mxu0 }
 0xb31   :  { %v1416_v24 = vpop.f32.mrb[30].mxu0 }
 0xb32   :  { %v1481_v19 = vpack.c.bf16 %v1414_v14, %v1414_v14  ;;  %v1417_v21 = vadd.f32 %v5232_v10, %v1416_v24  ;;  %v5999_v51 = vpop.f32.mrb[31].mxu0  ;;  %v6501_v24 = vld [vmem:[%s8076_s3 + $0x68] sm:$0xff]  }
 0xb34   :  { %v1486_v11 = vsel %vm445_vm3, %v1481_v19, 0  ;;  %v1589_v48 = vpack.c.bf16 %v1417_v21, %v1417_v21  ;;  %v6502_v19 = vld [vmem:[%s8076_s3 + $0x70] sm:$0xff]   ;;  %v6503_v21 = vld [vmem:[%s8076_s3 + $0x78] sm:$0xff]  }
 0xb35   :  { %6007 = vmatpush3.bf16.msra.mxu1 %v1486_v11 }
 0xb36   :  { %6018 = vmatprep.subr.bf16.mxu1 %v6707_v15  ;;  %v1594_v53 = vsel %vm445_vm3, %v1589_v48, 0 }
 0xbf9   :  { %v1463_v12 = vpop.f32.mrb[44].mxu1 }
 0xbfa   :  { %v1464_v23 = vadd.f32 %v7000_v26, %v1463_v12  ;;  %v6004_v25 = vpop.f32.mrb[45].mxu1 }
 0xbfb   :  { %v1466_v27 = vpop.f32.mrb[46].mxu1  ;;  %v1571_v28 = vpop.f32.mrb[32].mxu0 }
 0xbfc   :  { %v1572_v29 = vadd.f32 %v7020_v55, %v1571_v28  ;;  %v6005_v30 = vpop.f32.mrb[47].mxu1  ;;  %v6016_v31 = vpop.f32.mrb[33].mxu0  ;;  %v1469_v32 = vsel %vm428_vm4, %v1464_v23, -inf  ;;  %v5285_v28 = vld [vmem:[%s8042_s9 + $0x3] ss:$0 sm:$0xff] }
 0xbfd   :  { %1470 = vmax.xlane.f32.xlu0 %v1469_v32  ;;  %v1574_v33 = vpop.f32.mrb[34].mxu0 }
 0xbfe   :  { %v6017_v34 = vpop.f32.mrb[35].mxu0  ;;  %v1577_v35 = vsel %vm428_vm4, %v1572_v29, -inf }
 0xbff   :  { %1578 = vmax.xlane.f32.xlu1 %v1577_v35 }
 0xc8a   :  { %v1471_v36 = vpop.xlane.xlu0 %1470 }
 0xc8b   :  { %v1472_v39 = vsub.f32 %v1464_v23, %v1471_v36 }
 0xc8c   :  { %v1579_v41 = vpop.xlane.xlu1 %1578 }
 0xc8d   :  { %v1473_v42 = vmul.f32 1.442695, %v1472_v39  ;;  %v1580_v16 = vsub.f32 %v1572_v29, %v1579_v41  ;;  %v5270_v39 = vld [vmem:[%s8080_s6 + $0x3] ss:$0 sm:$0xff] }
 0xc8e   :  { %v5255_v41 = vld [vmem:[%s8081_s7 + $0x3] ss:$0 sm:$0xff] }
 0xc8f   :  { %6609 = vpow2.f32 %v1473_v42  ;;  %v1581_v43 = vmul.f32 1.442695, %v1580_v16 }
 0xc91   :  { %6611 = vpow2.f32 %v1581_v43 }
 0xc99   :  { %v6610_v44 = vpop.eup %6609 }
 0xc9a   :  { %v1475_v18 = vsel %vm428_vm4, %v6610_v44, 0.0 }
 0xc9b   :  { %v6612_v20 = vpop.eup %6611  ;;  %1476 = vadd.xlane.f32.xlu0 %v1475_v18 }
 0xc9c   :  { %v1583_v22 = vsel %vm428_vm4, %v6612_v20, 0.0 }
 0xc9d   :  { %1584 = vadd.xlane.f32.xlu1 %v1583_v22 }
 0xd28   :  { %v1477_v45 = vpop.xlane.xlu0 %1476 }
 0xd29   :  { %6613 = vrcp.f32 %v1477_v45 }
 0xd2a   :  { %v1585_v46 = vpop.xlane.xlu1 %1584 }
 0xd2b   :  { %6615 = vrcp.f32 %v1585_v46 }
 0xd33   :  { %v6614_v47 = vpop.eup %6613 }
 0xd34   :  { %v1479_v49 = vmul.f32 %v6614_v47, %v6610_v44 }
 0xd35   :  { %v6616_v52 = vpop.eup %6615 }
 0xd36   :  { %v1480_v50 = vpack.c.bf16 %v1479_v49, %v1479_v49  ;;  %v1587_v54 = vmul.f32 %v6616_v52, %v6612_v20 }
 0xd38   :  { %6009 = vmatmul.mubr.msk.bf16.vlgmr.msra.gmra.mrb[48].mxu1 %vm428_vm4, %v1480_v50  ;;  %v1588_v57 = vpack.c.bf16 %v1587_v54, %v1587_v54 }
 0xd39   :  { %6019 = vmatpush3.bf16.msra.mxu1 %v1594_v53  ;;  %6020 = vmatprep.mubr.msk.bf16.mxu1 %vm6708_vm1, %v6707_v15 }
 0xd3a   :  { %6030 = vmatprep.subr.bf16.mxu1 %v6707_v15 }
 0xd40   :  { %6021 = vmatmul.mubr.msk.bf16.vlgmr.msra.gmra.mrb[52].mxu1 %vm428_vm4, %v1588_v57 }
 0xd41   :  { %6031 = vmatpush3.bf16.msra.mxu1 %v6491_v56  ;;  %6038 = vmatprep.mubr.msk.bf16.mxu1 %vm6708_vm1, %v6707_v15 }
 0xd42   :  { %6032 = vmatprep.subr.bf16.mxu1 %v6707_v15 }
 0xd45   :  { %6033 = vmatpush3.bf16.msra.mxu1 %v6492_v59 }
 0xd46   :  { %6034 = vmatprep.subr.bf16.mxu1 %v6707_v15 }
 0xd49   :  { %6035 = vmatpush3.bf16.msra.mxu1 %v6493_v60 }
 0xd4a   :  { %6036 = vmatprep.subr.bf16.mxu1 %v6707_v15 }
 0xd4d   :  { %6037 = vmatpush3.bf16.msra.mxu1 %v6494_v62 }
 0xd4e   :  { %6054 = vmatprep.subr.bf16.mxu1 %v6707_v15 }
 0xd50   :  { %6039 = vmatmul.mubr.msk.bf16.vlgmr.msra.gmra.mrb[56].mxu1 %vm83_vm0, %v6900_v40 }
 0xd51   :  { %6055 = vmatpush3.bf16.msra.mxu1 %v6495_v63  ;;  %6062 = vmatprep.mubr.msk.bf16.mxu1 %vm6708_vm1, %v6707_v15 }
 0xd52   :  { %6056 = vmatprep.subr.bf16.mxu1 %v6707_v15 }
 0xd55   :  { %6057 = vmatpush3.bf16.msra.mxu1 %v6496_v0 }
 0xd56   :  { %6058 = vmatprep.subr.bf16.mxu1 %v6707_v15 }
 0xd59   :  { %6059 = vmatpush3.bf16.msra.mxu1 %v6497_v1 }
 0xd5a   :  { %6060 = vmatprep.subr.bf16.mxu1 %v6707_v15 }
 0xd5d   :  { %6061 = vmatpush3.bf16.msra.mxu1 %v6498_v2 }
 0xd5e   :  { %6078 = vmatprep.subr.bf16.mxu1 %v6707_v15 }
 0xd60   :  { %6063 = vmatmul.mubr.msk.bf16.vlgmr.msra.gmra.mrb[60].mxu1 %vm83_vm0, %v6900_v40 }
 0xd61   :  { %6080 = vmatprep.mubr.msk.bf16.mxu1 %vm6708_vm1, %v6707_v15 }
 0xe0b   :  { %v1522_v4 = vpop.f32.mrb[48].mxu1 }
 0xe0c   :  { %v6010_v5 = vpop.f32.mrb[49].mxu1 }
 0xe0d   :  { %v1525_v6 = vpop.f32.mrb[50].mxu1 }
 0xe0e   :  { %v6011_v7 = vpop.f32.mrb[51].mxu1 }
 0xe13   :  { %v1630_v8 = vpop.f32.mrb[52].mxu1 }
 0xe14   :  { %v1636_v10 = vpack.c.bf16 %v1630_v8, %v1522_v4  ;;  %v6022_v13 = vpop.f32.mrb[53].mxu1 }
 0xe15   :  { %v1633_v14 = vpop.f32.mrb[54].mxu1 }
 0xe16   :  { %v6023_v17 = vpop.f32.mrb[55].mxu1  ;;  %6027 = vmatmul.mubr.msk.bf16.vlgmr.msra.gmra.mrb[36].mxu0 %vm381_vm2, %v1636_v10 }
 0xe17   :  { %6043 = vmatpush3.bf16.msra.mxu0 %v6500_v9  ;;  %6050 = vmatprep.mubr.msk.bf16.mxu0 %vm6708_vm1, %v6707_v15 }
 0xe18   :  { %6044 = vmatprep.subr.bf16.mxu0 %v6707_v15 }
 0xe1b   :  { %6045 = vmatpush3.bf16.msra.mxu0 %v6501_v24 }
 0xe1c   :  { %6046 = vmatprep.subr.bf16.mxu0 %v6707_v15 }
 0xe1f   :  { %6047 = vmatpush3.bf16.msra.mxu0 %v6502_v19 }
 0xe20   :  { %6048 = vmatprep.subr.bf16.mxu0 %v6707_v15 }
 0xe23   :  { %v1767_v51 = vpop.f32.mrb[56].mxu1  ;;  %6049 = vmatpush3.bf16.msra.mxu0 %v6503_v21 }
 0xe24   :  { %v6040_v11 = vpop.f32.mrb[57].mxu1  ;;  %6066 = vmatprep.subr.bf16.mxu0 %v6707_v15 }
 0xe25   :  { %v1770_v12 = vpop.f32.mrb[58].mxu1 }
 0xe26   :  { %v6041_v23 = vpop.f32.mrb[59].mxu1  ;;  %6051 = vmatmul.mubr.msk.bf16.vlgmr.msra.gmra.mrb[40].mxu0 %vm83_vm0, %v6900_v40  ;;  %v1771_v45 = vadd.f32 %v5255_v41, %v1770_v12 }
 0xe27   :  { %6068 = vmatprep.mubr.msk.bf16.mxu0 %vm6708_vm1, %v6707_v15 }
 0xe28   :  { %v2046_v50 = vmul.f32 0.25, %v1771_v45 }
 0xe2a   :  { %v2047_v54 = vpack.c.bf16 %v2046_v50, %v2046_v50 }
 0xe33   :  { %v1931_v25 = vpop.f32.mrb[60].mxu1 }
 0xe34   :  { %v6064_v27 = vpop.f32.mrb[61].mxu1 }
 0xe35   :  { %v1934_v29 = vpop.f32.mrb[62].mxu1 }
 0xe36   :  { %v7276_v30 = vadd.f32 %v5285_v28, %v1934_v29  ;;  %v6065_v31 = vpop.f32.mrb[63].mxu1 }
 0xe38   :  { %v2107_v11 = vpack.c.bf16 %v7276_v30, %v7276_v30  ;;  %v6504_v30 = vld [vmem:[%s8043_s10 + $0x18] sm:$0xff]  }
 0xe3a   :  { %v2112_v27 = vsel %vm445_vm3, %v2107_v11, 0  ;;  %v6511_v11 = vld [vmem:[%s8049_s16 + $0x10] sm:$0xff]  }
 0xee9   :  { %v1683_v32 = vpop.f32.mrb[36].mxu0 }
 0xeea   :  { %v7279_v33 = vadd.f32 %v1683_v32, %v7174_v58  ;;  %v6028_v34 = vpop.f32.mrb[37].mxu0  ;;  %v1768_v58 = vadd.f32 %v5255_v41, %v1767_v51 }
 0xeeb   :  { %v1686_v35 = vpop.f32.mrb[38].mxu0 }
 0xeec   :  { %v7282_v40 = vadd.f32 %v1686_v35, %v7176_v61  ;;  %v6029_v36 = vpop.f32.mrb[39].mxu0  ;;  %v1932_v61 = vadd.f32 %v5285_v28, %v1931_v25  ;;  %v1938_v48 = vmul.f32 0.25, %v1768_v58 }
 0xeee   :  { %v1999_v52 = vpack.c.bf16 %v1932_v61, %v1932_v61  ;;  %v1939_v53 = vpack.c.bf16 %v1938_v48, %v1938_v48 }
 0xef0   :  { %v2004_v56 = vsel %vm445_vm3, %v1999_v52, 0 }
 0xef9   :  { %v1849_v42 = vpop.f32.mrb[40].mxu0 }
 0xefa   :  { %v1850_v16 = vadd.f32 %v5270_v39, %v1849_v42  ;;  %v6052_v43 = vpop.f32.mrb[41].mxu0 }
 0xefb   :  { %v1852_v44 = vpop.f32.mrb[42].mxu0 }
 0xefc   :  { %v1940_v18 = vpack.c.bf16 %v1850_v16, %v1850_v16  ;;  %v1853_v20 = vadd.f32 %v5270_v39, %v1852_v44  ;;  %v6053_v22 = vpop.f32.mrb[43].mxu0  ;;  %v5299_v44 = vld [vmem:[%s8044_s11] ss:$0 sm:$0xff] }
 0xefe   :  { %v1945_v46 = vsel %vm381_vm2, %v1940_v18, 0  ;;  %v2048_v47 = vpack.c.bf16 %v1853_v20, %v1853_v20 }
 0xeff   :  { %6067 = vmatpush3.bf16.xpose.msra.mxu0 %v1945_v46 }
 0xf00   :  { %v2053_v49 = vsel %vm381_vm2, %v2048_v47, 0  ;;  %6072 = vmatprep.subr.bf16.mxu0 %v6707_v15 }
 0xf01   :  { %6079 = vmatpush3.bf16.xpose.msra.mxu1 %v2053_v49 }
 0xf02   :  { %6090 = vmatprep.subr.bf16.mxu1 %v6707_v15 }
 0xf06   :  { %6069 = vmatmul.mubr.msk.bf16.vlgmr.msra.gmra.mrb[44].mxu0 %vm381_vm2, %v1939_v53 }
 0xf07   :  { %6073 = vmatpush3.bf16.msra.mxu0 %v2004_v56  ;;  %6074 = vmatprep.mubr.msk.bf16.mxu0 %vm6708_vm1, %v6707_v15 }
 0xf08   :  { %6081 = vmatmul.mubr.msk.bf16.vlgmr.msra.gmra.mrb[64].mxu1 %vm381_vm2, %v2047_v54  ;;  %6084 = vmatprep.subr.bf16.mxu0 %v6707_v15 }
 0xf09   :  { %6092 = vmatprep.mubr.msk.bf16.mxu1 %vm6708_vm1, %v6707_v15  ;;  %6091 = vmatpush3.bf16.msra.mxu1 %v6504_v30 }
 0xf0a   :  { %6108 = vmatprep.subr.bf16.mxu1 %v6707_v15 }
 0xfd9   :  { %v1981_v57 = vpop.f32.mrb[44].mxu0 }
 0xfda   :  { %v1982_v59 = vadd.f32 %v7000_v26, %v1981_v57  ;;  %v6070_v60 = vpop.f32.mrb[45].mxu0 }
 0xfdb   :  { %v1984_v62 = vpop.f32.mrb[46].mxu0  ;;  %v2089_v63 = vpop.f32.mrb[64].mxu1 }
 0xfdc   :  { %v2090_v0 = vadd.f32 %v7020_v55, %v2089_v63  ;;  %v6071_v1 = vpop.f32.mrb[47].mxu0  ;;  %v6082_v2 = vpop.f32.mrb[65].mxu1  ;;  %v1987_v3 = vsel %vm428_vm4, %v1982_v59, -inf  ;;  %v6506_v62 = vld [vmem:[%s8047_s14 + $0x8] sm:$0xff]   ;;  %v6507_v63 = vld [vmem:[%s8047_s14 + $0x10] sm:$0xff]  }
 0xfdd   :  { %v2092_v4 = vpop.f32.mrb[66].mxu1  ;;  %1988 = vmax.xlane.f32.xlu0 %v1987_v3 }
 0xfde   :  { %v6083_v5 = vpop.f32.mrb[67].mxu1  ;;  %v2095_v6 = vsel %vm428_vm4, %v2090_v0, -inf }
 0xfdf   :  { %2096 = vmax.xlane.f32.xlu1 %v2095_v6 }
0x106a   :  { %v1989_v7 = vpop.xlane.xlu0 %1988 }
0x106b   :  { %v1990_v8 = vsub.f32 %v1982_v59, %v1989_v7 }
0x106c   :  { %v2097_v9 = vpop.xlane.xlu1 %2096 }
0x106d   :  { %v1991_v10 = vmul.f32 1.442695, %v1990_v8  ;;  %v2098_v26 = vsub.f32 %v2090_v0, %v2097_v9  ;;  %v6508_v0 = vld [vmem:[%s8047_s14 + $0x18] sm:$0xff]   ;;  %v5300_v8 = vld [vmem:[%s8045_s12] ss:$0 sm:$0xff] }
0x106f   :  { %6617 = vpow2.f32 %v1991_v10  ;;  %v2099_v13 = vmul.f32 1.442695, %v2098_v26 }
0x1071   :  { %6619 = vpow2.f32 %v2099_v13 }
0x1079   :  { %v6618_v14 = vpop.eup %6617 }
0x107a   :  { %v1993_v55 = vsel %vm428_vm4, %v6618_v14, 0.0 }
0x107b   :  { %v6620_v17 = vpop.eup %6619  ;;  %1994 = vadd.xlane.f32.xlu0 %v1993_v55 }
0x107c   :  { %v2101_v24 = vsel %vm428_vm4, %v6620_v17, 0.0 }
0x107d   :  { %2102 = vadd.xlane.f32.xlu1 %v2101_v24 }
0x1108   :  { %v1995_v19 = vpop.xlane.xlu0 %1994 }
0x1109   :  { %6621 = vrcp.f32 %v1995_v19 }
0x110a   :  { %v2103_v21 = vpop.xlane.xlu1 %2102 }
0x110b   :  { %6623 = vrcp.f32 %v2103_v21  ;;  %v6509_v21 = vld [vmem:[%s8049_s16] sm:$0xff]  }
0x1113   :  { %v6622_v51 = vpop.eup %6621 }
0x1114   :  { %v1997_v12 = vmul.f32 %v6622_v51, %v6618_v14  ;;  %v5301_v14 = vld [vmem:[%s8046_s13] ss:$0 sm:$0xff]  ;;  %v6510_v51 = vld [vmem:[%s8049_s16 + $0x8] sm:$0xff]  }
0x1115   :  { %v6624_v25 = vpop.eup %6623 }
0x1116   :  { %v1998_v23 = vpack.c.bf16 %v1997_v12, %v1997_v12  ;;  %v2105_v28 = vmul.f32 %v6624_v25, %v6620_v17  ;;  %v6512_v12 = vld [vmem:[%s8049_s16 + $0x18] sm:$0xff]   ;;  %v6514_v25 = vld [vmem:[%s8049_s16 + $0x28] sm:$0xff]  }
0x1118   :  { %6075 = vmatmul.mubr.msk.bf16.vlgmr.msra.gmra.mrb[48].mxu0 %vm428_vm4, %v1998_v23  ;;  %v2106_v29 = vpack.c.bf16 %v2105_v28, %v2105_v28  ;;  %v6513_v23 = vld [vmem:[%s8049_s16 + $0x20] sm:$0xff]   ;;  %v6516_v28 = vld [vmem:[%s8049_s16 + $0x38] sm:$0xff]  }
0x1119   :  { %6085 = vmatpush3.bf16.msra.mxu0 %v2112_v27  ;;  %6086 = vmatprep.mubr.msk.bf16.mxu0 %vm6708_vm1, %v6707_v15  ;;  %v6515_v27 = vld [vmem:[%s8049_s16 + $0x30] sm:$0xff]  }
0x111a   :  { %6096 = vmatprep.subr.bf16.mxu0 %v6707_v15 }
0x1120   :  { %6087 = vmatmul.mubr.msk.bf16.vlgmr.msra.gmra.mrb[52].mxu0 %vm428_vm4, %v2106_v29  ;;  %v5302_v29 = vld [vmem:[%s8048_s15] ss:$0 sm:$0xff] }
0x1121   :  { %6104 = vmatprep.mubr.msk.bf16.mxu0 %vm6708_vm1, %v6707_v15 }
0x11eb   :  { %v2040_v31 = vpop.f32.mrb[48].mxu0 }
0x11ec   :  { %v6076_v32 = vpop.f32.mrb[49].mxu0 }
0x11ed   :  { %v2043_v34 = vpop.f32.mrb[50].mxu0 }
0x11ee   :  { %v6077_v35 = vpop.f32.mrb[51].mxu0 }
0x11f3   :  { %v2148_v36 = vpop.f32.mrb[52].mxu0 }
0x11f4   :  { %v2154_v39 = vpack.c.bf16 %v2148_v36, %v2040_v31  ;;  %v6088_v41 = vpop.f32.mrb[53].mxu0 }
0x11f5   :  { %v2151_v42 = vpop.f32.mrb[54].mxu0 }
0x11f6   :  { %v6089_v16 = vpop.f32.mrb[55].mxu0  ;;  %6093 = vmatmul.mubr.msk.bf16.vlgmr.msra.gmra.mrb[68].mxu1 %vm381_vm2, %v2154_v39 }
0x11f7   :  { %6124 = vmatprep.mubr.msk.bf16.mxu1 %vm6708_vm1, %v6707_v15  ;;  %6109 = vmatpush3.bf16.msra.mxu1 %v6509_v21 }
0x11f8   :  { %6110 = vmatprep.subr.bf16.mxu1 %v6707_v15 }
0x11fb   :  { %6111 = vmatpush3.bf16.msra.mxu1 %v6510_v51 }
0x11fc   :  { %6112 = vmatprep.subr.bf16.mxu1 %v6707_v15 }
0x11ff   :  { %6113 = vmatpush3.bf16.msra.mxu1 %v6511_v11 }
0x1200   :  { %6114 = vmatprep.subr.bf16.mxu1 %v6707_v15 }
0x1203   :  { %6115 = vmatpush3.bf16.msra.mxu1 %v6512_v12 }
0x1204   :  { %6116 = vmatprep.subr.bf16.mxu1 %v6707_v15 }
0x1207   :  { %6117 = vmatpush3.bf16.msra.mxu1 %v6513_v23 }
0x1208   :  { %6118 = vmatprep.subr.bf16.mxu1 %v6707_v15 }
0x120b   :  { %6119 = vmatpush3.bf16.msra.mxu1 %v6514_v25 }
0x120c   :  { %6120 = vmatprep.subr.bf16.mxu1 %v6707_v15 }
0x120f   :  { %6121 = vmatpush3.bf16.msra.mxu1 %v6515_v27 }
0x1210   :  { %6122 = vmatprep.subr.bf16.mxu1 %v6707_v15 }
0x1213   :  { %6123 = vmatpush3.bf16.msra.mxu1 %v6516_v28  ;;  %v5317_v28 = vld [vmem:[%s8051_s18] ss:$0 sm:$0xff] }
0x1214   :  { %6152 = vmatprep.subr.bf16.mxu1 %v6707_v15 }
0x12c9   :  { %v2201_v43 = vpop.f32.mrb[68].mxu1 }
0x12ca   :  { %v2208_v58 = vadd.f32 %v2201_v43, %v7279_v33  ;;  %v6094_v18 = vpop.f32.mrb[69].mxu1 }
0x12cb   :  { %v2204_v20 = vpop.f32.mrb[70].mxu1 }
0x12cc   :  { %v2217_v22 = vadd.f32 %v5299_v44, %v2208_v58  ;;  %v2209_v45 = vadd.f32 %v2204_v20, %v7282_v40  ;;  %v6095_v61 = vpop.f32.mrb[71].mxu1 }
0x12ce   :  { %v2218_v46 = vadd.f32 %v5299_v44, %v2209_v45  ;;  %v2219_v47 = vadd.f32 %v2217_v22, %v6891_v37 }
0x12d0   :  { %v2223_v48 = vsel %vm83_vm0, %v2219_v47, 0.0  ;;  %v2220_v49 = vadd.f32 %v2218_v46, %v6893_v38  ;;  %v6505_v38 = vld [vmem:[%s8047_s14] sm:$0xff]  }
0x12d1   :  { %2224 = vadd.xlane.f32.xlu0 %v2223_v48  ;;  %6097 = vmatpush3.bf16.msra.mxu0 %v6505_v38 }
0x12d2   :  { %v2226_v50 = vsel %vm83_vm0, %v2220_v49, 0.0  ;;  %6098 = vmatprep.subr.bf16.mxu0 %v6707_v15 }
0x12d3   :  { %2227 = vadd.xlane.f32.xlu1 %v2226_v50 }
0x12d5   :  { %6099 = vmatpush3.bf16.msra.mxu0 %v6506_v62 }
0x12d6   :  { %6100 = vmatprep.subr.bf16.mxu0 %v6707_v15 }
0x12d9   :  { %6101 = vmatpush3.bf16.msra.mxu0 %v6507_v63 }
0x12da   :  { %6102 = vmatprep.subr.bf16.mxu0 %v6707_v15 }
0x12dd   :  { %6103 = vmatpush3.bf16.msra.mxu0 %v6508_v0 }
0x12de   :  { %6128 = vmatprep.subr.bf16.mxu0 %v6707_v15 }
0x135e   :  { %v2225_v52 = vpop.xlane.xlu0 %2224 }
0x135f   :  { %v2229_v53 = vmul.f32 0.015625, %v2225_v52 }
0x1360   :  { %v2228_v33 = vpop.xlane.xlu1 %2227 }
0x1361   :  { %v2231_v54 = vsub.f32 %v2219_v47, %v2229_v53  ;;  %v2230_v56 = vmul.f32 0.015625, %v2228_v33  ;;  %v5308_v33 = vld [vmem:[%s8050_s17] ss:$0 sm:$0xff] }
0x1363   :  { %v2232_v57 = vsub.f32 %v2220_v49, %v2230_v56  ;;  %v2233_v59 = vmul.f32 %v2231_v54, %v2231_v54 }
0x1365   :  { %v2235_v40 = vsel %vm83_vm0, %v2233_v59, 0.0  ;;  %v2234_v60 = vmul.f32 %v2232_v57, %v2232_v57 }
0x1366   :  { %2236 = vadd.xlane.f32.xlu0 %v2235_v40 }
0x1367   :  { %v2238_v37 = vsel %vm83_vm0, %v2234_v60, 0.0 }
0x1368   :  { %2239 = vadd.xlane.f32.xlu1 %v2238_v37 }
0x13f3   :  { %v2237_v1 = vpop.xlane.xlu0 %2236 }
0x13f4   :  { %v2241_v2 = vmul.f32 0.015625, %v2237_v1 }
0x13f5   :  { %v2240_v3 = vpop.xlane.xlu1 %2239 }
0x13f6   :  { %v2243_v4 = vadd.f32 1e-12, %v2241_v2  ;;  %v2242_v5 = vmul.f32 0.015625, %v2240_v3 }
0x13f8   :  { %6625 = vrsqrt.f32 %v2243_v4  ;;  %v2244_v6 = vadd.f32 1e-12, %v2242_v5 }
0x13fa   :  { %6627 = vrsqrt.f32 %v2244_v6 }
0x1402   :  { %v6626_v7 = vpop.eup %6625 }
0x1403   :  { %v2247_v9 = vmul.f32 %v6626_v7, %v2231_v54 }
0x1404   :  { %v6628_v10 = vpop.eup %6627 }
0x1405   :  { %v2255_v26 = vmul.f32 %v5300_v8, %v2247_v9  ;;  %v2248_v13 = vmul.f32 %v6628_v10, %v2232_v57  ;;  %v6517_v10 = vld [vmem:[%s8075_s0 + $0x80] sm:$0xff]  }
0x1407   :  { %v2256_v55 = vmul.f32 %v5300_v8, %v2248_v13  ;;  %v7358_v17 = vadd.f32 %v5301_v14, %v2255_v26  ;;  %v6518_v26 = vld [vmem:[%s8079_s28 + $0x80] sm:$0xff]   ;;  %v6519_v13 = vld [vmem:[%s8075_s0 + $0x88] sm:$0xff]  }
0x1409   :  { %v7360_v24 = vadd.f32 %v5301_v14, %v2256_v55  ;;  %v6520_v14 = vld [vmem:[%s8079_s28 + $0x88] sm:$0xff]   ;;  %v6521_v55 = vld [vmem:[%s8075_s0 + $0x90] sm:$0xff]  }
0x140b   :  { %v2265_v19 = vpack.c.bf16 %v7360_v24, %v7358_v17 }
0x140d   :  { %6105 = vmatmul.mubr.msk.bf16.vlgmr.msra.gmra.mrb[56].mxu0 %vm83_vm0, %v2265_v19  ;;  %v6524_v19 = vld [vmem:[%s8079_s28 + $0x98] sm:$0xff]  }
0x140e   :  { %6136 = vmatprep.mubr.msk.bf16.mxu0 %vm6708_vm1, %v6707_v15  ;;  %6129 = vmatpush3.bf16.msra.mxu0 %v6517_v10  ;;  %v6532_v10 = vld [vmem:[%s8075_s0 + $0xb8] sm:$0xff]  }
0x140f   :  { %6130 = vmatprep.subr.bf16.mxu0 %v6707_v15 }
0x1412   :  { %6131 = vmatpush3.bf16.msra.mxu0 %v6519_v13  ;;  %v6534_v13 = vld [vmem:[%s8079_s28 + $0xa8] sm:$0xff]  }
0x1413   :  { %6132 = vmatprep.subr.bf16.mxu0 %v6707_v15 }
0x1416   :  { %6133 = vmatpush3.bf16.msra.mxu0 %v6521_v55  ;;  %v6536_v55 = vld [vmem:[%s8079_s28 + $0xb8] sm:$0xff]  }
0x1417   :  { %6134 = vmatprep.subr.bf16.mxu0 %v6707_v15 }
0x14e0   :  { %v2342_v30 = vpop.f32.mrb[56].mxu0 }
0x14e1   :  { %v2343_v31 = vadd.f32 %v5302_v29, %v2342_v30  ;;  %v6106_v32 = vpop.f32.mrb[57].mxu0 }
0x14e2   :  { %v2345_v34 = vpop.f32.mrb[58].mxu0 }
0x14e3   :  { %v2349_v35 = vmul.f32 %v2343_v31, %v2343_v31  ;;  %v2346_v36 = vadd.f32 %v5302_v29, %v2345_v34  ;;  %v6107_v39 = vpop.f32.mrb[59].mxu0  ;;  %v5318_v34 = vld [vmem:[%s8052_s19] ss:$0 sm:$0xff] }
0x14e5   :  { %v2351_v41 = vmul.f32 %v2349_v35, %v2343_v31  ;;  %v2350_v42 = vmul.f32 %v2346_v36, %v2346_v36 }
0x14e7   :  { %v2353_v16 = vmul.f32 0.044715, %v2351_v41  ;;  %v2352_v43 = vmul.f32 %v2350_v42, %v2346_v36  ;;  %v6525_v41 = vld [vmem:[%s8076_s3 + $0x80] sm:$0xff]  }
0x14e9   :  { %v2355_v44 = vadd.f32 %v2353_v16, %v2343_v31  ;;  %v2354_v58 = vmul.f32 0.044715, %v2352_v43  ;;  %v6526_v16 = vld [vmem:[%s8076_s3 + $0x88] sm:$0xff]   ;;  %v6527_v43 = vld [vmem:[%s8076_s3 + $0x90] sm:$0xff]  }
0x14eb   :  { %v2357_v18 = vmul.f32 0.7978846, %v2355_v44  ;;  %v2356_v20 = vadd.f32 %v2354_v58, %v2346_v36  ;;  %v6528_v44 = vld [vmem:[%s8076_s3 + $0x98] sm:$0xff]   ;;  %v5358_v58 = vld [vmem:[%s8042_s9 + $0x4] ss:$0 sm:$0xff] }
0x14ed   :  { %6629 = vtanh.f32 %v2357_v18  ;;  %v2358_v22 = vmul.f32 0.7978846, %v2356_v20 }
0x14ef   :  { %6631 = vtanh.f32 %v2358_v22 }
0x14f7   :  { %v6630_v45 = vpop.eup %6629 }
0x14f8   :  { %v2361_v61 = vadd.f32 1.0, %v6630_v45 }
0x14f9   :  { %v6632_v46 = vpop.eup %6631 }
0x14fa   :  { %v2363_v47 = vmul.f32 0.5, %v2361_v61  ;;  %v2362_v48 = vadd.f32 1.0, %v6632_v46 }
0x14fc   :  { %v2364_v49 = vmul.f32 0.5, %v2362_v48  ;;  %v2365_v50 = vmul.f32 %v2363_v47, %v2343_v31 }
0x14fe   :  { %v2366_v52 = vmul.f32 %v2364_v49, %v2346_v36 }
0x1500   :  { %v2367_v53 = vpack.c.bf16 %v2366_v52, %v2365_v50 }
0x1502   :  { %6125 = vmatmul.mubr.bf16.vlgmr.msra.gmra.mrb[72].mxu1 %v2367_v53 }
0x1503   :  { %6160 = vmatprep.mubr.msk.bf16.mxu1 %vm6708_vm1, %v6707_v15  ;;  %6153 = vmatpush3.bf16.msra.mxu1 %v6518_v26  ;;  %v6533_v26 = vld [vmem:[%s8079_s28 + $0xa0] sm:$0xff]  }
0x1504   :  { %6154 = vmatprep.subr.bf16.mxu1 %v6707_v15 }
0x1507   :  { %6155 = vmatpush3.bf16.msra.mxu1 %v6520_v14  ;;  %v6535_v14 = vld [vmem:[%s8079_s28 + $0xb0] sm:$0xff]  }
0x1508   :  { %6156 = vmatprep.subr.bf16.mxu1 %v6707_v15 }
0x15d5   :  { %v2473_v54 = vpop.f32.mrb[72].mxu1 }
0x15d6   :  { %v2474_v56 = vadd.f32 %v5308_v33, %v2473_v54  ;;  %v6126_v57 = vpop.f32.mrb[73].mxu1  ;;  %v5328_v54 = vld [vmem:[%s8081_s7 + $0x4] ss:$0 sm:$0xff] }
0x15d7   :  { %v2476_v59 = vpop.f32.mrb[74].mxu1 }
0x15d8   :  { %v2477_v40 = vadd.f32 %v5308_v33, %v2476_v59  ;;  %v6127_v60 = vpop.f32.mrb[75].mxu1  ;;  %v2480_v37 = vadd.f32 %v2474_v56, %v7358_v17  ;;  %v6522_v17 = vld [vmem:[%s8079_s28 + $0x90] sm:$0xff]   ;;  %v5343_v33 = vld [vmem:[%s8080_s6 + $0x4] ss:$0 sm:$0xff] }
0x15d9   :  { %6157 = vmatpush3.bf16.msra.mxu1 %v6522_v17 }
0x15da   :  { %v2484_v38 = vsel %vm83_vm0, %v2480_v37, 0.0  ;;  %v2481_v62 = vadd.f32 %v2477_v40, %v7360_v24  ;;  %v6523_v24 = vld [vmem:[%s8075_s0 + $0x98] sm:$0xff]   ;;  %6158 = vmatprep.subr.bf16.mxu1 %v6707_v15 }
0x15db   :  { %2485 = vadd.xlane.f32.xlu0 %v2484_v38  ;;  %6135 = vmatpush3.bf16.msra.mxu0 %v6523_v24  ;;  %v7553_v24 = vld [vmem:[%s8082_s26] ss:$0 sm:$0xff] }
0x15dc   :  { %v2487_v63 = vsel %vm83_vm0, %v2481_v62, 0.0  ;;  %6140 = vmatprep.subr.bf16.mxu0 %v6707_v15 }
0x15dd   :  { %2488 = vadd.xlane.f32.xlu1 %v2487_v63  ;;  %6159 = vmatpush3.bf16.msra.mxu1 %v6524_v19 }
0x15de   :  { %6170 = vmatprep.subr.bf16.mxu1 %v6707_v15 }
0x1668   :  { %v2486_v0 = vpop.xlane.xlu0 %2485 }
0x1669   :  { %v2490_v1 = vmul.f32 0.015625, %v2486_v0 }
0x166a   :  { %v2489_v2 = vpop.xlane.xlu1 %2488 }
0x166b   :  { %v2492_v3 = vsub.f32 %v2480_v37, %v2490_v1  ;;  %v2491_v4 = vmul.f32 0.015625, %v2489_v2 }
0x166d   :  { %v2493_v5 = vsub.f32 %v2481_v62, %v2491_v4  ;;  %v2494_v6 = vmul.f32 %v2492_v3, %v2492_v3 }
0x166f   :  { %v2496_v7 = vsel %vm83_vm0, %v2494_v6, 0.0  ;;  %v2495_v8 = vmul.f32 %v2493_v5, %v2493_v5  ;;  %v6529_v6 = vld [vmem:[%s8075_s0 + $0xa0] sm:$0xff]  }
0x1670   :  { %2497 = vadd.xlane.f32.xlu0 %v2496_v7 }
0x1671   :  { %v2499_v9 = vsel %vm83_vm0, %v2495_v8, 0.0  ;;  %v6530_v8 = vld [vmem:[%s8075_s0 + $0xa8] sm:$0xff]  }
0x1672   :  { %2500 = vadd.xlane.f32.xlu1 %v2499_v9  ;;  %v6531_v9 = vld [vmem:[%s8075_s0 + $0xb0] sm:$0xff]  }
0x16fd   :  { %v2498_v21 = vpop.xlane.xlu0 %2497 }
0x16fe   :  { %v2502_v51 = vmul.f32 0.015625, %v2498_v21 }
0x16ff   :  { %v2501_v11 = vpop.xlane.xlu1 %2500 }
0x1700   :  { %v2504_v12 = vadd.f32 1e-12, %v2502_v51  ;;  %v2503_v23 = vmul.f32 0.015625, %v2501_v11 }
0x1702   :  { %6633 = vrsqrt.f32 %v2504_v12  ;;  %v2505_v25 = vadd.f32 1e-12, %v2503_v23 }
0x1704   :  { %6635 = vrsqrt.f32 %v2505_v25  ;;  %v7560_v25 = vld [vmem:[%s8082_s26 + $0x1] ss:$0 sm:$0xff] }
0x170c   :  { %v6634_v27 = vpop.eup %6633 }
0x170d   :  { %v2508_v29 = vmul.f32 %v6634_v27, %v2492_v3 }
0x170e   :  { %v6636_v30 = vpop.eup %6635 }
0x170f   :  { %v2516_v31 = vmul.f32 %v5317_v28, %v2508_v29  ;;  %v2509_v32 = vmul.f32 %v6636_v30, %v2493_v5 }
0x1711   :  { %v2517_v35 = vmul.f32 %v5317_v28, %v2509_v32  ;;  %v7451_v36 = vadd.f32 %v5318_v34, %v2516_v31 }
0x1713   :  { %v7453_v39 = vadd.f32 %v5318_v34, %v2517_v35 }
0x1715   :  { %v7460_v42 = vpack.c.bf16 %v7453_v39, %v7451_v36 }
0x1717   :  { %6137 = vmatmul.mubr.msk.bf16.vlgmr.msra.gmra.mrb[60].mxu0 %vm83_vm0, %v7460_v42  ;;  %6161 = vmatmul.mubr.msk.bf16.vlgmr.msra.gmra.mrb[76].mxu1 %vm83_vm0, %v7460_v42 }
0x1718   :  { %6141 = vmatpush3.bf16.msra.mxu0 %v6525_v41  ;;  %6148 = vmatprep.mubr.msk.bf16.mxu0 %vm6708_vm1, %v6707_v15 }
0x1719   :  { %6142 = vmatprep.subr.bf16.mxu0 %v6707_v15  ;;  %6172 = vmatprep.mubr.msk.bf16.mxu1 %vm6708_vm1, %v6707_v15 }
0x171c   :  { %6143 = vmatpush3.bf16.msra.mxu0 %v6526_v16 }
0x171d   :  { %6144 = vmatprep.subr.bf16.mxu0 %v6707_v15 }
0x1720   :  { %6145 = vmatpush3.bf16.msra.mxu0 %v6527_v43 }
0x1721   :  { %6146 = vmatprep.subr.bf16.mxu0 %v6707_v15 }
0x1724   :  { %6147 = vmatpush3.bf16.msra.mxu0 %v6528_v44  ;;  %v7573_v44 = vld [vmem:[%s8042_s9 + $0x5] ss:$0 sm:$0xff] }
0x1725   :  { %6164 = vmatprep.subr.bf16.mxu0 %v6707_v15 }
0x1727   :  { %6149 = vmatmul.mubr.msk.bf16.vlgmr.msra.gmra.mrb[64].mxu0 %vm83_vm0, %v7460_v42 }
0x1728   :  { %6166 = vmatprep.mubr.msk.bf16.mxu0 %vm6708_vm1, %v6707_v15 }
0x17ea   :  { %v2605_v18 = vpop.f32.mrb[60].mxu0  ;;  %v2769_v20 = vpop.f32.mrb[76].mxu1 }
0x17eb   :  { %v2770_v22 = vadd.f32 %v5358_v58, %v2769_v20  ;;  %v6138_v45 = vpop.f32.mrb[61].mxu0  ;;  %v6162_v61 = vpop.f32.mrb[77].mxu1  ;;  %v2606_v60 = vadd.f32 %v5328_v54, %v2605_v18 }
0x17ec   :  { %v2608_v46 = vpop.f32.mrb[62].mxu0  ;;  %v2772_v47 = vpop.f32.mrb[78].mxu1 }
0x17ed   :  { %v2837_v48 = vpack.c.bf16 %v2770_v22, %v2770_v22  ;;  %v7490_v49 = vadd.f32 %v5358_v58, %v2772_v47  ;;  %v6139_v50 = vpop.f32.mrb[63].mxu0  ;;  %v6163_v52 = vpop.f32.mrb[79].mxu1  ;;  %v2776_v0 = vmul.f32 0.25, %v2606_v60  ;;  %v2609_v3 = vadd.f32 %v5328_v54, %v2608_v46 }
0x17ef   :  { %v2842_v53 = vsel %vm445_vm3, %v2837_v48, 0  ;;  %v2777_v2 = vpack.c.bf16 %v2776_v0, %v2776_v0  ;;  %v2884_v5 = vmul.f32 0.25, %v2609_v3 }
0x17f0   :  { %6171 = vmatpush3.bf16.msra.mxu1 %v2842_v53 }
0x17f1   :  { %6182 = vmatprep.subr.bf16.mxu1 %v6707_v15  ;;  %v2885_v7 = vpack.c.bf16 %v2884_v5, %v2884_v5 }
0x17fa   :  { %v2687_v56 = vpop.f32.mrb[64].mxu0 }
0x17fb   :  { %v2688_v57 = vadd.f32 %v5343_v33, %v2687_v56  ;;  %v6150_v59 = vpop.f32.mrb[65].mxu0 }
0x17fc   :  { %v2690_v40 = vpop.f32.mrb[66].mxu0  ;;  %v2945_v59 = vpack.c.bf16 %v7490_v49, %v7490_v49  ;;  %v6538_v49 = vld [vmem:[%s8076_s3 + $0xa8] sm:$0xff]  }
0x17fd   :  { %v2778_v37 = vpack.c.bf16 %v2688_v57, %v2688_v57  ;;  %v6151_v38 = vpop.f32.mrb[67].mxu0  ;;  %v2691_v63 = vadd.f32 %v5343_v33, %v2690_v40 }
0x17ff   :  { %v2783_v62 = vsel %vm381_vm2, %v2778_v37, 0  ;;  %v2886_v1 = vpack.c.bf16 %v2691_v63, %v2691_v63  ;;  %v2950_v37 = vsel %vm445_vm3, %v2945_v59, 0  ;;  %v6537_v63 = vld [vmem:[%s8076_s3 + $0xa0] sm:$0xff]  }
0x1800   :  { %6165 = vmatpush3.bf16.xpose.msra.mxu0 %v2783_v62 }
0x1801   :  { %6176 = vmatprep.subr.bf16.mxu0 %v6707_v15  ;;  %v2891_v4 = vsel %vm381_vm2, %v2886_v1, 0  ;;  %v6539_v1 = vld [vmem:[%s8076_s3 + $0xb0] sm:$0xff]  }
0x1807   :  { %6167 = vmatmul.mubr.msk.bf16.vlgmr.msra.gmra.mrb[68].mxu0 %vm381_vm2, %v2777_v2  ;;  %v6540_v2 = vld [vmem:[%s8076_s3 + $0xb8] sm:$0xff]  }
0x1808   :  { %6177 = vmatpush3.bf16.xpose.msra.mxu0 %v2891_v4  ;;  %6178 = vmatprep.mubr.msk.bf16.mxu0 %vm6708_vm1, %v6707_v15 }
0x1809   :  { %6188 = vmatprep.subr.bf16.mxu0 %v6707_v15 }
0x180f   :  { %6179 = vmatmul.mubr.msk.bf16.vlgmr.msra.gmra.mrb[72].mxu0 %vm381_vm2, %v2885_v7 }
0x1810   :  { %6189 = vmatpush3.bf16.msra.mxu0 %v6529_v6  ;;  %6196 = vmatprep.mubr.msk.bf16.mxu0 %vm6708_vm1, %v6707_v15 }
0x1811   :  { %6190 = vmatprep.subr.bf16.mxu0 %v6707_v15 }
0x1814   :  { %6191 = vmatpush3.bf16.msra.mxu0 %v6530_v8 }
0x1815   :  { %6192 = vmatprep.subr.bf16.mxu0 %v6707_v15 }
0x1818   :  { %6193 = vmatpush3.bf16.msra.mxu0 %v6531_v9 }
0x1819   :  { %6194 = vmatprep.subr.bf16.mxu0 %v6707_v15 }
0x181c   :  { %6195 = vmatpush3.bf16.msra.mxu0 %v6532_v10 }
0x181d   :  { %6212 = vmatprep.subr.bf16.mxu0 %v6707_v15 }
0x181f   :  { %6197 = vmatmul.mubr.msk.bf16.vlgmr.msra.gmra.mrb[76].mxu0 %vm83_vm0, %v7460_v42 }
0x1820   :  { %6213 = vmatpush3.bf16.msra.mxu0 %v6533_v26  ;;  %6220 = vmatprep.mubr.msk.bf16.mxu0 %vm6708_vm1, %v6707_v15 }
0x1821   :  { %6214 = vmatprep.subr.bf16.mxu0 %v6707_v15 }
0x1824   :  { %6215 = vmatpush3.bf16.msra.mxu0 %v6534_v13  ;;  %v5394_v13 = vld [vmem:[%s8080_s6 + $0x5] ss:$0 sm:$0xff] }
0x1825   :  { %6216 = vmatprep.subr.bf16.mxu0 %v6707_v15 }
0x1828   :  { %6217 = vmatpush3.bf16.msra.mxu0 %v6535_v14  ;;  %v5379_v14 = vld [vmem:[%s8081_s7 + $0x5] ss:$0 sm:$0xff] }
0x1829   :  { %6218 = vmatprep.subr.bf16.mxu0 %v6707_v15 }
0x182c   :  { %6219 = vmatpush3.bf16.msra.mxu0 %v6536_v55 }
0x182d   :  { %6236 = vmatprep.subr.bf16.mxu0 %v6707_v15 }
0x182f   :  { %6221 = vmatmul.mubr.msk.bf16.vlgmr.msra.gmra.mrb[80].mxu0 %vm83_vm0, %v7460_v42 }
0x1830   :  { %6238 = vmatprep.mubr.msk.bf16.mxu0 %vm6708_vm1, %v6707_v15 }
0x18da   :  { %v2819_v17 = vpop.f32.mrb[68].mxu0 }
0x18db   :  { %v2820_v19 = vadd.f32 %v7553_v24, %v2819_v17  ;;  %v6168_v21 = vpop.f32.mrb[69].mxu0 }
0x18dc   :  { %v2822_v51 = vpop.f32.mrb[70].mxu0 }
0x18dd   :  { %v6169_v11 = vpop.f32.mrb[71].mxu0  ;;  %v2825_v12 = vsel %vm428_vm4, %v2820_v19, -inf }
0x18de   :  { %2826 = vmax.xlane.f32.xlu0 %v2825_v12 }
0x18e2   :  { %v2927_v23 = vpop.f32.mrb[72].mxu0 }
0x18e3   :  { %v2928_v27 = vadd.f32 %v7560_v25, %v2927_v23  ;;  %v6180_v28 = vpop.f32.mrb[73].mxu0 }
0x18e4   :  { %v2930_v29 = vpop.f32.mrb[74].mxu0 }
0x18e5   :  { %v6181_v30 = vpop.f32.mrb[75].mxu0  ;;  %v2933_v31 = vsel %vm428_vm4, %v2928_v27, -inf }
0x18e6   :  { %2934 = vmax.xlane.f32.xlu1 %v2933_v31 }
0x18f2   :  { %v7564_v32 = vpop.f32.mrb[76].mxu0 }
0x18f3   :  { %v6198_v34 = vpop.f32.mrb[77].mxu0  ;;  %v3072_v51 = vadd.f32 %v5379_v14, %v7564_v32 }
0x18f4   :  { %v7566_v35 = vpop.f32.mrb[78].mxu0 }
0x18f5   :  { %v6199_v41 = vpop.f32.mrb[79].mxu0  ;;  %v3242_v31 = vmul.f32 0.25, %v3072_v51  ;;  %v6547_v51 = vld [vmem:[%s8075_s0 + $0xc0] sm:$0xff]  }
0x1902   :  { %v7568_v16 = vpop.f32.mrb[80].mxu0 }
0x1903   :  { %v6222_v43 = vpop.f32.mrb[81].mxu0  ;;  %v3236_v28 = vadd.f32 %v7573_v44, %v7568_v16 }
0x1904   :  { %v3238_v58 = vpop.f32.mrb[82].mxu0  ;;  %v3243_v43 = vpack.c.bf16 %v3242_v31, %v3242_v31 }
0x1905   :  { %v7576_v18 = vadd.f32 %v7573_v44, %v3238_v58  ;;  %v6223_v20 = vpop.f32.mrb[83].mxu0  ;;  %v3303_v32 = vpack.c.bf16 %v3236_v28, %v3236_v28  ;;  %v6548_v28 = vld [vmem:[%s8075_s0 + $0xc8] sm:$0xff]  }
0x196b   :  { %v2827_v22 = vpop.xlane.xlu0 %2826 }
0x196c   :  { %v2828_v45 = vsub.f32 %v2820_v19, %v2827_v22 }
0x196e   :  { %v2829_v61 = vmul.f32 1.442695, %v2828_v45 }
0x1970   :  { %6637 = vpow2.f32 %v2829_v61 }
0x1973   :  { %v2935_v46 = vpop.xlane.xlu1 %2934 }
0x1974   :  { %v2936_v47 = vsub.f32 %v2928_v27, %v2935_v46  ;;  %v3075_v27 = vadd.f32 %v5379_v14, %v7566_v35  ;;  %v3308_v35 = vsel %vm445_vm3, %v3303_v32, 0  ;;  %v6544_v14 = vld [vmem:[%s8076_s3 + $0xd0] sm:$0xff]   ;;  %v6550_v32 = vld [vmem:[%s8075_s0 + $0xd8] sm:$0xff]  }
0x1976   :  { %v2937_v48 = vmul.f32 1.442695, %v2936_v47  ;;  %v3350_v41 = vmul.f32 0.25, %v3075_v27 }
0x1978   :  { %6639 = vpow2.f32 %v2937_v48  ;;  %v3351_v58 = vpack.c.bf16 %v3350_v41, %v3350_v41 }
0x197a   :  { %v6638_v50 = vpop.eup %6637 }
0x197b   :  { %v2831_v52 = vsel %vm428_vm4, %v6638_v50, 0.0 }
0x197c   :  { %2832 = vadd.xlane.f32.xlu0 %v2831_v52 }
0x1982   :  { %v6640_v53 = vpop.eup %6639 }
0x1983   :  { %v2939_v33 = vsel %vm428_vm4, %v6640_v53, 0.0 }
0x1984   :  { %2940 = vadd.xlane.f32.xlu1 %v2939_v33 }
0x1a09   :  { %v2833_v54 = vpop.xlane.xlu0 %2832 }
0x1a0a   :  { %6641 = vrcp.f32 %v2833_v54 }
0x1a11   :  { %v2941_v56 = vpop.xlane.xlu1 %2940 }
0x1a12   :  { %6643 = vrcp.f32 %v2941_v56 }
0x1a14   :  { %v6642_v57 = vpop.eup %6641 }
0x1a15   :  { %v2835_v40 = vmul.f32 %v6642_v57, %v6638_v50 }
0x1a17   :  { %v2836_v60 = vpack.c.bf16 %v2835_v40, %v2835_v40 }
0x1a19   :  { %6173 = vmatmul.mubr.msk.bf16.vlgmr.msra.gmra.mrb[80].mxu1 %vm428_vm4, %v2836_v60 }
0x1a1a   :  { %6183 = vmatpush3.bf16.msra.mxu1 %v2950_v37  ;;  %6184 = vmatprep.mubr.msk.bf16.mxu1 %vm6708_vm1, %v6707_v15 }
0x1a1b   :  { %6200 = vmatprep.subr.bf16.mxu1 %v6707_v15 }
0x1a1c   :  { %v6644_v38 = vpop.eup %6643 }
0x1a1d   :  { %v2943_v62 = vmul.f32 %v6644_v38, %v6640_v53 }
0x1a1f   :  { %v2944_v0 = vpack.c.bf16 %v2943_v62, %v2943_v62 }
0x1a21   :  { %6185 = vmatmul.mubr.msk.bf16.vlgmr.msra.gmra.mrb[84].mxu1 %vm428_vm4, %v2944_v0 }
0x1a22   :  { %6201 = vmatpush3.bf16.msra.mxu1 %v6537_v63  ;;  %6208 = vmatprep.mubr.msk.bf16.mxu1 %vm6708_vm1, %v6707_v15 }
0x1a23   :  { %6202 = vmatprep.subr.bf16.mxu1 %v6707_v15 }
0x1a26   :  { %6203 = vmatpush3.bf16.msra.mxu1 %v6538_v49 }
0x1a27   :  { %6204 = vmatprep.subr.bf16.mxu1 %v6707_v15 }
0x1a2a   :  { %6205 = vmatpush3.bf16.msra.mxu1 %v6539_v1  ;;  %v3411_v1 = vpack.c.bf16 %v7576_v18, %v7576_v18  ;;  %v6542_v18 = vld [vmem:[%s8076_s3 + $0xc0] sm:$0xff]  }
0x1a2b   :  { %6206 = vmatprep.subr.bf16.mxu1 %v6707_v15 }
0x1a2e   :  { %6207 = vmatpush3.bf16.msra.mxu1 %v6540_v2 }
0x1a2f   :  { %6224 = vmatprep.subr.bf16.mxu1 %v6707_v15 }
0x1a31   :  { %6209 = vmatmul.mubr.msk.bf16.vlgmr.msra.gmra.mrb[88].mxu1 %vm83_vm0, %v7460_v42 }
0x1a32   :  { %6226 = vmatprep.mubr.msk.bf16.mxu1 %vm6708_vm1, %v6707_v15 }
0x1aec   :  { %v7610_v3 = vpop.f32.mrb[80].mxu1 }
0x1aed   :  { %v6174_v4 = vpop.f32.mrb[81].mxu1 }
0x1aee   :  { %v2881_v5 = vpop.f32.mrb[82].mxu1 }
0x1aef   :  { %v6175_v6 = vpop.f32.mrb[83].mxu1 }
0x1af0   :  { %v3416_v6 = vsel %vm445_vm3, %v3411_v1, 0 }
0x1af4   :  { %v7612_v7 = vpop.f32.mrb[84].mxu1 }
0x1af5   :  { %v2992_v8 = vpack.c.bf16 %v7612_v7, %v7610_v3  ;;  %v6186_v9 = vpop.f32.mrb[85].mxu1  ;;  %v6545_v3 = vld [vmem:[%s8076_s3 + $0xd8] sm:$0xff]   ;;  %v6546_v7 = vld [vmem:[%s8043_s10 + $0x28] sm:$0xff]  }
0x1af6   :  { %v2989_v10 = vpop.f32.mrb[86].mxu1 }
0x1af7   :  { %v6187_v26 = vpop.f32.mrb[87].mxu1  ;;  %v6541_v10 = vld [vmem:[%s8043_s10 + $0x20] sm:$0xff]  }
0x1b04   :  { %v3153_v55 = vpop.f32.mrb[88].mxu1 }
0x1b05   :  { %v3154_v17 = vadd.f32 %v5394_v13, %v3153_v55  ;;  %v6210_v19 = vpop.f32.mrb[89].mxu1 }
0x1b06   :  { %v3156_v21 = vpop.f32.mrb[90].mxu1 }
0x1b07   :  { %v3244_v11 = vpack.c.bf16 %v3154_v17, %v3154_v17  ;;  %v3157_v12 = vadd.f32 %v5394_v13, %v3156_v21  ;;  %v6211_v23 = vpop.f32.mrb[91].mxu1  ;;  %v6543_v13 = vld [vmem:[%s8076_s3 + $0xc8] sm:$0xff]  }
0x1b09   :  { %v3249_v29 = vsel %vm381_vm2, %v3244_v11, 0  ;;  %v3352_v30 = vpack.c.bf16 %v3157_v12, %v3157_v12 }
0x1b0a   :  { %6225 = vmatpush3.bf16.xpose.msra.mxu1 %v3249_v29 }
0x1b0b   :  { %v3357_v34 = vsel %vm381_vm2, %v3352_v30, 0  ;;  %6230 = vmatprep.subr.bf16.mxu1 %v6707_v15  ;;  %v6549_v30 = vld [vmem:[%s8075_s0 + $0xd0] sm:$0xff]  }
0x1b0c   :  { %6237 = vmatpush3.bf16.xpose.msra.mxu0 %v3357_v34 }
0x1b0d   :  { %6248 = vmatprep.subr.bf16.mxu0 %v6707_v15 }
0x1b11   :  { %6227 = vmatmul.mubr.msk.bf16.vlgmr.msra.gmra.mrb[92].mxu1 %vm381_vm2, %v3243_v43  ;;  %v6551_v43 = vld [vmem:[%s8079_s28 + $0xc0] sm:$0xff]  }
0x1b12   :  { %6231 = vmatpush3.bf16.msra.mxu1 %v3308_v35  ;;  %6232 = vmatprep.mubr.msk.bf16.mxu1 %vm6708_vm1, %v6707_v15  ;;  %v5449_v35 = vld [vmem:[%s8080_s6 + $0x6] ss:$0 sm:$0xff] }
0x1b13   :  { %6239 = vmatmul.mubr.msk.bf16.vlgmr.msra.gmra.mrb[84].mxu0 %vm381_vm2, %v3351_v58  ;;  %6242 = vmatprep.subr.bf16.mxu1 %v6707_v15  ;;  %v6552_v58 = vld [vmem:[%s8079_s28 + $0xc8] sm:$0xff]  }
0x1b14   :  { %6250 = vmatprep.mubr.msk.bf16.mxu0 %vm6708_vm1, %v6707_v15  ;;  %6249 = vmatpush3.bf16.msra.mxu0 %v6546_v7 }
0x1b15   :  { %6260 = vmatprep.subr.bf16.mxu0 %v6707_v15 }
0x1be4   :  { %v3285_v16 = vpop.f32.mrb[92].mxu1 }
0x1be5   :  { %v3286_v44 = vadd.f32 %v7553_v24, %v3285_v16  ;;  %v6228_v20 = vpop.f32.mrb[93].mxu1 }
0x1be6   :  { %v3288_v22 = vpop.f32.mrb[94].mxu1  ;;  %v3393_v45 = vpop.f32.mrb[84].mxu0 }
0x1be7   :  { %v3394_v61 = vadd.f32 %v7560_v25, %v3393_v45  ;;  %v6229_v46 = vpop.f32.mrb[95].mxu1  ;;  %v6240_v47 = vpop.f32.mrb[85].mxu0  ;;  %v3291_v48 = vsel %vm428_vm4, %v3286_v44, -inf }
0x1be8   :  { %3292 = vmax.xlane.f32.xlu0 %v3291_v48  ;;  %v3396_v50 = vpop.f32.mrb[86].mxu0  ;;  %v6554_v47 = vld [vmem:[%s8079_s28 + $0xd8] sm:$0xff]  }
0x1be9   :  { %v6241_v52 = vpop.f32.mrb[87].mxu0  ;;  %v3399_v53 = vsel %vm428_vm4, %v3394_v61, -inf }
0x1bea   :  { %3400 = vmax.xlane.f32.xlu1 %v3399_v53 }
0x1c75   :  { %v3293_v33 = vpop.xlane.xlu0 %3292 }
0x1c76   :  { %v3294_v54 = vsub.f32 %v3286_v44, %v3293_v33  ;;  %v6553_v44 = vld [vmem:[%s8079_s28 + $0xd0] sm:$0xff]  }
0x1c77   :  { %v3401_v56 = vpop.xlane.xlu1 %3400 }
0x1c78   :  { %v3295_v57 = vmul.f32 1.442695, %v3294_v54  ;;  %v3402_v59 = vsub.f32 %v3394_v61, %v3401_v56 }
0x1c7a   :  { %6645 = vpow2.f32 %v3295_v57  ;;  %v3403_v40 = vmul.f32 1.442695, %v3402_v59 }
0x1c7c   :  { %6647 = vpow2.f32 %v3403_v40 }
0x1c84   :  { %v6646_v60 = vpop.eup %6645 }
0x1c85   :  { %v3297_v37 = vsel %vm428_vm4, %v6646_v60, 0.0 }
0x1c86   :  { %v6648_v38 = vpop.eup %6647  ;;  %3298 = vadd.xlane.f32.xlu0 %v3297_v37 }
0x1c87   :  { %v3405_v62 = vsel %vm428_vm4, %v6648_v38, 0.0 }
0x1c88   :  { %3406 = vadd.xlane.f32.xlu1 %v3405_v62 }
0x1d13   :  { %v3299_v63 = vpop.xlane.xlu0 %3298 }
0x1d14   :  { %6649 = vrcp.f32 %v3299_v63 }
0x1d15   :  { %v3407_v0 = vpop.xlane.xlu1 %3406 }
0x1d16   :  { %6651 = vrcp.f32 %v3407_v0 }
0x1d1e   :  { %v6650_v49 = vpop.eup %6649 }
0x1d1f   :  { %v3301_v2 = vmul.f32 %v6650_v49, %v6646_v60  ;;  %v5434_v60 = vld [vmem:[%s8081_s7 + $0x6] ss:$0 sm:$0xff] }
0x1d20   :  { %v6652_v5 = vpop.eup %6651 }
0x1d21   :  { %v3302_v4 = vpack.c.bf16 %v3301_v2, %v3301_v2  ;;  %v3409_v9 = vmul.f32 %v6652_v5, %v6648_v38 }
0x1d23   :  { %6233 = vmatmul.mubr.msk.bf16.vlgmr.msra.gmra.mrb[96].mxu1 %vm428_vm4, %v3302_v4  ;;  %v3410_v26 = vpack.c.bf16 %v3409_v9, %v3409_v9 }
0x1d24   :  { %6243 = vmatpush3.bf16.msra.mxu1 %v3416_v6  ;;  %6244 = vmatprep.mubr.msk.bf16.mxu1 %vm6708_vm1, %v6707_v15  ;;  %v5464_v6 = vld [vmem:[%s8042_s9 + $0x6] ss:$0 sm:$0xff] }
0x1d25   :  { %6254 = vmatprep.subr.bf16.mxu1 %v6707_v15 }
0x1d2b   :  { %6245 = vmatmul.mubr.msk.bf16.vlgmr.msra.gmra.mrb[100].mxu1 %vm428_vm4, %v3410_v26 }
0x1d2c   :  { %6255 = vmatpush3.bf16.msra.mxu1 %v6541_v10  ;;  %6256 = vmatprep.mubr.msk.bf16.mxu1 %vm6708_vm1, %v6707_v15 }
0x1d2d   :  { %6272 = vmatprep.subr.bf16.mxu1 %v6707_v15 }
0x1d33   :  { %6257 = vmatmul.mubr.msk.bf16.vlgmr.msra.gmra.mrb[104].mxu1 %vm381_vm2, %v2992_v8 }
0x1d34   :  { %6273 = vmatpush3.bf16.msra.mxu1 %v6542_v18  ;;  %6280 = vmatprep.mubr.msk.bf16.mxu1 %vm6708_vm1, %v6707_v15 }
0x1d35   :  { %6274 = vmatprep.subr.bf16.mxu1 %v6707_v15 }
0x1d38   :  { %6275 = vmatpush3.bf16.msra.mxu1 %v6543_v13 }
0x1d39   :  { %6276 = vmatprep.subr.bf16.mxu1 %v6707_v15 }
0x1d3c   :  { %6277 = vmatpush3.bf16.msra.mxu1 %v6544_v14 }
0x1d3d   :  { %6278 = vmatprep.subr.bf16.mxu1 %v6707_v15 }
0x1d40   :  { %6279 = vmatpush3.bf16.msra.mxu1 %v6545_v3 }
0x1d41   :  { %6296 = vmatprep.subr.bf16.mxu1 %v6707_v15 }
0x1d43   :  { %6281 = vmatmul.mubr.msk.bf16.vlgmr.msra.gmra.mrb[108].mxu1 %vm83_vm0, %v7460_v42 }
0x1d44   :  { %6298 = vmatprep.mubr.msk.bf16.mxu1 %vm6708_vm1, %v6707_v15 }
0x1df6   :  { %v3344_v8 = vpop.f32.mrb[96].mxu1 }
0x1df7   :  { %v6234_v55 = vpop.f32.mrb[97].mxu1 }
0x1df8   :  { %v3347_v17 = vpop.f32.mrb[98].mxu1 }
0x1df9   :  { %v6235_v19 = vpop.f32.mrb[99].mxu1 }
0x1dfe   :  { %v3452_v21 = vpop.f32.mrb[100].mxu1 }
0x1dff   :  { %v3458_v11 = vpack.c.bf16 %v3452_v21, %v3344_v8  ;;  %v6246_v12 = vpop.f32.mrb[101].mxu1 }
0x1e00   :  { %v3455_v23 = vpop.f32.mrb[102].mxu1 }
0x1e01   :  { %v6247_v27 = vpop.f32.mrb[103].mxu1  ;;  %6251 = vmatmul.mubr.msk.bf16.vlgmr.msra.gmra.mrb[88].mxu0 %vm381_vm2, %v3458_v11 }
0x1e02   :  { %6261 = vmatpush3.bf16.msra.mxu0 %v6547_v51  ;;  %6268 = vmatprep.mubr.msk.bf16.mxu0 %vm6708_vm1, %v6707_v15 }
0x1e03   :  { %6262 = vmatprep.subr.bf16.mxu0 %v6707_v15 }
0x1e06   :  { %6263 = vmatpush3.bf16.msra.mxu0 %v6548_v28  ;;  %v3555_v29 = vpop.f32.mrb[104].mxu1 }
0x1e07   :  { %v6258_v31 = vpop.f32.mrb[105].mxu1  ;;  %6264 = vmatprep.subr.bf16.mxu0 %v6707_v15 }
0x1e08   :  { %v3558_v34 = vpop.f32.mrb[106].mxu1 }
0x1e09   :  { %v6259_v41 = vpop.f32.mrb[107].mxu1 }
0x1e0a   :  { %6265 = vmatpush3.bf16.msra.mxu0 %v6549_v30 }
0x1e0b   :  { %6266 = vmatprep.subr.bf16.mxu0 %v6707_v15 }
0x1e0e   :  { %6267 = vmatpush3.bf16.msra.mxu0 %v6550_v32 }
0x1e0f   :  { %6284 = vmatprep.subr.bf16.mxu0 %v6707_v15 }
0x1e11   :  { %6269 = vmatmul.mubr.msk.bf16.vlgmr.msra.gmra.mrb[92].mxu0 %vm83_vm0, %v7460_v42 }
0x1e12   :  { %6285 = vmatpush3.bf16.msra.mxu0 %v6551_v43  ;;  %6292 = vmatprep.mubr.msk.bf16.mxu0 %vm6708_vm1, %v6707_v15 }
0x1e13   :  { %6286 = vmatprep.subr.bf16.mxu0 %v6707_v15 }
0x1e16   :  { %v3719_v16 = vpop.f32.mrb[108].mxu1  ;;  %6287 = vmatpush3.bf16.msra.mxu0 %v6552_v58 }
0x1e17   :  { %v3720_v20 = vadd.f32 %v5449_v35, %v3719_v16  ;;  %v6282_v22 = vpop.f32.mrb[109].mxu1  ;;  %6288 = vmatprep.subr.bf16.mxu0 %v6707_v15 }
0x1e18   :  { %v3722_v45 = vpop.f32.mrb[110].mxu1 }
0x1e19   :  { %v3810_v61 = vpack.c.bf16 %v3720_v20, %v3720_v20  ;;  %v6283_v46 = vpop.f32.mrb[111].mxu1  ;;  %v3723_v50 = vadd.f32 %v5449_v35, %v3722_v45 }
0x1e1a   :  { %6289 = vmatpush3.bf16.msra.mxu0 %v6553_v44 }
0x1e1b   :  { %v3815_v48 = vsel %vm381_vm2, %v3810_v61, 0  ;;  %6290 = vmatprep.subr.bf16.mxu0 %v6707_v15  ;;  %v3918_v52 = vpack.c.bf16 %v3723_v50, %v3723_v50 }
0x1e1c   :  { %6297 = vmatpush3.bf16.xpose.msra.mxu1 %v3815_v48 }
0x1e1d   :  { %6302 = vmatprep.subr.bf16.mxu1 %v6707_v15  ;;  %v3923_v53 = vsel %vm381_vm2, %v3918_v52, 0 }
0x1e1e   :  { %6291 = vmatpush3.bf16.msra.mxu0 %v6554_v47 }
0x1e1f   :  { %6308 = vmatprep.subr.bf16.mxu0 %v6707_v15 }
0x1e21   :  { %6293 = vmatmul.mubr.msk.bf16.vlgmr.msra.gmra.mrb[96].mxu0 %vm83_vm0, %v7460_v42 }
0x1e22   :  { %6310 = vmatprep.mubr.msk.bf16.mxu0 %vm6708_vm1, %v6707_v15 }
0x1e27   :  { %6309 = vmatpush3.bf16.xpose.msra.mxu0 %v3923_v53  ;;  %v6555_v53 = vld [vmem:[%s8075_s0 + $0xe0] sm:$0xff]  }
0x1e28   :  { %6320 = vmatprep.subr.bf16.mxu0 %v6707_v15 }
0x1ed4   :  { %v3505_v33 = vpop.f32.mrb[88].mxu0 }
0x1ed5   :  { %v7738_v54 = vadd.f32 %v3555_v29, %v3505_v33  ;;  %v6252_v56 = vpop.f32.mrb[89].mxu0 }
0x1ed6   :  { %v3508_v57 = vpop.f32.mrb[90].mxu0  ;;  %v6556_v56 = vld [vmem:[%s8075_s0 + $0xe8] sm:$0xff]  }
0x1ed7   :  { %v7740_v59 = vadd.f32 %v3558_v34, %v3508_v57  ;;  %v6253_v40 = vpop.f32.mrb[91].mxu0  ;;  %v6557_v57 = vld [vmem:[%s8075_s0 + $0xf0] sm:$0xff]  }
0x1ed8   :  { %v6558_v40 = vld [vmem:[%s8075_s0 + $0xf8] sm:$0xff]  }
0x1ee4   :  { %v3637_v37 = vpop.f32.mrb[92].mxu0 }
0x1ee5   :  { %v3638_v38 = vadd.f32 %v5434_v60, %v3637_v37  ;;  %v6270_v62 = vpop.f32.mrb[93].mxu0  ;;  %v6560_v37 = vld [vmem:[%s8079_s28 + $0xe8] sm:$0xff]  }
0x1ee6   :  { %v3640_v63 = vpop.f32.mrb[94].mxu0  ;;  %v6562_v62 = vld [vmem:[%s8079_s28 + $0xf8] sm:$0xff]  }
0x1ee7   :  { %v3808_v0 = vmul.f32 0.25, %v3638_v38  ;;  %v3641_v49 = vadd.f32 %v5434_v60, %v3640_v63  ;;  %v6271_v1 = vpop.f32.mrb[95].mxu0  ;;  %v6559_v60 = vld [vmem:[%s8079_s28 + $0xe0] sm:$0xff]   ;;  %v6561_v38 = vld [vmem:[%s8079_s28 + $0xf0] sm:$0xff]  }
0x1ee8   :  { %v6563_v63 = vld [vmem:[%s8043_s10 + $0x30] sm:$0xff]  }
0x1ee9   :  { %v3809_v2 = vpack.c.bf16 %v3808_v0, %v3808_v0  ;;  %v3916_v4 = vmul.f32 0.25, %v3641_v49 }
0x1eeb   :  { %v3917_v5 = vpack.c.bf16 %v3916_v4, %v3916_v4  ;;  %6299 = vmatmul.mubr.msk.bf16.vlgmr.msra.gmra.mrb[112].mxu1 %vm381_vm2, %v3809_v2 }
0x1eec   :  { %6304 = vmatprep.mubr.msk.bf16.mxu1 %vm6708_vm1, %v6707_v15 }
0x1eed   :  { %6311 = vmatmul.mubr.msk.bf16.vlgmr.msra.gmra.mrb[100].mxu0 %vm381_vm2, %v3917_v5  ;;  %v6564_v5 = vld [vmem:[%s8076_s3 + $0xe0] sm:$0xff]  }
0x1eee   :  { %6322 = vmatprep.mubr.msk.bf16.mxu0 %vm6708_vm1, %v6707_v15  ;;  %6321 = vmatpush3.bf16.msra.mxu0 %v6563_v63 }
0x1eef   :  { %6338 = vmatprep.subr.bf16.mxu0 %v6707_v15 }
0x1ef4   :  { %v3801_v9 = vpop.f32.mrb[96].mxu0 }
0x1ef5   :  { %v3802_v10 = vadd.f32 %v5464_v6, %v3801_v9  ;;  %v6294_v26 = vpop.f32.mrb[97].mxu0 }
0x1ef6   :  { %v3804_v18 = vpop.f32.mrb[98].mxu0 }
0x1ef7   :  { %v3869_v13 = vpack.c.bf16 %v3802_v10, %v3802_v10  ;;  %v3805_v14 = vadd.f32 %v5464_v6, %v3804_v18  ;;  %v6295_v3 = vpop.f32.mrb[99].mxu0  ;;  %v6565_v18 = vld [vmem:[%s8076_s3 + $0xe8] sm:$0xff]  }
0x1ef9   :  { %v3874_v7 = vsel %vm445_vm3, %v3869_v13, 0  ;;  %v3977_v61 = vpack.c.bf16 %v3805_v14, %v3805_v14  ;;  %v6566_v13 = vld [vmem:[%s8076_s3 + $0xf0] sm:$0xff]   ;;  %v6567_v14 = vld [vmem:[%s8076_s3 + $0xf8] sm:$0xff]  }
0x1efa   :  { %6303 = vmatpush3.bf16.msra.mxu1 %v3874_v7 }
0x1efb   :  { %6314 = vmatprep.subr.bf16.mxu1 %v6707_v15  ;;  %v3982_v50 = vsel %vm445_vm3, %v3977_v61, 0 }
0x1fbe   :  { %v3851_v8 = vpop.f32.mrb[112].mxu1 }
0x1fbf   :  { %v3852_v55 = vadd.f32 %v7553_v24, %v3851_v8  ;;  %v6300_v17 = vpop.f32.mrb[113].mxu1 }
0x1fc0   :  { %v3854_v19 = vpop.f32.mrb[114].mxu1  ;;  %v3959_v21 = vpop.f32.mrb[100].mxu0 }
0x1fc1   :  { %v3960_v51 = vadd.f32 %v7560_v25, %v3959_v21  ;;  %v6301_v11 = vpop.f32.mrb[115].mxu1  ;;  %v6312_v12 = vpop.f32.mrb[101].mxu0  ;;  %v3857_v23 = vsel %vm428_vm4, %v3852_v55, -inf  ;;  %v5517_v21 = vld [vmem:[%s8042_s9 + $0x7] ss:$0 sm:$0xff] }
0x1fc2   :  { %3858 = vmax.xlane.f32.xlu0 %v3857_v23  ;;  %v3962_v27 = vpop.f32.mrb[102].mxu0 }
0x1fc3   :  { %v6313_v28 = vpop.f32.mrb[103].mxu0  ;;  %v3965_v29 = vsel %vm428_vm4, %v3960_v51, -inf }
0x1fc4   :  { %3966 = vmax.xlane.f32.xlu1 %v3965_v29 }
0x204f   :  { %v3859_v30 = vpop.xlane.xlu0 %3858 }
0x2050   :  { %v3860_v31 = vsub.f32 %v3852_v55, %v3859_v30 }
0x2051   :  { %v3967_v34 = vpop.xlane.xlu1 %3966 }
0x2052   :  { %v3861_v41 = vmul.f32 1.442695, %v3860_v31  ;;  %v3968_v32 = vsub.f32 %v3960_v51, %v3967_v34  ;;  %v5502_v31 = vld [vmem:[%s8080_s6 + $0x7] ss:$0 sm:$0xff] }
0x2053   :  { %v5487_v34 = vld [vmem:[%s8081_s7 + $0x7] ss:$0 sm:$0xff] }
0x2054   :  { %6653 = vpow2.f32 %v3861_v41  ;;  %v3969_v43 = vmul.f32 1.442695, %v3968_v32 }
0x2056   :  { %6655 = vpow2.f32 %v3969_v43 }
0x205e   :  { %v6654_v58 = vpop.eup %6653 }
0x205f   :  { %v3863_v35 = vsel %vm428_vm4, %v6654_v58, 0.0 }
0x2060   :  { %v6656_v16 = vpop.eup %6655  ;;  %3864 = vadd.xlane.f32.xlu0 %v3863_v35 }
0x2061   :  { %v3971_v44 = vsel %vm428_vm4, %v6656_v16, 0.0 }
0x2062   :  { %3972 = vadd.xlane.f32.xlu1 %v3971_v44 }
0x20ed   :  { %v3865_v20 = vpop.xlane.xlu0 %3864 }
0x20ee   :  { %6657 = vrcp.f32 %v3865_v20 }
0x20ef   :  { %v3973_v22 = vpop.xlane.xlu1 %3972 }
0x20f0   :  { %6659 = vrcp.f32 %v3973_v22 }
0x20f8   :  { %v6658_v45 = vpop.eup %6657 }
0x20f9   :  { %v3867_v46 = vmul.f32 %v6658_v45, %v6654_v58 }
0x20fa   :  { %v6660_v48 = vpop.eup %6659 }
0x20fb   :  { %v3868_v47 = vpack.c.bf16 %v3867_v46, %v3867_v46  ;;  %v3975_v52 = vmul.f32 %v6660_v48, %v6656_v16 }
0x20fd   :  { %6305 = vmatmul.mubr.msk.bf16.vlgmr.msra.gmra.mrb[116].mxu1 %vm428_vm4, %v3868_v47  ;;  %v3976_v33 = vpack.c.bf16 %v3975_v52, %v3975_v52 }
0x20fe   :  { %6315 = vmatpush3.bf16.msra.mxu1 %v3982_v50  ;;  %6316 = vmatprep.mubr.msk.bf16.mxu1 %vm6708_vm1, %v6707_v15 }
0x20ff   :  { %6326 = vmatprep.subr.bf16.mxu1 %v6707_v15 }
0x2105   :  { %6317 = vmatmul.mubr.msk.bf16.vlgmr.msra.gmra.mrb[120].mxu1 %vm428_vm4, %v3976_v33 }
0x2106   :  { %6327 = vmatpush3.bf16.msra.mxu1 %v6555_v53  ;;  %6334 = vmatprep.mubr.msk.bf16.mxu1 %vm6708_vm1, %v6707_v15 }
0x2107   :  { %6328 = vmatprep.subr.bf16.mxu1 %v6707_v15 }
0x210a   :  { %6329 = vmatpush3.bf16.msra.mxu1 %v6556_v56 }
0x210b   :  { %6330 = vmatprep.subr.bf16.mxu1 %v6707_v15 }
0x210e   :  { %6331 = vmatpush3.bf16.msra.mxu1 %v6557_v57 }
0x210f   :  { %6332 = vmatprep.subr.bf16.mxu1 %v6707_v15 }
0x2112   :  { %6333 = vmatpush3.bf16.msra.mxu1 %v6558_v40 }
0x2113   :  { %6350 = vmatprep.subr.bf16.mxu1 %v6707_v15 }
0x2115   :  { %6335 = vmatmul.mubr.msk.bf16.vlgmr.msra.gmra.mrb[124].mxu1 %vm83_vm0, %v7460_v42 }
0x2116   :  { %6351 = vmatpush3.bf16.msra.mxu1 %v6559_v60  ;;  %6358 = vmatprep.mubr.msk.bf16.mxu1 %vm6708_vm1, %v6707_v15 }
0x2117   :  { %6352 = vmatprep.subr.bf16.mxu1 %v6707_v15 }
0x211a   :  { %6353 = vmatpush3.bf16.msra.mxu1 %v6560_v37 }
0x211b   :  { %6354 = vmatprep.subr.bf16.mxu1 %v6707_v15 }
0x211e   :  { %6355 = vmatpush3.bf16.msra.mxu1 %v6561_v38 }
0x211f   :  { %6356 = vmatprep.subr.bf16.mxu1 %v6707_v15 }
0x2122   :  { %6357 = vmatpush3.bf16.msra.mxu1 %v6562_v62 }
0x2123   :  { %6374 = vmatprep.subr.bf16.mxu1 %v6707_v15 }
0x2125   :  { %6359 = vmatmul.mubr.msk.bf16.vlgmr.msra.gmra.mrb[128].mxu1 %vm83_vm0, %v7460_v42 }
0x2126   :  { %6376 = vmatprep.mubr.msk.bf16.mxu1 %vm6708_vm1, %v6707_v15 }
0x21d0   :  { %v3910_v0 = vpop.f32.mrb[116].mxu1 }
0x21d1   :  { %v6306_v49 = vpop.f32.mrb[117].mxu1 }
0x21d2   :  { %v3913_v1 = vpop.f32.mrb[118].mxu1 }
0x21d3   :  { %v6307_v2 = vpop.f32.mrb[119].mxu1 }
0x21d8   :  { %v4018_v4 = vpop.f32.mrb[120].mxu1 }
0x21d9   :  { %v4024_v6 = vpack.c.bf16 %v4018_v4, %v3910_v0  ;;  %v6318_v9 = vpop.f32.mrb[121].mxu1 }
0x21da   :  { %v4021_v10 = vpop.f32.mrb[122].mxu1 }
0x21db   :  { %v6319_v26 = vpop.f32.mrb[123].mxu1  ;;  %6323 = vmatmul.mubr.msk.bf16.vlgmr.msra.gmra.mrb[104].mxu0 %vm381_vm2, %v4024_v6 }
0x21dc   :  { %6339 = vmatpush3.bf16.msra.mxu0 %v6564_v5  ;;  %6346 = vmatprep.mubr.msk.bf16.mxu0 %vm6708_vm1, %v6707_v15 }
0x21dd   :  { %6340 = vmatprep.subr.bf16.mxu0 %v6707_v15 }
0x21e0   :  { %6341 = vmatpush3.bf16.msra.mxu0 %v6565_v18 }
0x21e1   :  { %6342 = vmatprep.subr.bf16.mxu0 %v6707_v15 }
0x21e4   :  { %6343 = vmatpush3.bf16.msra.mxu0 %v6566_v13 }
0x21e5   :  { %6344 = vmatprep.subr.bf16.mxu0 %v6707_v15 }
0x21e8   :  { %v4155_v3 = vpop.f32.mrb[124].mxu1  ;;  %6345 = vmatpush3.bf16.msra.mxu0 %v6567_v14 }
0x21e9   :  { %v6336_v7 = vpop.f32.mrb[125].mxu1  ;;  %6362 = vmatprep.subr.bf16.mxu0 %v6707_v15 }
0x21ea   :  { %v4158_v8 = vpop.f32.mrb[126].mxu1 }
0x21eb   :  { %v6337_v55 = vpop.f32.mrb[127].mxu1  ;;  %6347 = vmatmul.mubr.msk.bf16.vlgmr.msra.gmra.mrb[108].mxu0 %vm83_vm0, %v7460_v42  ;;  %v4159_v20 = vadd.f32 %v5487_v34, %v4158_v8 }
0x21ec   :  { %6364 = vmatprep.mubr.msk.bf16.mxu0 %vm6708_vm1, %v6707_v15 }
0x21ed   :  { %v4434_v47 = vmul.f32 0.25, %v4159_v20 }
0x21ef   :  { %v4435_v52 = vpack.c.bf16 %v4434_v47, %v4434_v47 }
0x21f8   :  { %v4319_v17 = vpop.f32.mrb[128].mxu1 }
0x21f9   :  { %v6360_v19 = vpop.f32.mrb[129].mxu1 }
0x21fa   :  { %v4322_v51 = vpop.f32.mrb[130].mxu1 }
0x21fb   :  { %v7840_v11 = vadd.f32 %v5517_v21, %v4322_v51  ;;  %v6361_v12 = vpop.f32.mrb[131].mxu1 }
0x21fd   :  { %v4495_v7 = vpack.c.bf16 %v7840_v11, %v7840_v11  ;;  %v6568_v11 = vld [vmem:[%s8043_s10 + $0x38] sm:$0xff]  }
0x21ff   :  { %v4500_v19 = vsel %vm445_vm3, %v4495_v7, 0  ;;  %v6575_v7 = vld [vmem:[%s8049_s16 + $0x50] sm:$0xff]  }
0x22ae   :  { %v4071_v23 = vpop.f32.mrb[104].mxu0 }
0x22af   :  { %v7843_v27 = vadd.f32 %v4071_v23, %v7738_v54  ;;  %v6324_v28 = vpop.f32.mrb[105].mxu0  ;;  %v4156_v54 = vadd.f32 %v5487_v34, %v4155_v3 }
0x22b0   :  { %v4074_v29 = vpop.f32.mrb[106].mxu0 }
0x22b1   :  { %v7846_v42 = vadd.f32 %v4074_v29, %v7740_v59  ;;  %v6325_v30 = vpop.f32.mrb[107].mxu0  ;;  %v4320_v59 = vadd.f32 %v5517_v21, %v4319_v17  ;;  %v4326_v61 = vmul.f32 0.25, %v4156_v54 }
0x22b3   :  { %v4387_v48 = vpack.c.bf16 %v4320_v59, %v4320_v59  ;;  %v4327_v50 = vpack.c.bf16 %v4326_v61, %v4326_v61 }
0x22b5   :  { %v4392_v53 = vsel %vm445_vm3, %v4387_v48, 0 }
0x22be   :  { %v4237_v41 = vpop.f32.mrb[108].mxu0 }
0x22bf   :  { %v4238_v32 = vadd.f32 %v5502_v31, %v4237_v41  ;;  %v6348_v43 = vpop.f32.mrb[109].mxu0 }
0x22c0   :  { %v4240_v58 = vpop.f32.mrb[110].mxu0 }
0x22c1   :  { %v4328_v35 = vpack.c.bf16 %v4238_v32, %v4238_v32  ;;  %v4241_v16 = vadd.f32 %v5502_v31, %v4240_v58  ;;  %v6349_v44 = vpop.f32.mrb[111].mxu0  ;;  %v5532_v58 = vld [vmem:[%s8044_s11 + $0x1] ss:$0 sm:$0xff] }
0x22c3   :  { %v4333_v22 = vsel %vm381_vm2, %v4328_v35, 0  ;;  %v4436_v45 = vpack.c.bf16 %v4241_v16, %v4241_v16 }
0x22c4   :  { %6363 = vmatpush3.bf16.xpose.msra.mxu0 %v4333_v22 }
0x22c5   :  { %v4441_v46 = vsel %vm381_vm2, %v4436_v45, 0  ;;  %6368 = vmatprep.subr.bf16.mxu0 %v6707_v15 }
0x22c6   :  { %6375 = vmatpush3.bf16.xpose.msra.mxu1 %v4441_v46 }
0x22c7   :  { %6386 = vmatprep.subr.bf16.mxu1 %v6707_v15 }
0x22cb   :  { %6365 = vmatmul.mubr.msk.bf16.vlgmr.msra.gmra.mrb[112].mxu0 %vm381_vm2, %v4327_v50 }
0x22cc   :  { %6369 = vmatpush3.bf16.msra.mxu0 %v4392_v53  ;;  %6370 = vmatprep.mubr.msk.bf16.mxu0 %vm6708_vm1, %v6707_v15 }
0x22cd   :  { %6377 = vmatmul.mubr.msk.bf16.vlgmr.msra.gmra.mrb[132].mxu1 %vm381_vm2, %v4435_v52  ;;  %6380 = vmatprep.subr.bf16.mxu0 %v6707_v15 }
0x22ce   :  { %6388 = vmatprep.mubr.msk.bf16.mxu1 %vm6708_vm1, %v6707_v15  ;;  %6387 = vmatpush3.bf16.msra.mxu1 %v6568_v11 }
0x22cf   :  { %6404 = vmatprep.subr.bf16.mxu1 %v6707_v15 }
0x239e   :  { %v4369_v33 = vpop.f32.mrb[112].mxu0 }
0x239f   :  { %v4370_v56 = vadd.f32 %v7553_v24, %v4369_v33  ;;  %v6366_v57 = vpop.f32.mrb[113].mxu0 }
0x23a0   :  { %v4372_v40 = vpop.f32.mrb[114].mxu0  ;;  %v4477_v60 = vpop.f32.mrb[132].mxu1 }
0x23a1   :  { %v4478_v37 = vadd.f32 %v7560_v25, %v4477_v60  ;;  %v6367_v38 = vpop.f32.mrb[115].mxu0  ;;  %v6378_v62 = vpop.f32.mrb[133].mxu1  ;;  %v4375_v63 = vsel %vm428_vm4, %v4370_v56, -inf  ;;  %v6570_v40 = vld [vmem:[%s8047_s14 + $0x28] sm:$0xff]   ;;  %v6571_v60 = vld [vmem:[%s8047_s14 + $0x30] sm:$0xff]  }
0x23a2   :  { %v4480_v0 = vpop.f32.mrb[134].mxu1  ;;  %4376 = vmax.xlane.f32.xlu0 %v4375_v63 }
0x23a3   :  { %v6379_v49 = vpop.f32.mrb[135].mxu1  ;;  %v4483_v1 = vsel %vm428_vm4, %v4478_v37, -inf }
0x23a4   :  { %4484 = vmax.xlane.f32.xlu1 %v4483_v1 }
0x242f   :  { %v4377_v2 = vpop.xlane.xlu0 %4376 }
0x2430   :  { %v4378_v4 = vsub.f32 %v4370_v56, %v4377_v2 }
0x2431   :  { %v4485_v5 = vpop.xlane.xlu1 %4484 }
0x2432   :  { %v4379_v6 = vmul.f32 1.442695, %v4378_v4  ;;  %v4486_v24 = vsub.f32 %v4478_v37, %v4485_v5  ;;  %v6572_v37 = vld [vmem:[%s8047_s14 + $0x38] sm:$0xff]   ;;  %v5535_v4 = vld [vmem:[%s8045_s12 + $0x1] ss:$0 sm:$0xff] }
0x2434   :  { %6661 = vpow2.f32 %v4379_v6  ;;  %v4487_v9 = vmul.f32 1.442695, %v4486_v24 }
0x2436   :  { %6663 = vpow2.f32 %v4487_v9 }
0x243e   :  { %v6662_v10 = vpop.eup %6661 }
0x243f   :  { %v4381_v25 = vsel %vm428_vm4, %v6662_v10, 0.0 }
0x2440   :  { %v6664_v26 = vpop.eup %6663  ;;  %4382 = vadd.xlane.f32.xlu0 %v4381_v25 }
0x2441   :  { %v4489_v18 = vsel %vm428_vm4, %v6664_v26, 0.0 }
0x2442   :  { %4490 = vadd.xlane.f32.xlu1 %v4489_v18 }
0x24cd   :  { %v4383_v13 = vpop.xlane.xlu0 %4382 }
0x24ce   :  { %6665 = vrcp.f32 %v4383_v13 }
0x24cf   :  { %v4491_v14 = vpop.xlane.xlu1 %4490 }
0x24d0   :  { %6667 = vrcp.f32 %v4491_v14  ;;  %v6573_v14 = vld [vmem:[%s8049_s16 + $0x40] sm:$0xff]  }
0x24d8   :  { %v6666_v3 = vpop.eup %6665 }
0x24d9   :  { %v4385_v8 = vmul.f32 %v6666_v3, %v6662_v10  ;;  %v5536_v10 = vld [vmem:[%s8046_s13 + $0x1] ss:$0 sm:$0xff]  ;;  %v6574_v3 = vld [vmem:[%s8049_s16 + $0x48] sm:$0xff]  }
0x24da   :  { %v6668_v17 = vpop.eup %6667 }
0x24db   :  { %v4386_v55 = vpack.c.bf16 %v4385_v8, %v4385_v8  ;;  %v4493_v21 = vmul.f32 %v6668_v17, %v6664_v26  ;;  %v6576_v8 = vld [vmem:[%s8049_s16 + $0x58] sm:$0xff]   ;;  %v6578_v17 = vld [vmem:[%s8049_s16 + $0x68] sm:$0xff]  }
0x24dd   :  { %6371 = vmatmul.mubr.msk.bf16.vlgmr.msra.gmra.mrb[116].mxu0 %vm428_vm4, %v4386_v55  ;;  %v4494_v51 = vpack.c.bf16 %v4493_v21, %v4493_v21  ;;  %v6577_v55 = vld [vmem:[%s8049_s16 + $0x60] sm:$0xff]   ;;  %v6580_v21 = vld [vmem:[%s8049_s16 + $0x78] sm:$0xff]  }
0x24de   :  { %6381 = vmatpush3.bf16.msra.mxu0 %v4500_v19  ;;  %6382 = vmatprep.mubr.msk.bf16.mxu0 %vm6708_vm1, %v6707_v15  ;;  %v6579_v19 = vld [vmem:[%s8049_s16 + $0x70] sm:$0xff]  }
0x24df   :  { %6392 = vmatprep.subr.bf16.mxu0 %v6707_v15 }
0x24e5   :  { %6383 = vmatmul.mubr.msk.bf16.vlgmr.msra.gmra.mrb[120].mxu0 %vm428_vm4, %v4494_v51  ;;  %v5546_v51 = vld [vmem:[%s8048_s15 + $0x1] ss:$0 sm:$0xff] }
0x24e6   :  { %6400 = vmatprep.mubr.msk.bf16.mxu0 %vm6708_vm1, %v6707_v15 }
0x25b0   :  { %v4428_v12 = vpop.f32.mrb[116].mxu0 }
0x25b1   :  { %v6372_v23 = vpop.f32.mrb[117].mxu0 }
0x25b2   :  { %v4431_v28 = vpop.f32.mrb[118].mxu0 }
0x25b3   :  { %v6373_v29 = vpop.f32.mrb[119].mxu0 }
0x25b8   :  { %v4536_v30 = vpop.f32.mrb[120].mxu0 }
0x25b9   :  { %v4542_v31 = vpack.c.bf16 %v4536_v30, %v4428_v12  ;;  %v6384_v34 = vpop.f32.mrb[121].mxu0 }
0x25ba   :  { %v4539_v41 = vpop.f32.mrb[122].mxu0 }
0x25bb   :  { %v6385_v32 = vpop.f32.mrb[123].mxu0  ;;  %6389 = vmatmul.mubr.msk.bf16.vlgmr.msra.gmra.mrb[136].mxu1 %vm381_vm2, %v4542_v31 }
0x25bc   :  { %6420 = vmatprep.mubr.msk.bf16.mxu1 %vm6708_vm1, %v6707_v15  ;;  %6405 = vmatpush3.bf16.msra.mxu1 %v6573_v14 }
0x25bd   :  { %6406 = vmatprep.subr.bf16.mxu1 %v6707_v15 }
0x25c0   :  { %6407 = vmatpush3.bf16.msra.mxu1 %v6574_v3 }
0x25c1   :  { %6408 = vmatprep.subr.bf16.mxu1 %v6707_v15 }
0x25c4   :  { %6409 = vmatpush3.bf16.msra.mxu1 %v6575_v7 }
0x25c5   :  { %6410 = vmatprep.subr.bf16.mxu1 %v6707_v15 }
0x25c8   :  { %6411 = vmatpush3.bf16.msra.mxu1 %v6576_v8  ;;  %v5580_v8 = vld [vmem:[%s8051_s18 + $0x1] ss:$0 sm:$0xff] }
0x25c9   :  { %6412 = vmatprep.subr.bf16.mxu1 %v6707_v15 }
0x25cc   :  { %6413 = vmatpush3.bf16.msra.mxu1 %v6577_v55 }
0x25cd   :  { %6414 = vmatprep.subr.bf16.mxu1 %v6707_v15 }
0x25d0   :  { %6415 = vmatpush3.bf16.msra.mxu1 %v6578_v17 }
0x25d1   :  { %6416 = vmatprep.subr.bf16.mxu1 %v6707_v15 }
0x25d4   :  { %6417 = vmatpush3.bf16.msra.mxu1 %v6579_v19 }
0x25d5   :  { %6418 = vmatprep.subr.bf16.mxu1 %v6707_v15 }
0x25d8   :  { %6419 = vmatpush3.bf16.msra.mxu1 %v6580_v21 }
0x268e   :  { %v4589_v43 = vpop.f32.mrb[136].mxu1 }
0x268f   :  { %v4596_v54 = vadd.f32 %v4589_v43, %v7843_v27  ;;  %v6390_v35 = vpop.f32.mrb[137].mxu1 }
0x2690   :  { %v4592_v16 = vpop.f32.mrb[138].mxu1 }
0x2691   :  { %v4606_v44 = vadd.f32 %v5532_v58, %v4596_v54  ;;  %v4597_v20 = vadd.f32 %v4592_v16, %v7846_v42  ;;  %v6391_v59 = vpop.f32.mrb[139].mxu1 }
0x2693   :  { %v4607_v22 = vadd.f32 %v5532_v58, %v4597_v20  ;;  %v4608_v45 = vadd.f32 %v4606_v44, %v7451_v36 }
0x2695   :  { %v4614_v61 = vsel %vm83_vm0, %v4608_v45, 0.0  ;;  %v4609_v46 = vadd.f32 %v4607_v22, %v7453_v39  ;;  %v6569_v39 = vld [vmem:[%s8047_s14 + $0x20] sm:$0xff]  }
0x2696   :  { %4615 = vadd.xlane.f32.xlu0 %v4614_v61  ;;  %6393 = vmatpush3.bf16.msra.mxu0 %v6569_v39 }
0x2697   :  { %v4617_v47 = vsel %vm83_vm0, %v4609_v46, 0.0  ;;  %6394 = vmatprep.subr.bf16.mxu0 %v6707_v15 }
0x2698   :  { %4618 = vadd.xlane.f32.xlu1 %v4617_v47 }
0x269a   :  { %6395 = vmatpush3.bf16.msra.mxu0 %v6570_v40 }
0x269b   :  { %6396 = vmatprep.subr.bf16.mxu0 %v6707_v15 }
0x269e   :  { %6397 = vmatpush3.bf16.msra.mxu0 %v6571_v60 }
0x269f   :  { %6398 = vmatprep.subr.bf16.mxu0 %v6707_v15 }
0x26a2   :  { %6399 = vmatpush3.bf16.msra.mxu0 %v6572_v37 }
0x26a3   :  { %6424 = vmatprep.subr.bf16.mxu0 %v6707_v15 }
0x2723   :  { %v4616_v48 = vpop.xlane.xlu0 %4615 }
0x2724   :  { %v4620_v50 = vmul.f32 0.015625, %v4616_v48 }
0x2725   :  { %v4619_v27 = vpop.xlane.xlu1 %4618 }
0x2726   :  { %v4622_v52 = vsub.f32 %v4608_v45, %v4620_v50  ;;  %v4621_v53 = vmul.f32 0.015625, %v4619_v27  ;;  %v5569_v27 = vld [vmem:[%s8050_s17 + $0x1] ss:$0 sm:$0xff] }
0x2728   :  { %v4623_v33 = vsub.f32 %v4609_v46, %v4621_v53  ;;  %v4624_v56 = vmul.f32 %v4622_v52, %v4622_v52 }
0x272a   :  { %v4626_v42 = vsel %vm83_vm0, %v4624_v56, 0.0  ;;  %v4625_v57 = vmul.f32 %v4623_v33, %v4623_v33 }
0x272b   :  { %4627 = vadd.xlane.f32.xlu0 %v4626_v42 }
0x272c   :  { %v4629_v36 = vsel %vm83_vm0, %v4625_v57, 0.0 }
0x272d   :  { %4630 = vadd.xlane.f32.xlu1 %v4629_v36 }
0x27b8   :  { %v4628_v38 = vpop.xlane.xlu0 %4627 }
0x27b9   :  { %v4632_v62 = vmul.f32 0.015625, %v4628_v38 }
0x27ba   :  { %v4631_v63 = vpop.xlane.xlu1 %4630 }
0x27bb   :  { %v4634_v0 = vadd.f32 1e-12, %v4632_v62  ;;  %v4633_v49 = vmul.f32 0.015625, %v4631_v63 }
0x27bd   :  { %6669 = vrsqrt.f32 %v4634_v0  ;;  %v4635_v1 = vadd.f32 1e-12, %v4633_v49 }
0x27bf   :  { %6671 = vrsqrt.f32 %v4635_v1 }
0x27c7   :  { %v6670_v2 = vpop.eup %6669 }
0x27c8   :  { %v4638_v5 = vmul.f32 %v6670_v2, %v4622_v52 }
0x27c9   :  { %v6672_v6 = vpop.eup %6671 }
0x27ca   :  { %v4646_v24 = vmul.f32 %v5535_v4, %v4638_v5  ;;  %v4639_v9 = vmul.f32 %v6672_v6, %v4623_v33  ;;  %v6581_v6 = vld [vmem:[%s8053_s20] sm:$0xff]  }
0x27cc   :  { %v4647_v25 = vmul.f32 %v5535_v4, %v4639_v9  ;;  %v7922_v26 = vadd.f32 %v5536_v10, %v4646_v24  ;;  %v6582_v24 = vld [vmem:[%s8053_s20 + $0x8] sm:$0xff]   ;;  %v6583_v9 = vld [vmem:[%s8053_s20 + $0x10] sm:$0xff]  }
0x27ce   :  { %v7924_v18 = vadd.f32 %v5536_v10, %v4647_v25  ;;  %v6584_v10 = vld [vmem:[%s8053_s20 + $0x18] sm:$0xff]  }
0x27d0   :  { %v4656_v13 = vpack.c.bf16 %v7924_v18, %v7922_v26 }
0x27d2   :  { %6401 = vmatmul.mubr.msk.bf16.vlgmr.msra.gmra.mrb[124].mxu0 %vm83_vm0, %v4656_v13 }
0x27d3   :  { %6432 = vmatprep.mubr.msk.bf16.mxu0 %vm6708_vm1, %v6707_v15  ;;  %6425 = vmatpush3.bf16.msra.mxu0 %v6581_v6 }
0x27d4   :  { %6426 = vmatprep.subr.bf16.mxu0 %v6707_v15 }
0x27d7   :  { %6427 = vmatpush3.bf16.msra.mxu0 %v6582_v24 }
0x27d8   :  { %6428 = vmatprep.subr.bf16.mxu0 %v6707_v15 }
0x27db   :  { %6429 = vmatpush3.bf16.msra.mxu0 %v6583_v9 }
0x27dc   :  { %6430 = vmatprep.subr.bf16.mxu0 %v6707_v15 }
0x27df   :  { %6431 = vmatpush3.bf16.msra.mxu0 %v6584_v10 }
0x27e0   :  { %6436 = vmatprep.subr.bf16.mxu0 %v6707_v15 }
0x28a5   :  { %v4735_v11 = vpop.f32.mrb[124].mxu0 }
0x28a6   :  { %v4736_v12 = vadd.f32 %v5546_v51, %v4735_v11  ;;  %v6402_v23 = vpop.f32.mrb[125].mxu0 }
0x28a7   :  { %v4738_v28 = vpop.f32.mrb[126].mxu0 }
0x28a8   :  { %v4742_v29 = vmul.f32 %v4736_v12, %v4736_v12  ;;  %v4739_v30 = vadd.f32 %v5546_v51, %v4738_v28  ;;  %v6403_v31 = vpop.f32.mrb[127].mxu0  ;;  %v5581_v51 = vld [vmem:[%s8052_s19 + $0x1] ss:$0 sm:$0xff] }
0x28a9   :  { %v6585_v28 = vld [vmem:[%s8055_s22] sm:$0xff]   ;;  %v6587_v31 = vld [vmem:[%s8055_s22 + $0x10] sm:$0xff]  }
0x28aa   :  { %v4744_v34 = vmul.f32 %v4742_v29, %v4736_v12  ;;  %v4743_v41 = vmul.f32 %v4739_v30, %v4739_v30 }
0x28ac   :  { %v4746_v32 = vmul.f32 0.044715, %v4744_v34  ;;  %v4745_v43 = vmul.f32 %v4743_v41, %v4739_v30  ;;  %v6588_v34 = vld [vmem:[%s8055_s22 + $0x18] sm:$0xff]   ;;  %v5582_v41 = vld [vmem:[%s8054_s21] ss:$0 sm:$0xff] }
0x28ae   :  { %v4748_v58 = vadd.f32 %v4746_v32, %v4736_v12  ;;  %v4747_v54 = vmul.f32 0.044715, %v4745_v43 }
0x28b0   :  { %v4750_v35 = vmul.f32 0.7978846, %v4748_v58  ;;  %v4749_v16 = vadd.f32 %v4747_v54, %v4739_v30 }
0x28b2   :  { %6673 = vtanh.f32 %v4750_v35  ;;  %v4751_v44 = vmul.f32 0.7978846, %v4749_v16 }
0x28b4   :  { %6675 = vtanh.f32 %v4751_v44 }
0x28bc   :  { %v6674_v20 = vpop.eup %6673 }
0x28bd   :  { %v4754_v59 = vadd.f32 1.0, %v6674_v20 }
0x28be   :  { %v6676_v22 = vpop.eup %6675 }
0x28bf   :  { %v4756_v45 = vmul.f32 0.5, %v4754_v59  ;;  %v4755_v61 = vadd.f32 1.0, %v6676_v22 }
0x28c1   :  { %v4757_v46 = vmul.f32 0.5, %v4755_v61  ;;  %v4758_v47 = vmul.f32 %v4756_v45, %v4736_v12 }
0x28c3   :  { %v4759_v48 = vmul.f32 %v4757_v46, %v4739_v30  ;;  %v6586_v30 = vld [vmem:[%s8055_s22 + $0x8] sm:$0xff]   ;;  %s6709_s22 = smov [#allocation2]  }
0x28c4   :  { %s5100_s26 = sshll.u32 %s6709_s22, 4  ;;  %s5101_s26 = int_to_ptr.vmem [resolvable:$true] %s5100_s26 }
0x28c5   :  { %v4760_v50 = vpack.c.bf16 %v4759_v48, %v4758_v47  ;;  %s6683_s21 = scalar_lea.vmem %s5101_s26, 256  ;;  %p6688_p1 = scmp.lt.s32.totalorder %s5101_s26, %s5101_s26 }
0x28c6   :  { %p6684_p0 = scmp.ne.s32.totalorder %s5101_s26, %s6683_s21  ;;  %p6689_p2 = scmp.lt.s32.totalorder %s6683_s21, %s6683_s21 }
0x28c7   :  { %6421 = vmatmul.mubr.bf16.vlgmr.msra.gmra.mrb[140].mxu1 %v4760_v50 }
0x28c8   :  { %p6690_p3 = por %p6689_p2, %p6688_p1 }
0x28ca   :  { %p6691_p4 = pnand %p6690_p3, %p6684_p0 }
0x299a   :  { %v4868_v52 = vpop.f32.mrb[140].mxu1 }
0x299b   :  { %v4869_v53 = vadd.f32 %v5569_v27, %v4868_v52  ;;  %v6422_v33 = vpop.f32.mrb[141].mxu1 }
0x299c   :  { %v4871_v56 = vpop.f32.mrb[142].mxu1 }
0x299d   :  { %v4872_v42 = vadd.f32 %v5569_v27, %v4871_v56  ;;  %v6423_v57 = vpop.f32.mrb[143].mxu1  ;;  %v4875_v36 = vadd.f32 %v4869_v53, %v7922_v26 }
0x299f   :  { %v4881_v39 = vsel %vm83_vm0, %v4875_v36, 0.0  ;;  %v4876_v40 = vadd.f32 %v4872_v42, %v7924_v18 }
0x29a0   :  { %4882 = vadd.xlane.f32.xlu0 %v4881_v39 }
0x29a1   :  { %v4884_v60 = vsel %vm83_vm0, %v4876_v40, 0.0 }
0x29a2   :  { %4885 = vadd.xlane.f32.xlu1 %v4884_v60 }
0x2a2d   :  { %v4883_v37 = vpop.xlane.xlu0 %4882 }
0x2a2e   :  { %v4887_v38 = vmul.f32 0.015625, %v4883_v37 }
0x2a2f   :  { %v4886_v62 = vpop.xlane.xlu1 %4885 }
0x2a30   :  { %v4889_v63 = vsub.f32 %v4875_v36, %v4887_v38  ;;  %v4888_v0 = vmul.f32 0.015625, %v4886_v62 }
0x2a32   :  { %v4890_v49 = vsub.f32 %v4876_v40, %v4888_v0  ;;  %v4891_v1 = vmul.f32 %v4889_v63, %v4889_v63 }
0x2a34   :  { %v4893_v2 = vsel %vm83_vm0, %v4891_v1, 0.0  ;;  %v4892_v4 = vmul.f32 %v4890_v49, %v4890_v49 }
0x2a35   :  { %4894 = vadd.xlane.f32.xlu0 %v4893_v2 }
0x2a36   :  { %v4896_v5 = vsel %vm83_vm0, %v4892_v4, 0.0 }
0x2a37   :  { %4897 = vadd.xlane.f32.xlu1 %v4896_v5 }
0x2ac2   :  { %v4895_v25 = vpop.xlane.xlu0 %4894 }
0x2ac3   :  { %v4899_v26 = vmul.f32 0.015625, %v4895_v25 }
0x2ac4   :  { %v4898_v18 = vpop.xlane.xlu1 %4897 }
0x2ac5   :  { %v4901_v13 = vadd.f32 1e-12, %v4899_v26  ;;  %v4900_v14 = vmul.f32 0.015625, %v4898_v18 }
0x2ac7   :  { %6677 = vrsqrt.f32 %v4901_v13  ;;  %v4902_v3 = vadd.f32 1e-12, %v4900_v14 }
0x2ac9   :  { %6679 = vrsqrt.f32 %v4902_v3 }
0x2ad1   :  { %v6678_v7 = vpop.eup %6677 }
0x2ad2   :  { %v4905_v55 = vmul.f32 %v6678_v7, %v4889_v63 }
0x2ad3   :  { %v6680_v17 = vpop.eup %6679 }
0x2ad4   :  { %v4913_v19 = vmul.f32 %v5580_v8, %v4905_v55  ;;  %v4906_v21 = vmul.f32 %v6680_v17, %v4890_v49 }
0x2ad6   :  { %v4914_v11 = vmul.f32 %v5580_v8, %v4906_v21  ;;  %v4921_v12 = vadd.f32 %v5581_v51, %v4913_v19 }
0x2ad8   :  { %v4922_v23 = vadd.f32 %v5581_v51, %v4914_v11 }
0x2ada   :  { %v4923_v29 = vpack.c.bf16 %v4922_v23, %v4921_v12 }
0x2adc   :  { %6433 = vmatmul.mubr.msk.bf16.vlgmr.msra.gmra.mrb[128].mxu0 %vm83_vm0, %v4923_v29 }
0x2add   :  { %6437 = vmatpush3.bf16.msra.mxu0 %v6585_v28  ;;  %6444 = vmatprep.mubr.msk.bf16.mxu0 %vm6708_vm1, %v6707_v15 }
0x2ade   :  { %6438 = vmatprep.subr.bf16.mxu0 %v6707_v15 }
0x2ae1   :  { %6439 = vmatpush3.bf16.msra.mxu0 %v6586_v30 }
0x2ae2   :  { %6440 = vmatprep.subr.bf16.mxu0 %v6707_v15 }
0x2ae5   :  { %6441 = vmatpush3.bf16.msra.mxu0 %v6587_v31 }
0x2ae6   :  { %6442 = vmatprep.subr.bf16.mxu0 %v6707_v15  ;;  %v5588_v15 = vld [vmem:[%s8056_s23] ss:$0 sm:$0xff] }
0x2ae9   :  { %6443 = vmatpush3.bf16.msra.mxu0 %v6588_v34 }
0x2baf   :  { %v5000_v32 = vpop.f32.mrb[128].mxu0 }
0x2bb0   :  { %v5001_v43 = vadd.f32 %v5582_v41, %v5000_v32  ;;  %v6434_v58 = vpop.f32.mrb[129].mxu0 }
0x2bb1   :  { %v5003_v54 = vpop.f32.mrb[130].mxu0 }
0x2bb2   :  { %v5004_v35 = vadd.f32 %v5582_v41, %v5003_v54  ;;  %v6435_v16 = vpop.f32.mrb[131].mxu0  ;;  %v5007_v44 = vmax.f32 %v5001_v43, 0.0 }
0x2bb4   :  { %v5008_v20 = vmax.f32 %v5004_v35, 0.0 }
0x2bb6   :  { %v5009_v59 = vpack.c.bf16 %v5008_v20, %v5007_v44 }
0x2bb8   :  { %6445 = vmatmul.mubr.msk.bf16.vlgmr.msra.gmra.mrb[132].mxu0 %vm83_vm0, %v5009_v59 }
0x2c8b   :  { %v5086_v22 = vpop.f32.mrb[132].mxu0 }
0x2c8c   :  { %v5087_v45 = vadd.f32 %v5588_v15, %v5086_v22  ;;  %v6446_v61 = vpop.f32.mrb[133].mxu0 }
0x2c8d   :  { %v5089_v46 = vpop.f32.mrb[134].mxu0 }
0x2c8e   :  { %5093 = vst [vmem:[#allocation2] sm:$0xff] %v5087_v45  ;;  %v5090_v47 = vadd.f32 %v5588_v15, %v5089_v46  ;;  %v6447_v48 = vpop.f32.mrb[135].mxu0 }
0x2c90   :  { %5094 = vst [vmem:[#allocation2 + $0x8] sm:$0xff] %v5090_v47 }
0x2c91   :  { %6694 = shalt.err (!%p6691_p4)
}
0x2c92   :  { %s6695_s16 = scalar_lea.hbm %s8057_s24, 256 }
0x2c93   :  { %p6696_p5 = scmp.ne.s32.totalorder %s8057_s24, %s6695_s16  ;;  %p6699_p6 = scmp.lt.u32.totalorder %s6695_s16, %s8057_s24 }
0x2c95   :  { %p6701_p7 = pnand %p6699_p6, %p6696_p5 }
0x2c97   :  { %6704 = shalt.err (!%p6701_p7)
}
0x2c98   :  { %s6710_s12 = smov 128   ;;  %s6711_s2 = smov 8  }
0x2c99   :  { %5106 = dma.vmem_to_hbm [thread:$0]  %s5101_s26, 256, %s8057_s24, [#allocation3], %s6710_s12, %s6710_s12, %s6711_s2  }
0x2c9a   :  { %6705 = dma.done.wait [#allocation3], 256  }
0x2c9b   :  { %6706 = vsyncadd [#allocation3], 4294967040 }
0x2c9c   :  { %5110 = vsyncpa [#allocation3], 1 }

</bundles_post_ra>
